<compile_context>
chip_gen: v7x
topology: tpu7x:2x2x1
jax: 0.10.0
libtpu: 0.0.40
codegen_flags: <defaults>
</compile_context>

<pallas_src>
import jax
import jax.numpy as jnp
from jax.experimental import pallas as pl
from jax.experimental.pallas import tpu as pltpu

F_IN = 1433            # concatenated node scalar feature width
NS, NV = 128, 2        # node (scalar, vector) dims of GVPConvLayer
ES, EV = 8, 1          # edge (scalar, vector) dims
FF_S, FF_V = 4 * NS, 2 * NV   # feed-forward hidden dims (512, 4)

_EPS_NORM = 1e-8       # gvp _norm_no_nan eps
_EPS_LN = 1e-5         # nn.LayerNorm default eps

_TILE_N = 1024         # node-row tile
_TILE_E = 2048         # edge-row tile
_VMEM_LIMIT = 32 * 1024 * 1024   # safe on v5e/v6e (128 MiB) and v7x (64 MiB)


# ----------------------------------------------------------------------------
# small static helpers
# ----------------------------------------------------------------------------
def _cdiv(a, b):
    return -(-a // b)


def _round_up(x, m):
    return ((x + m - 1) // m) * m


def _pick_tile(n, target):
    """<= target, multiple of 8, and <= ~n/2 so there are >=2 grid steps (v7x 2 TCs)."""
    half = _round_up(max(_cdiv(n, 2), 1), 8)
    return max(8, min(target, half))


def _pack_vec(v):
    """(M, C, 3) torch-style vectors -> lane-packed (M, 3*C) = [x.. | y.. | z..]."""
    m, c, _ = v.shape
    return jnp.transpose(v, (0, 2, 1)).reshape(m, 3 * c)


def _blockdiag3(w):
    """(r, c) -> (3r, 3c) block-diagonal: applies w to each xyz component at once."""
    return jnp.kron(jnp.eye(3, dtype=w.dtype), w)


def _res(a):
    """Resident (weight) BlockSpec: whole array, constant block index."""
    nd = a.ndim
    return pl.BlockSpec(a.shape, lambda *_: (0,) * nd)


def _cparams():
    return pltpu.CompilerParams(
        dimension_semantics=("parallel",),
        vmem_limit_bytes=_VMEM_LIMIT)


# ----------------------------------------------------------------------------
# in-kernel math (lane-packed vectors; elementwise f32, matmuls bf16 on MXU)
# ----------------------------------------------------------------------------
def _bdot(a, w_bf16):
    """bf16 MXU matmul with f32 accumulation (activation cast in VMEM)."""
    return jnp.dot(a.astype(jnp.bfloat16), w_bf16, preferred_element_type=jnp.float32)


def _vnorm3(v):
    """packed (M, 3C) vectors -> per-channel L2 norms (M, C), gvp-style eps clamp."""
    c = v.shape[-1] // 3
    vx, vy, vz = v[:, :c], v[:, c:2 * c], v[:, 2 * c:]
    return jnp.sqrt(jnp.maximum(vx * vx + vy * vy + vz * vz, _EPS_NORM))


def _vgate(v, gate):
    """multiply packed (M, 3C) vectors by per-channel gate (M, C)."""
    return v * jnp.concatenate([gate, gate, gate], axis=-1)


def _scalar_ln(x, g, b):
    mu = jnp.mean(x, axis=-1, keepdims=True)
    var = jnp.mean((x - mu) ** 2, axis=-1, keepdims=True)
    return (x - mu) * jax.lax.rsqrt(var + _EPS_LN) * g + b


def _vec_ln_packed(v):
    """gvp.LayerNorm vector half on lane-packed (M, 3*C)."""
    c = v.shape[-1] // 3
    vx, vy, vz = v[:, :c], v[:, c:2 * c], v[:, 2 * c:]
    ss = jnp.maximum(vx * vx + vy * vy + vz * vz, _EPS_NORM)        # (M, C)
    inv = jax.lax.rsqrt(jnp.mean(ss, axis=-1, keepdims=True))       # (M, 1)
    return v * inv


# ----------------------------------------------------------------------------
# Pallas kernels
# ----------------------------------------------------------------------------
def _linear_kernel(x_ref, w_ref, b_ref, o_ref):
    """1433->128 linear; x streamed f32, cast to bf16 in VMEM, f32 accumulation."""
    x = x_ref[...].astype(jnp.bfloat16)
    o_ref[...] = jnp.dot(x, w_ref[...], preferred_element_type=jnp.float32) + b_ref[...]


def _edge_message_kernel(sj_ref, es_ref, si_ref, vj_ref, ev_ref, vi_ref,
                         wh1j_ref, wh1e_ref, wh1i_ref,
                         ws1j_ref, ws1e_ref, ws1i_ref, ws1n_ref, wv1_ref,
                         wh2_ref, ws2s_ref, ws2n_ref, wv2_ref,
                         wh3_ref, ws3s_ref, ws3n_ref, wv3_ref,
                         b_ref,
                         ms_ref, mv_ref):
    """3-layer GVP message stack over a tile of edges (gather done in wrapper).

    No in-kernel concat: the (s_j | edge_s | s_i | vn) and (v_j | edge_v | v_i)
    concatenations are replaced by split matmuls against statically-sliced weights.
    """
    f32 = jnp.float32

    # ---- GVP 1: ((2*NS+ES), (2*NV+EV)) -> (NS, NV); ReLU + vector sigmoid gate
    vh = (jnp.dot(vj_ref[...], wh1j_ref[...], preferred_element_type=f32)
          + jnp.dot(ev_ref[...], wh1e_ref[...], preferred_element_type=f32)
          + jnp.dot(vi_ref[...], wh1i_ref[...], preferred_element_type=f32))    # (M, 3*h1)
    vn = _vnorm3(vh)                                                             # (M, h1)
    s = (_bdot(sj_ref[...], ws1j_ref[...]) + _bdot(es_ref[...], ws1e_ref[...])
         + _bdot(si_ref[...], ws1i_ref[...]) + _bdot(vn, ws1n_ref[...])
         + b_ref[0, :])
    s = jnp.maximum(s, 0.0)
    v = jnp.dot(vh, wv1_ref[...], preferred_element_type=f32)                    # (M, 3*NV)
    v = _vgate(v, jax.nn.sigmoid(_vnorm3(v)))

    # ---- GVP 2: (NS, NV) -> (NS, NV); ReLU + vector sigmoid gate
    vh = jnp.dot(v, wh2_ref[...], preferred_element_type=f32)
    vn = _vnorm3(vh)
    s = _bdot(s, ws2s_ref[...]) + _bdot(vn, ws2n_ref[...]) + b_ref[1, :]
    s = jnp.maximum(s, 0.0)
    v = jnp.dot(vh, wv2_ref[...], preferred_element_type=f32)
    v = _vgate(v, jax.nn.sigmoid(_vnorm3(v)))

    # ---- GVP 3: (NS, NV) -> (NS, NV); no activations
    vh = jnp.dot(v, wh3_ref[...], preferred_element_type=f32)
    vn = _vnorm3(vh)
    s = _bdot(s, ws3s_ref[...]) + _bdot(vn, ws3n_ref[...]) + b_ref[2, :]
    v = jnp.dot(vh, wv3_ref[...], preferred_element_type=f32)

    ms_ref[...] = s
    mv_ref[...] = v


def _node_update_kernel(s_ref, v_ref, dhs_ref, dhv_ref, cnt_ref,
                        pk_ref, f1wh_ref, f1wss_ref, f1wsn_ref, f1b_ref, f1wv_ref,
                        f2wh_ref, f2wss_ref, f2wsn_ref, ro_b_ref,
                        out_ref):
    """scatter-mean finalize -> residual+LN -> feed-forward GVPs -> residual+LN -> read_out.

    pk_ref rows: [ln0_g, ln0_b, f2_b, ln1_g, ln1_b, ro_w]  (coalesced tiny constants)
    """
    f32 = jnp.float32
    inv_deg = 1.0 / jnp.maximum(cnt_ref[...], 1.0)                   # (M, 1)

    s = s_ref[...] + dhs_ref[...] * inv_deg        # Dropout is identity in eval mode
    v = v_ref[...] + dhv_ref[...] * inv_deg
    s = _scalar_ln(s, pk_ref[0, :], pk_ref[1, :])
    v = _vec_ln_packed(v)

    # feed-forward GVP 1: (128,2)->(512,4); ReLU + vector sigmoid gate
    vh = jnp.dot(v, f1wh_ref[...], preferred_element_type=f32)        # (M, 12)
    vn = _vnorm3(vh)
    fs = _bdot(s, f1wss_ref[...]) + _bdot(vn, f1wsn_ref[...]) + f1b_ref[...]
    fs = jnp.maximum(fs, 0.0)
    fv = jnp.dot(vh, f1wv_ref[...], preferred_element_type=f32)       # (M, 12)
    fv = _vgate(fv, jax.nn.sigmoid(_vnorm3(fv)))

    # feed-forward GVP 2: (512,4)->(128,2); no activations; vector output unused downstream
    vh2 = jnp.dot(fv, f2wh_ref[...], preferred_element_type=f32)
    vn2 = _vnorm3(vh2)
    fs2 = _bdot(fs, f2wss_ref[...]) + _bdot(vn2, f2wsn_ref[...]) + pk_ref[2, :]

    s2 = _scalar_ln(s + fs2, pk_ref[3, :], pk_ref[4, :])
    # read_out: elementwise multiply + lane reduction (no width-1 MXU matvec)
    out_ref[...] = jax.nn.sigmoid(
        jnp.sum(s2 * pk_ref[5, :], axis=-1, keepdims=True) + ro_b_ref[...])


# ----------------------------------------------------------------------------
# Parameter construction (deterministic synthetic init; shapes follow the module)
# ----------------------------------------------------------------------------
def init_params(key):
    keys = iter(jax.random.split(key, 64))

    def w(shape, scale=0.05):
        return jax.random.normal(next(keys), shape, dtype=jnp.float32) * scale

    p = {}
    # linear_scalar: nn.Linear(1433, 128)   (stored as (in, out) for right-multiply)
    p["lin_w"], p["lin_b"] = w((F_IN, NS)), w((1, NS))

    # GVPConv message stack: GVP((264,5)->(128,2)), GVP((128,2)->(128,2)) x2
    si1, vi1 = 2 * NS + ES, 2 * NV + EV          # 264, 5
    h1 = max(vi1, NV)                            # 5
    p["m1_wh"], p["m1_ws"] = w((vi1, h1)), w((si1 + h1, NS))
    p["m1_b"], p["m1_wv"] = w((1, NS)), w((h1, NV))
    h2 = max(NV, NV)                             # 2
    for name in ("m2", "m3"):
        p[f"{name}_wh"], p[f"{name}_ws"] = w((NV, h2)), w((NS + h2, NS))
        p[f"{name}_b"], p[f"{name}_wv"] = w((1, NS)), w((h2, NV))

    # LayerNorms (scalar affine only, as in gvp.LayerNorm)
    p["ln0_g"], p["ln0_b"] = jnp.ones((1, NS), jnp.float32), jnp.zeros((1, NS), jnp.float32)
    p["ln1_g"], p["ln1_b"] = jnp.ones((1, NS), jnp.float32), jnp.zeros((1, NS), jnp.float32)

    # feed-forward GVPs: (128,2)->(512,4)->(128,2)
    hf1 = max(NV, FF_V)                          # 4
    p["f1_wh"], p["f1_ws"] = w((NV, hf1)), w((NS + hf1, FF_S))
    p["f1_b"], p["f1_wv"] = w((1, FF_S)), w((hf1, FF_V))
    hf2 = max(FF_V, NV)                          # 4
    p["f2_wh"], p["f2_ws"] = w((FF_V, hf2)), w((FF_S + hf2, NS))
    p["f2_b"], p["f2_wv"] = w((1, NS)), w((hf2, NV))

    # read_out: nn.Linear(128, 1)
    p["ro_w"], p["ro_b"] = w((NS, 1)), w((1, 1))
    return p


# ----------------------------------------------------------------------------
# Forward pass (Pallas) and pure-JAX reference
# ----------------------------------------------------------------------------
def scoring_model_forward(params, node_scalar_raw, node_vec, edge_index,
                          edge_s, edge_vec, labels):
    N = node_scalar_raw.shape[0]
    E = edge_index.shape[1]

    tile_n = _pick_tile(N, _TILE_N)
    tile_e = _pick_tile(E, _TILE_E)
    grid_n = _cdiv(N, tile_n)
    grid_e = _cdiv(E, tile_e)

    bf = lambda a: a.astype(jnp.bfloat16)
    blk = _blockdiag3

    # ---------------- 1) linear_scalar: tiled, pipelined, bf16 MXU ----------------
    lin_w_bf16 = bf(params["lin_w"])
    s0 = pl.pallas_call(
        _linear_kernel,
        out_shape=jax.ShapeDtypeStruct((N, NS), jnp.float32),
        grid=(grid_n,),
        in_specs=[pl.BlockSpec((tile_n, F_IN), lambda i: (i, 0)),
                  _res(lin_w_bf16),
                  _res(params["lin_b"])],
        out_specs=pl.BlockSpec((tile_n, NS), lambda i: (i, 0)),
        compiler_params=_cparams(),
    )(node_scalar_raw, lin_w_bf16, params["lin_b"])

    # ---------------- 2) per-edge gather (XLA) + GVP message kernel ----------------
    src = edge_index[0].astype(jnp.int32)
    dst = edge_index[1].astype(jnp.int32)

    v0p = _pack_vec(node_vec)                  # (N, 3*NV)  lane-packed [x|y|z]
    evp = _pack_vec(edge_vec)                  # (E, 3*EV)

    s_j = jnp.take(s0, src, axis=0)            # (E, NS)
    s_i = jnp.take(s0, dst, axis=0)
    v_j = jnp.take(v0p, src, axis=0)           # (E, 3*NV)
    v_i = jnp.take(v0p, dst, axis=0)

    # GVP1 weight splits: scalar rows follow cat([s_j, edge_s, s_i, vn]);
    # vector rows follow cat-channels [v_j(2), edge_v(1), v_i(2)].
    m1_wh, m1_ws = params["m1_wh"], params["m1_ws"]
    wh1j, wh1e, wh1i = blk(m1_wh[:NV]), blk(m1_wh[NV:NV + EV]), blk(m1_wh[NV + EV:])
    ws1j = bf(m1_ws[:NS])
    ws1e = bf(m1_ws[NS:NS + ES])
    ws1i = bf(m1_ws[NS + ES:2 * NS + ES])
    ws1n = bf(m1_ws[2 * NS + ES:])
    wv1 = blk(params["m1_wv"])
    wh2, wv2 = blk(params["m2_wh"]), blk(params["m2_wv"])
    wh3, wv3 = blk(params["m3_wh"]), blk(params["m3_wv"])
    ws2s, ws2n = bf(params["m2_ws"][:NS]), bf(params["m2_ws"][NS:])
    ws3s, ws3n = bf(params["m3_ws"][:NS]), bf(params["m3_ws"][NS:])
    msg_b = jnp.concatenate([params["m1_b"], params["m2_b"], params["m3_b"]], axis=0)

    edge_inputs = (s_j, edge_s, s_i, v_j, evp, v_i)
    edge_weights = (wh1j, wh1e, wh1i, ws1j, ws1e, ws1i, ws1n, wv1,
                    wh2, ws2s, ws2n, wv2,
                    wh3, ws3s, ws3n, wv3,
                    msg_b)

    msg_s, msg_v = pl.pallas_call(
        _edge_message_kernel,
        out_shape=(jax.ShapeDtypeStruct((E, NS), jnp.float32),
                   jax.ShapeDtypeStruct((E, 3 * NV), jnp.float32)),
        grid=(grid_e,),
        in_specs=[pl.BlockSpec((tile_e, a.shape[1]), lambda i: (i, 0))
                  for a in edge_inputs]
                 + [_res(w) for w in edge_weights],
        out_specs=(pl.BlockSpec((tile_e, NS), lambda i: (i, 0)),
                   pl.BlockSpec((tile_e, 3 * NV), lambda i: (i, 0))),
        compiler_params=_cparams(),
    )(*edge_inputs, *edge_weights)

    # scatter-add onto target nodes (XLA scatter; mean division folded into node kernel)
    cnt = jnp.zeros((N, 1), jnp.float32).at[dst].add(1.0)
    dh_s = jnp.zeros((N, NS), jnp.float32).at[dst].add(msg_s)
    dh_v = jnp.zeros((N, 3 * NV), jnp.float32).at[dst].add(msg_v)

    # ---------------- 3) node residual/LN/feed-forward/LN + read_out ----------------
    f1wh, f1wv = blk(params["f1_wh"]), blk(params["f1_wv"])
    f1wss, f1wsn = bf(params["f1_ws"][:NS]), bf(params["f1_ws"][NS:])
    f2wh = blk(params["f2_wh"])
    f2wss, f2wsn = bf(params["f2_ws"][:FF_S]), bf(params["f2_ws"][FF_S:])
    node_pk = jnp.concatenate(
        [params["ln0_g"], params["ln0_b"], params["f2_b"],
         params["ln1_g"], params["ln1_b"], params["ro_w"].reshape(1, NS)], axis=0)

    node_weights = (node_pk, f1wh, f1wss, f1wsn, params["f1_b"], f1wv,
                    f2wh, f2wss, f2wsn, params["ro_b"])

    out = pl.pallas_call(
        _node_update_kernel,
        out_shape=jax.ShapeDtypeStruct((N, 1), jnp.float32),
        grid=(grid_n,),
        in_specs=[pl.BlockSpec((tile_n, NS), lambda i: (i, 0)),
                  pl.BlockSpec((tile_n, 3 * NV), lambda i: (i, 0)),
                  pl.BlockSpec((tile_n, NS), lambda i: (i, 0)),
                  pl.BlockSpec((tile_n, 3 * NV), lambda i: (i, 0)),
                  pl.BlockSpec((tile_n, 1), lambda i: (i, 0))]
                 + [_res(w) for w in node_weights],
        out_specs=pl.BlockSpec((tile_n, 1), lambda i: (i, 0)),
        compiler_params=_cparams(),
    )(s0, v0p, dh_s, dh_v, cnt, *node_weights)

    return out[:, 0], labels


# ---------------- pure-JAX (f32, per-component) reference of the module ----------------
def _gvp_ref(s, vx, vy, vz, wh, ws_w, ws_b, wv, scalar_relu, vector_sigmoid):
    f32 = jnp.float32
    vhx = jnp.dot(vx, wh, preferred_element_type=f32)
    vhy = jnp.dot(vy, wh, preferred_element_type=f32)
    vhz = jnp.dot(vz, wh, preferred_element_type=f32)
    vn = jnp.sqrt(jnp.maximum(vhx * vhx + vhy * vhy + vhz * vhz, _EPS_NORM))
    s_out = jnp.dot(jnp.concatenate([s, vn], axis=-1), ws_w,
                    preferred_element_type=f32) + ws_b
    vox = jnp.dot(vhx, wv, preferred_element_type=f32)
    voy = jnp.dot(vhy, wv, preferred_element_type=f32)
    voz = jnp.dot(vhz, wv, preferred_element_type=f32)
    if vector_sigmoid:
        nrm = jnp.sqrt(jnp.maximum(vox * vox + voy * voy + voz * voz, _EPS_NORM))
        gate = jax.nn.sigmoid(nrm)
        vox, voy, voz = vox * gate, voy * gate, voz * gate
    if scalar_relu:
        s_out = jnp.maximum(s_out, 0.0)
    return s_out, vox, voy, voz


def _vec_ln_ref(vx, vy, vz):
    ss = jnp.maximum(vx * vx + vy * vy + vz * vz, _EPS_NORM)
    inv = jax.lax.rsqrt(jnp.mean(ss, axis=-1, keepdims=True))
    return vx * inv, vy * inv, vz * inv


def reference_forward(params, node_scalar_raw, node_vec, edge_index,
                      edge_s, edge_vec, labels):
    N = node_scalar_raw.shape[0]
    s = node_scalar_raw @ params["lin_w"] + params["lin_b"]
    vx, vy, vz = node_vec[..., 0], node_vec[..., 1], node_vec[..., 2]
    evx, evy, evz = edge_vec[..., 0], edge_vec[..., 1], edge_vec[..., 2]
    src, dst = edge_index[0], edge_index[1]

    s_cat = jnp.concatenate([s[src], edge_s, s[dst]], axis=-1)
    cx = jnp.concatenate([vx[src], evx, vx[dst]], axis=-1)
    cy = jnp.concatenate([vy[src], evy, vy[dst]], axis=-1)
    cz = jnp.concatenate([vz[src], evz, vz[dst]], axis=-1)
    ms, mx, my, mz = _gvp_ref(s_cat, cx, cy, cz, params["m1_wh"], params["m1_ws"],
                              params["m1_b"], params["m1_wv"], True, True)
    ms, mx, my, mz = _gvp_ref(ms, mx, my, mz, params["m2_wh"], params["m2_ws"],
                              params["m2_b"], params["m2_wv"], True, True)
    ms, mx, my, mz = _gvp_ref(ms, mx, my, mz, params["m3_wh"], params["m3_ws"],
                              params["m3_b"], params["m3_wv"], False, False)
    cnt = jnp.zeros((N, 1), jnp.float32).at[dst].add(1.0)
    denom = jnp.maximum(cnt, 1.0)
    agg = lambda m: jnp.zeros((N, m.shape[-1]), jnp.float32).at[dst].add(m) / denom
    dh_s, dx, dy, dz = agg(ms), agg(mx), agg(my), agg(mz)

    s1 = _scalar_ln(s + dh_s, params["ln0_g"], params["ln0_b"])
    v1x, v1y, v1z = _vec_ln_ref(vx + dx, vy + dy, vz + dz)
    fs, fx, fy, fz = _gvp_ref(s1, v1x, v1y, v1z, params["f1_wh"], params["f1_ws"],
                              params["f1_b"], params["f1_wv"], True, True)
    fs, fx, fy, fz = _gvp_ref(fs, fx, fy, fz, params["f2_wh"], params["f2_ws"],
                              params["f2_b"], params["f2_wv"], False, False)
    s2 = _scalar_ln(s1 + fs, params["ln1_g"], params["ln1_b"])
    out = jax.nn.sigmoid(s2 @ params["ro_w"] + params["ro_b"])
    return out[:, 0], labels


# ----------------------------------------------------------------------------
if __name__ == "__main__":
    key = jax.random.PRNGKey(0)
    kp, k1, k2, k3, k4, k5, k6 = jax.random.split(key, 7)

    N, E = 16, 48   # small synthetic graph (N residues, E directed edges)
    params = init_params(kp)

    node_scalar = jax.random.normal(k1, (N, F_IN), jnp.float32)   # concat of one-hots/esm/phi/psi/rsa
    node_vec = jax.random.normal(k2, (N, NV, 3), jnp.float32)     # [ToNextCA, ToLastCA]
    edge_index = jax.random.randint(k3, (2, E), 0, N, dtype=jnp.int32)
    edge_s = jax.random.normal(k4, (E, ES), jnp.float32)          # distance_fourier
    edge_vec = jax.random.normal(k5, (E, EV, 3), jnp.float32)     # direction_vector
    labels = jax.random.uniform(k6, (N,), jnp.float32)            # b_factor stand-in

    out, lab = jax.jit(scoring_model_forward)(params, node_scalar, node_vec,
                                              edge_index, edge_s, edge_vec, labels)
    out = jax.block_until_ready(out)

    ref_out, _ = reference_forward(params, node_scalar, node_vec, edge_index,
                                   edge_s, edge_vec, labels)
    assert out.shape == (N,) and lab.shape == (N,)
    assert bool(jnp.all(jnp.isfinite(out)))
    # tolerance reflects bf16 MXU matmuls (f32 accumulation) on the 1433-wide linear
    # and the GVP scalar paths; sigmoid outputs are in (0,1)
    assert jnp.allclose(out, ref_out, atol=2e-2, rtol=2e-2), \
        f"max abs diff {float(jnp.max(jnp.abs(out - ref_out)))}"
    print("KERNEL_OK")
</pallas_src>

<mosaic_0001>
module attributes {stable_mosaic.version = 11 : i64} {
  func.func private @main(%arg0: i32) attributes {dimension_semantics = [#tpu.dimension_semantics<core_parallel>], iteration_bounds = array<i64: 2>, tpu.core_type = #tpu.core_type<sc_scalar_subcore>, window_params = []} {
    return
  }
}

module attributes {stable_mosaic.version = 11 : i64} {
  func.func private @main(%arg0: i32) attributes {dimension_semantics = [#tpu.dimension_semantics<core_parallel>], iteration_bounds = array<i64: 2>, tpu.core_type = #tpu.core_type<sc_scalar_subcore>, window_params = []} {
    return
  }
}

module attributes {stable_mosaic.version = 11 : i64} {
  func.func @_linear_kernel(%arg0: i32, %arg1: memref<8x1433xf32, #tpu.memory_space<vmem>>, %arg2: memref<1433x128xbf16, #tpu.memory_space<vmem>>, %arg3: memref<1x128xf32, #tpu.memory_space<vmem>>, %arg4: memref<8x128xf32, #tpu.memory_space<vmem>>) attributes {dimension_semantics = [#tpu.dimension_semantics<parallel>], iteration_bounds = array<i64: 2>, scalar_prefetch = 0 : i64, scratch_operands = 0 : i64, tpu.core_type = #tpu.core_type<tc>, window_params = [{transform_indices = @transform_0, window_bounds = array<i64: 8, 1433>}, {pipeline_mode = #tpu.pipeline_mode<synchronous>, transform_indices = @transform_1, window_bounds = array<i64: 1433, 128>}, {pipeline_mode = #tpu.pipeline_mode<synchronous>, transform_indices = @transform_2, window_bounds = array<i64: 1, 128>}, {transform_indices = @transform_3, window_bounds = array<i64: 8, 128>}]} {
    %c0 = arith.constant 0 : index
    %c0_0 = arith.constant 0 : index
    %0 = vector.load %arg1[%c0, %c0_0] : memref<8x1433xf32, #tpu.memory_space<vmem>>, vector<8x1433xf32>
    %1 = arith.truncf %0 : vector<8x1433xf32> to vector<8x1433xbf16>
    %c0_1 = arith.constant 0 : index
    %c0_2 = arith.constant 0 : index
    %2 = vector.load %arg2[%c0_1, %c0_2] : memref<1433x128xbf16, #tpu.memory_space<vmem>>, vector<1433x128xbf16>
    %cst = arith.constant dense<0.000000e+00> : vector<8x128xf32>
    %3 = tpu.matmul %1, %2, %cst {dimension_numbers = #tpu.dot_dimension_numbers<[1], [0], [0], [1], [0, 0, 1, 1], [], []>} : vector<8x1433xbf16>, vector<1433x128xbf16>, vector<8x128xf32> -> vector<8x128xf32>
    %c0_3 = arith.constant 0 : index
    %c0_4 = arith.constant 0 : index
    %4 = vector.load %arg3[%c0_3, %c0_4] : memref<1x128xf32, #tpu.memory_space<vmem>>, vector<1x128xf32>
    %5 = vector.broadcast %4 : vector<1x128xf32> to vector<8x128xf32>
    %6 = arith.addf %3, %5 : vector<8x128xf32>
    %c0_5 = arith.constant 0 : index
    %c0_6 = arith.constant 0 : index
    %7 = vector.load %arg4[%c0_5, %c0_6] : memref<8x128xf32, #tpu.memory_space<vmem>>, vector<8x128xf32>
    tpu.vector_store %arg4[%c0_5, %c0_6], %6 {strides = array<i32>} : memref<8x128xf32, #tpu.memory_space<vmem>>, vector<8x128xf32>,
    return
  }
  func.func @transform_0(%arg0: i32) -> (i32, i32) {
    %c0_i32 = arith.constant 0 : i32
    %c0_i32_0 = arith.constant 0 : i32
    return %arg0, %c0_i32 : i32, i32
  }
  func.func @transform_1(%arg0: i32) -> (i32, i32) {
    %c0_i32 = arith.constant 0 : i32
    %c0_i32_0 = arith.constant 0 : i32
    %c0_i32_1 = arith.constant 0 : i32
    return %c0_i32, %c0_i32_0 : i32, i32
  }
  func.func @transform_2(%arg0: i32) -> (i32, i32) {
    %c0_i32 = arith.constant 0 : i32
    %c0_i32_0 = arith.constant 0 : i32
    %c0_i32_1 = arith.constant 0 : i32
    return %c0_i32, %c0_i32_0 : i32, i32
  }
  func.func @transform_3(%arg0: i32) -> (i32, i32) {
    %c0_i32 = arith.constant 0 : i32
    %c0_i32_0 = arith.constant 0 : i32
    return %arg0, %c0_i32 : i32, i32
  }
}

module attributes {stable_mosaic.version = 11 : i64} {
  func.func @_edge_message_kernel(%arg0: i32, %arg1: memref<24x128xf32, #tpu.memory_space<vmem>>, %arg2: memref<24x8xf32, #tpu.memory_space<vmem>>, %arg3: memref<24x128xf32, #tpu.memory_space<vmem>>, %arg4: memref<24x6xf32, #tpu.memory_space<vmem>>, %arg5: memref<24x3xf32, #tpu.memory_space<vmem>>, %arg6: memref<24x6xf32, #tpu.memory_space<vmem>>, %arg7: memref<6x15xf32, #tpu.memory_space<vmem>>, %arg8: memref<3x15xf32, #tpu.memory_space<vmem>>, %arg9: memref<6x15xf32, #tpu.memory_space<vmem>>, %arg10: memref<128x128xbf16, #tpu.memory_space<vmem>>, %arg11: memref<8x128xbf16, #tpu.memory_space<vmem>>, %arg12: memref<128x128xbf16, #tpu.memory_space<vmem>>, %arg13: memref<5x128xbf16, #tpu.memory_space<vmem>>, %arg14: memref<15x6xf32, #tpu.memory_space<vmem>>, %arg15: memref<6x6xf32, #tpu.memory_space<vmem>>, %arg16: memref<128x128xbf16, #tpu.memory_space<vmem>>, %arg17: memref<2x128xbf16, #tpu.memory_space<vmem>>, %arg18: memref<6x6xf32, #tpu.memory_space<vmem>>, %arg19: memref<6x6xf32, #tpu.memory_space<vmem>>, %arg20: memref<128x128xbf16, #tpu.memory_space<vmem>>, %arg21: memref<2x128xbf16, #tpu.memory_space<vmem>>, %arg22: memref<6x6xf32, #tpu.memory_space<vmem>>, %arg23: memref<3x128xf32, #tpu.memory_space<vmem>>, %arg24: memref<24x128xf32, #tpu.memory_space<vmem>>, %arg25: memref<24x6xf32, #tpu.memory_space<vmem>>) attributes {dimension_semantics = [#tpu.dimension_semantics<parallel>], iteration_bounds = array<i64: 2>, scalar_prefetch = 0 : i64, scratch_operands = 0 : i64, tpu.core_type = #tpu.core_type<tc>, window_params = [{transform_indices = @transform_0, window_bounds = array<i64: 24, 128>}, {transform_indices = @transform_1, window_bounds = array<i64: 24, 8>}, {transform_indices = @transform_2, window_bounds = array<i64: 24, 128>}, {transform_indices = @transform_3, window_bounds = array<i64: 24, 6>}, {transform_indices = @transform_4, window_bounds = array<i64: 24, 3>}, {transform_indices = @transform_5, window_bounds = array<i64: 24, 6>}, {pipeline_mode = #tpu.pipeline_mode<synchronous>, transform_indices = @transform_6, window_bounds = array<i64: 6, 15>}, {pipeline_mode = #tpu.pipeline_mode<synchronous>, transform_indices = @transform_7, window_bounds = array<i64: 3, 15>}, {pipeline_mode = #tpu.pipeline_mode<synchronous>, transform_indices = @transform_8, window_bounds = array<i64: 6, 15>}, {pipeline_mode = #tpu.pipeline_mode<synchronous>, transform_indices = @transform_9, window_bounds = array<i64: 128, 128>}, {pipeline_mode = #tpu.pipeline_mode<synchronous>, transform_indices = @transform_10, window_bounds = array<i64: 8, 128>}, {pipeline_mode = #tpu.pipeline_mode<synchronous>, transform_indices = @transform_11, window_bounds = array<i64: 128, 128>}, {pipeline_mode = #tpu.pipeline_mode<synchronous>, transform_indices = @transform_12, window_bounds = array<i64: 5, 128>}, {pipeline_mode = #tpu.pipeline_mode<synchronous>, transform_indices = @transform_13, window_bounds = array<i64: 15, 6>}, {pipeline_mode = #tpu.pipeline_mode<synchronous>, transform_indices = @transform_14, window_bounds = array<i64: 6, 6>}, {pipeline_mode = #tpu.pipeline_mode<synchronous>, transform_indices = @transform_15, window_bounds = array<i64: 128, 128>}, {pipeline_mode = #tpu.pipeline_mode<synchronous>, transform_indices = @transform_16, window_bounds = array<i64: 2, 128>}, {pipeline_mode = #tpu.pipeline_mode<synchronous>, transform_indices = @transform_17, window_bounds = array<i64: 6, 6>}, {pipeline_mode = #tpu.pipeline_mode<synchronous>, transform_indices = @transform_18, window_bounds = array<i64: 6, 6>}, {pipeline_mode = #tpu.pipeline_mode<synchronous>, transform_indices = @transform_19, window_bounds = array<i64: 128, 128>}, {pipeline_mode = #tpu.pipeline_mode<synchronous>, transform_indices = @transform_20, window_bounds = array<i64: 2, 128>}, {pipeline_mode = #tpu.pipeline_mode<synchronous>, transform_indices = @transform_21, window_bounds = array<i64: 6, 6>}, {pipeline_mode = #tpu.pipeline_mode<synchronous>, transform_indices = @transform_22, window_bounds = array<i64: 3, 128>}, {transform_indices = @transform_23, window_bounds = array<i64: 24, 128>}, {transform_indices = @transform_24, window_bounds = array<i64: 24, 6>}]} {
    %c0 = arith.constant 0 : index
    %c0_0 = arith.constant 0 : index
    %0 = vector.load %arg4[%c0, %c0_0] : memref<24x6xf32, #tpu.memory_space<vmem>>, vector<24x6xf32>
    %c0_1 = arith.constant 0 : index
    %c0_2 = arith.constant 0 : index
    %1 = vector.load %arg7[%c0_1, %c0_2] : memref<6x15xf32, #tpu.memory_space<vmem>>, vector<6x15xf32>
    %cst = arith.constant dense<0.000000e+00> : vector<24x15xf32>
    %2 = tpu.matmul %0, %1, %cst {dimension_numbers = #tpu.dot_dimension_numbers<[1], [0], [0], [1], [0, 0, 1, 1], [], []>} : vector<24x6xf32>, vector<6x15xf32>, vector<24x15xf32> -> vector<24x15xf32>
    %c0_3 = arith.constant 0 : index
    %c0_4 = arith.constant 0 : index
    %3 = vector.load %arg5[%c0_3, %c0_4] : memref<24x3xf32, #tpu.memory_space<vmem>>, vector<24x3xf32>
    %c0_5 = arith.constant 0 : index
    %c0_6 = arith.constant 0 : index
    %4 = vector.load %arg8[%c0_5, %c0_6] : memref<3x15xf32, #tpu.memory_space<vmem>>, vector<3x15xf32>
    %cst_7 = arith.constant dense<0.000000e+00> : vector<24x15xf32>
    %5 = tpu.matmul %3, %4, %cst_7 {dimension_numbers = #tpu.dot_dimension_numbers<[1], [0], [0], [1], [0, 0, 1, 1], [], []>} : vector<24x3xf32>, vector<3x15xf32>, vector<24x15xf32> -> vector<24x15xf32>
    %6 = arith.addf %2, %5 : vector<24x15xf32>
    %c0_8 = arith.constant 0 : index
    %c0_9 = arith.constant 0 : index
    %7 = vector.load %arg6[%c0_8, %c0_9] : memref<24x6xf32, #tpu.memory_space<vmem>>, vector<24x6xf32>
    %c0_10 = arith.constant 0 : index
    %c0_11 = arith.constant 0 : index
    %8 = vector.load %arg9[%c0_10, %c0_11] : memref<6x15xf32, #tpu.memory_space<vmem>>, vector<6x15xf32>
    %cst_12 = arith.constant dense<0.000000e+00> : vector<24x15xf32>
    %9 = tpu.matmul %7, %8, %cst_12 {dimension_numbers = #tpu.dot_dimension_numbers<[1], [0], [0], [1], [0, 0, 1, 1], [], []>} : vector<24x6xf32>, vector<6x15xf32>, vector<24x15xf32> -> vector<24x15xf32>
    %10 = arith.addf %6, %9 : vector<24x15xf32>
    %11 = vector.extract_strided_slice %10 {offsets = [0, 0], sizes = [24, 5], strides = [1, 1]} : vector<24x15xf32> to vector<24x5xf32>
    %12 = vector.extract_strided_slice %10 {offsets = [0, 5], sizes = [24, 5], strides = [1, 1]} : vector<24x15xf32> to vector<24x5xf32>
    %13 = vector.extract_strided_slice %10 {offsets = [0, 10], sizes = [24, 5], strides = [1, 1]} : vector<24x15xf32> to vector<24x5xf32>
    %14 = arith.mulf %11, %11 : vector<24x5xf32>
    %15 = arith.mulf %12, %12 : vector<24x5xf32>
    %16 = arith.addf %14, %15 : vector<24x5xf32>
    %17 = arith.mulf %13, %13 : vector<24x5xf32>
    %18 = arith.addf %16, %17 : vector<24x5xf32>
    %cst_13 = arith.constant 9.99999993E-9 : f32
    %19 = vector.broadcast %cst_13 : f32 to vector<24x5xf32>
    %20 = arith.maximumf %18, %19 : vector<24x5xf32>
    %21 = math.sqrt %20 : vector<24x5xf32>
    %c0_14 = arith.constant 0 : index
    %c0_15 = arith.constant 0 : index
    %22 = vector.load %arg1[%c0_14, %c0_15] : memref<24x128xf32, #tpu.memory_space<vmem>>, vector<24x128xf32>
    %c0_16 = arith.constant 0 : index
    %c0_17 = arith.constant 0 : index
    %23 = vector.load %arg10[%c0_16, %c0_17] : memref<128x128xbf16, #tpu.memory_space<vmem>>, vector<128x128xbf16>
    %24 = arith.truncf %22 : vector<24x128xf32> to vector<24x128xbf16>
    %cst_18 = arith.constant dense<0.000000e+00> : vector<24x128xf32>
    %25 = tpu.matmul %24, %23, %cst_18 {dimension_numbers = #tpu.dot_dimension_numbers<[1], [0], [0], [1], [0, 0, 1, 1], [], []>} : vector<24x128xbf16>, vector<128x128xbf16>, vector<24x128xf32> -> vector<24x128xf32>
    %c0_19 = arith.constant 0 : index
    %c0_20 = arith.constant 0 : index
    %26 = vector.load %arg2[%c0_19, %c0_20] : memref<24x8xf32, #tpu.memory_space<vmem>>, vector<24x8xf32>
    %c0_21 = arith.constant 0 : index
    %c0_22 = arith.constant 0 : index
    %27 = vector.load %arg11[%c0_21, %c0_22] : memref<8x128xbf16, #tpu.memory_space<vmem>>, vector<8x128xbf16>
    %28 = arith.truncf %26 : vector<24x8xf32> to vector<24x8xbf16>
    %cst_23 = arith.constant dense<0.000000e+00> : vector<24x128xf32>
    %29 = tpu.matmul %28, %27, %cst_23 {dimension_numbers = #tpu.dot_dimension_numbers<[1], [0], [0], [1], [0, 0, 1, 1], [], []>} : vector<24x8xbf16>, vector<8x128xbf16>, vector<24x128xf32> -> vector<24x128xf32>
    %30 = arith.addf %25, %29 : vector<24x128xf32>
    %c0_24 = arith.constant 0 : index
    %c0_25 = arith.constant 0 : index
    %31 = vector.load %arg3[%c0_24, %c0_25] : memref<24x128xf32, #tpu.memory_space<vmem>>, vector<24x128xf32>
    %c0_26 = arith.constant 0 : index
    %c0_27 = arith.constant 0 : index
    %32 = vector.load %arg12[%c0_26, %c0_27] : memref<128x128xbf16, #tpu.memory_space<vmem>>, vector<128x128xbf16>
    %33 = arith.truncf %31 : vector<24x128xf32> to vector<24x128xbf16>
    %cst_28 = arith.constant dense<0.000000e+00> : vector<24x128xf32>
    %34 = tpu.matmul %33, %32, %cst_28 {dimension_numbers = #tpu.dot_dimension_numbers<[1], [0], [0], [1], [0, 0, 1, 1], [], []>} : vector<24x128xbf16>, vector<128x128xbf16>, vector<24x128xf32> -> vector<24x128xf32>
    %35 = arith.addf %30, %34 : vector<24x128xf32>
    %c0_29 = arith.constant 0 : index
    %c0_30 = arith.constant 0 : index
    %36 = vector.load %arg13[%c0_29, %c0_30] : memref<5x128xbf16, #tpu.memory_space<vmem>>, vector<5x128xbf16>
    %37 = arith.truncf %21 : vector<24x5xf32> to vector<24x5xbf16>
    %cst_31 = arith.constant dense<0.000000e+00> : vector<24x128xf32>
    %38 = tpu.matmul %37, %36, %cst_31 {dimension_numbers = #tpu.dot_dimension_numbers<[1], [0], [0], [1], [0, 0, 1, 1], [], []>} : vector<24x5xbf16>, vector<5x128xbf16>, vector<24x128xf32> -> vector<24x128xf32>
    %39 = arith.addf %35, %38 : vector<24x128xf32>
    %c0_32 = arith.constant 0 : index
    %c0_33 = arith.constant 0 : index
    %40 = vector.load %arg23[%c0_32, %c0_33] : memref<3x128xf32, #tpu.memory_space<vmem>>, vector<1x128xf32>
    %41 = vector.shape_cast %40 : vector<1x128xf32> to vector<128xf32>
    %42 = vector.shape_cast %41 : vector<128xf32> to vector<1x128xf32>
    %43 = vector.broadcast %42 : vector<1x128xf32> to vector<24x128xf32>
    %44 = arith.addf %39, %43 : vector<24x128xf32>
    %cst_34 = arith.constant 0.000000e+00 : f32
    %45 = vector.broadcast %cst_34 : f32 to vector<24x128xf32>
    %46 = arith.maximumf %44, %45 : vector<24x128xf32>
    %c0_35 = arith.constant 0 : index
    %c0_36 = arith.constant 0 : index
    %47 = vector.load %arg14[%c0_35, %c0_36] : memref<15x6xf32, #tpu.memory_space<vmem>>, vector<15x6xf32>
    %cst_37 = arith.constant dense<0.000000e+00> : vector<24x6xf32>
    %48 = tpu.matmul %10, %47, %cst_37 {dimension_numbers = #tpu.dot_dimension_numbers<[1], [0], [0], [1], [0, 0, 1, 1], [], []>} : vector<24x15xf32>, vector<15x6xf32>, vector<24x6xf32> -> vector<24x6xf32>
    %49 = vector.extract_strided_slice %48 {offsets = [0, 0], sizes = [24, 2], strides = [1, 1]} : vector<24x6xf32> to vector<24x2xf32>
    %50 = vector.extract_strided_slice %48 {offsets = [0, 2], sizes = [24, 2], strides = [1, 1]} : vector<24x6xf32> to vector<24x2xf32>
    %51 = vector.extract_strided_slice %48 {offsets = [0, 4], sizes = [24, 2], strides = [1, 1]} : vector<24x6xf32> to vector<24x2xf32>
    %52 = arith.mulf %49, %49 : vector<24x2xf32>
    %53 = arith.mulf %50, %50 : vector<24x2xf32>
    %54 = arith.addf %52, %53 : vector<24x2xf32>
    %55 = arith.mulf %51, %51 : vector<24x2xf32>
    %56 = arith.addf %54, %55 : vector<24x2xf32>
    %cst_38 = arith.constant 9.99999993E-9 : f32
    %57 = vector.broadcast %cst_38 : f32 to vector<24x2xf32>
    %58 = arith.maximumf %56, %57 : vector<24x2xf32>
    %59 = math.sqrt %58 : vector<24x2xf32>
    %60 = arith.negf %59 : vector<24x2xf32>
    %61 = math.exp %60 : vector<24x2xf32>
    %cst_39 = arith.constant 1.000000e+00 : f32
    %62 = vector.broadcast %cst_39 : f32 to vector<24x2xf32>
    %63 = arith.addf %62, %61 : vector<24x2xf32>
    %64 = arith.divf %62, %63 : vector<24x2xf32>
    %65 = tpu.concatenate %64, %64, %64 in 1 : vector<24x2xf32>, vector<24x2xf32>, vector<24x2xf32> -> vector<24x6xf32>
    %66 = arith.mulf %48, %65 : vector<24x6xf32>
    %c0_40 = arith.constant 0 : index
    %c0_41 = arith.constant 0 : index
    %67 = vector.load %arg15[%c0_40, %c0_41] : memref<6x6xf32, #tpu.memory_space<vmem>>, vector<6x6xf32>
    %cst_42 = arith.constant dense<0.000000e+00> : vector<24x6xf32>
    %68 = tpu.matmul %66, %67, %cst_42 {dimension_numbers = #tpu.dot_dimension_numbers<[1], [0], [0], [1], [0, 0, 1, 1], [], []>} : vector<24x6xf32>, vector<6x6xf32>, vector<24x6xf32> -> vector<24x6xf32>
    %69 = vector.extract_strided_slice %68 {offsets = [0, 0], sizes = [24, 2], strides = [1, 1]} : vector<24x6xf32> to vector<24x2xf32>
    %70 = vector.extract_strided_slice %68 {offsets = [0, 2], sizes = [24, 2], strides = [1, 1]} : vector<24x6xf32> to vector<24x2xf32>
    %71 = vector.extract_strided_slice %68 {offsets = [0, 4], sizes = [24, 2], strides = [1, 1]} : vector<24x6xf32> to vector<24x2xf32>
    %72 = arith.mulf %69, %69 : vector<24x2xf32>
    %73 = arith.mulf %70, %70 : vector<24x2xf32>
    %74 = arith.addf %72, %73 : vector<24x2xf32>
    %75 = arith.mulf %71, %71 : vector<24x2xf32>
    %76 = arith.addf %74, %75 : vector<24x2xf32>
    %cst_43 = arith.constant 9.99999993E-9 : f32
    %77 = vector.broadcast %cst_43 : f32 to vector<24x2xf32>
    %78 = arith.maximumf %76, %77 : vector<24x2xf32>
    %79 = math.sqrt %78 : vector<24x2xf32>
    %c0_44 = arith.constant 0 : index
    %c0_45 = arith.constant 0 : index
    %80 = vector.load %arg16[%c0_44, %c0_45] : memref<128x128xbf16, #tpu.memory_space<vmem>>, vector<128x128xbf16>
    %81 = arith.truncf %46 : vector<24x128xf32> to vector<24x128xbf16>
    %cst_46 = arith.constant dense<0.000000e+00> : vector<24x128xf32>
    %82 = tpu.matmul %81, %80, %cst_46 {dimension_numbers = #tpu.dot_dimension_numbers<[1], [0], [0], [1], [0, 0, 1, 1], [], []>} : vector<24x128xbf16>, vector<128x128xbf16>, vector<24x128xf32> -> vector<24x128xf32>
    %c0_47 = arith.constant 0 : index
    %c0_48 = arith.constant 0 : index
    %83 = vector.load %arg17[%c0_47, %c0_48] : memref<2x128xbf16, #tpu.memory_space<vmem>>, vector<2x128xbf16>
    %84 = arith.truncf %79 : vector<24x2xf32> to vector<24x2xbf16>
    %cst_49 = arith.constant dense<0.000000e+00> : vector<24x128xf32>
    %85 = tpu.matmul %84, %83, %cst_49 {dimension_numbers = #tpu.dot_dimension_numbers<[1], [0], [0], [1], [0, 0, 1, 1], [], []>} : vector<24x2xbf16>, vector<2x128xbf16>, vector<24x128xf32> -> vector<24x128xf32>
    %86 = arith.addf %82, %85 : vector<24x128xf32>
    %c1 = arith.constant 1 : index
    %c0_50 = arith.constant 0 : index
    %87 = vector.load %arg23[%c1, %c0_50] : memref<3x128xf32, #tpu.memory_space<vmem>>, vector<1x128xf32>
    %88 = vector.shape_cast %87 : vector<1x128xf32> to vector<128xf32>
    %89 = vector.shape_cast %88 : vector<128xf32> to vector<1x128xf32>
    %90 = vector.broadcast %89 : vector<1x128xf32> to vector<24x128xf32>
    %91 = arith.addf %86, %90 : vector<24x128xf32>
    %cst_51 = arith.constant 0.000000e+00 : f32
    %92 = vector.broadcast %cst_51 : f32 to vector<24x128xf32>
    %93 = arith.maximumf %91, %92 : vector<24x128xf32>
    %c0_52 = arith.constant 0 : index
    %c0_53 = arith.constant 0 : index
    %94 = vector.load %arg18[%c0_52, %c0_53] : memref<6x6xf32, #tpu.memory_space<vmem>>, vector<6x6xf32>
    %cst_54 = arith.constant dense<0.000000e+00> : vector<24x6xf32>
    %95 = tpu.matmul %68, %94, %cst_54 {dimension_numbers = #tpu.dot_dimension_numbers<[1], [0], [0], [1], [0, 0, 1, 1], [], []>} : vector<24x6xf32>, vector<6x6xf32>, vector<24x6xf32> -> vector<24x6xf32>
    %96 = vector.extract_strided_slice %95 {offsets = [0, 0], sizes = [24, 2], strides = [1, 1]} : vector<24x6xf32> to vector<24x2xf32>
    %97 = vector.extract_strided_slice %95 {offsets = [0, 2], sizes = [24, 2], strides = [1, 1]} : vector<24x6xf32> to vector<24x2xf32>
    %98 = vector.extract_strided_slice %95 {offsets = [0, 4], sizes = [24, 2], strides = [1, 1]} : vector<24x6xf32> to vector<24x2xf32>
    %99 = arith.mulf %96, %96 : vector<24x2xf32>
    %100 = arith.mulf %97, %97 : vector<24x2xf32>
    %101 = arith.addf %99, %100 : vector<24x2xf32>
    %102 = arith.mulf %98, %98 : vector<24x2xf32>
    %103 = arith.addf %101, %102 : vector<24x2xf32>
    %cst_55 = arith.constant 9.99999993E-9 : f32
    %104 = vector.broadcast %cst_55 : f32 to vector<24x2xf32>
    %105 = arith.maximumf %103, %104 : vector<24x2xf32>
    %106 = math.sqrt %105 : vector<24x2xf32>
    %107 = arith.negf %106 : vector<24x2xf32>
    %108 = math.exp %107 : vector<24x2xf32>
    %cst_56 = arith.constant 1.000000e+00 : f32
    %109 = vector.broadcast %cst_56 : f32 to vector<24x2xf32>
    %110 = arith.addf %109, %108 : vector<24x2xf32>
    %111 = arith.divf %109, %110 : vector<24x2xf32>
    %112 = tpu.concatenate %111, %111, %111 in 1 : vector<24x2xf32>, vector<24x2xf32>, vector<24x2xf32> -> vector<24x6xf32>
    %113 = arith.mulf %95, %112 : vector<24x6xf32>
    %c0_57 = arith.constant 0 : index
    %c0_58 = arith.constant 0 : index
    %114 = vector.load %arg19[%c0_57, %c0_58] : memref<6x6xf32, #tpu.memory_space<vmem>>, vector<6x6xf32>
    %cst_59 = arith.constant dense<0.000000e+00> : vector<24x6xf32>
    %115 = tpu.matmul %113, %114, %cst_59 {dimension_numbers = #tpu.dot_dimension_numbers<[1], [0], [0], [1], [0, 0, 1, 1], [], []>} : vector<24x6xf32>, vector<6x6xf32>, vector<24x6xf32> -> vector<24x6xf32>
    %116 = vector.extract_strided_slice %115 {offsets = [0, 0], sizes = [24, 2], strides = [1, 1]} : vector<24x6xf32> to vector<24x2xf32>
    %117 = vector.extract_strided_slice %115 {offsets = [0, 2], sizes = [24, 2], strides = [1, 1]} : vector<24x6xf32> to vector<24x2xf32>
    %118 = vector.extract_strided_slice %115 {offsets = [0, 4], sizes = [24, 2], strides = [1, 1]} : vector<24x6xf32> to vector<24x2xf32>
    %119 = arith.mulf %116, %116 : vector<24x2xf32>
    %120 = arith.mulf %117, %117 : vector<24x2xf32>
    %121 = arith.addf %119, %120 : vector<24x2xf32>
    %122 = arith.mulf %118, %118 : vector<24x2xf32>
    %123 = arith.addf %121, %122 : vector<24x2xf32>
    %cst_60 = arith.constant 9.99999993E-9 : f32
    %124 = vector.broadcast %cst_60 : f32 to vector<24x2xf32>
    %125 = arith.maximumf %123, %124 : vector<24x2xf32>
    %126 = math.sqrt %125 : vector<24x2xf32>
    %c0_61 = arith.constant 0 : index
    %c0_62 = arith.constant 0 : index
    %127 = vector.load %arg20[%c0_61, %c0_62] : memref<128x128xbf16, #tpu.memory_space<vmem>>, vector<128x128xbf16>
    %128 = arith.truncf %93 : vector<24x128xf32> to vector<24x128xbf16>
    %cst_63 = arith.constant dense<0.000000e+00> : vector<24x128xf32>
    %129 = tpu.matmul %128, %127, %cst_63 {dimension_numbers = #tpu.dot_dimension_numbers<[1], [0], [0], [1], [0, 0, 1, 1], [], []>} : vector<24x128xbf16>, vector<128x128xbf16>, vector<24x128xf32> -> vector<24x128xf32>
    %c0_64 = arith.constant 0 : index
    %c0_65 = arith.constant 0 : index
    %130 = vector.load %arg21[%c0_64, %c0_65] : memref<2x128xbf16, #tpu.memory_space<vmem>>, vector<2x128xbf16>
    %131 = arith.truncf %126 : vector<24x2xf32> to vector<24x2xbf16>
    %cst_66 = arith.constant dense<0.000000e+00> : vector<24x128xf32>
    %132 = tpu.matmul %131, %130, %cst_66 {dimension_numbers = #tpu.dot_dimension_numbers<[1], [0], [0], [1], [0, 0, 1, 1], [], []>} : vector<24x2xbf16>, vector<2x128xbf16>, vector<24x128xf32> -> vector<24x128xf32>
    %133 = arith.addf %129, %132 : vector<24x128xf32>
    %c2 = arith.constant 2 : index
    %c0_67 = arith.constant 0 : index
    %134 = vector.load %arg23[%c2, %c0_67] : memref<3x128xf32, #tpu.memory_space<vmem>>, vector<1x128xf32>
    %135 = vector.shape_cast %134 : vector<1x128xf32> to vector<128xf32>
    %136 = vector.shape_cast %135 : vector<128xf32> to vector<1x128xf32>
    %137 = vector.broadcast %136 : vector<1x128xf32> to vector<24x128xf32>
    %138 = arith.addf %133, %137 : vector<24x128xf32>
    %c0_68 = arith.constant 0 : index
    %c0_69 = arith.constant 0 : index
    %139 = vector.load %arg22[%c0_68, %c0_69] : memref<6x6xf32, #tpu.memory_space<vmem>>, vector<6x6xf32>
    %cst_70 = arith.constant dense<0.000000e+00> : vector<24x6xf32>
    %140 = tpu.matmul %115, %139, %cst_70 {dimension_numbers = #tpu.dot_dimension_numbers<[1], [0], [0], [1], [0, 0, 1, 1], [], []>} : vector<24x6xf32>, vector<6x6xf32>, vector<24x6xf32> -> vector<24x6xf32>
    %c0_71 = arith.constant 0 : index
    %c0_72 = arith.constant 0 : index
    %141 = vector.load %arg24[%c0_71, %c0_72] : memref<24x128xf32, #tpu.memory_space<vmem>>, vector<24x128xf32>
    tpu.vector_store %arg24[%c0_71, %c0_72], %138 {strides = array<i32>} : memref<24x128xf32, #tpu.memory_space<vmem>>, vector<24x128xf32>,
    %c0_73 = arith.constant 0 : index
    %c0_74 = arith.constant 0 : index
    %142 = vector.load %arg25[%c0_73, %c0_74] : memref<24x6xf32, #tpu.memory_space<vmem>>, vector<24x6xf32>
    tpu.vector_store %arg25[%c0_73, %c0_74], %140 {strides = array<i32>} : memref<24x6xf32, #tpu.memory_space<vmem>>, vector<24x6xf32>,
    return
  }
  func.func @transform_0(%arg0: i32) -> (i32, i32) {
    %c0_i32 = arith.constant 0 : i32
    %c0_i32_0 = arith.constant 0 : i32
    return %arg0, %c0_i32 : i32, i32
  }
  func.func @transform_1(%arg0: i32) -> (i32, i32) {
    %c0_i32 = arith.constant 0 : i32
    %c0_i32_0 = arith.constant 0 : i32
    return %arg0, %c0_i32 : i32, i32
  }
  func.func @transform_2(%arg0: i32) -> (i32, i32) {
    %c0_i32 = arith.constant 0 : i32
    %c0_i32_0 = arith.constant 0 : i32
    return %arg0, %c0_i32 : i32, i32
  }
  func.func @transform_3(%arg0: i32) -> (i32, i32) {
    %c0_i32 = arith.constant 0 : i32
    %c0_i32_0 = arith.constant 0 : i32
    return %arg0, %c0_i32 : i32, i32
  }
  func.func @transform_4(%arg0: i32) -> (i32, i32) {
    %c0_i32 = arith.constant 0 : i32
    %c0_i32_0 = arith.constant 0 : i32
    return %arg0, %c0_i32 : i32, i32
  }
  func.func @transform_5(%arg0: i32) -> (i32, i32) {
    %c0_i32 = arith.constant 0 : i32
    %c0_i32_0 = arith.constant 0 : i32
    return %arg0, %c0_i32 : i32, i32
  }
  func.func @transform_6(%arg0: i32) -> (i32, i32) {
    %c0_i32 = arith.constant 0 : i32
    %c0_i32_0 = arith.constant 0 : i32
    %c0_i32_1 = arith.constant 0 : i32
    return %c0_i32, %c0_i32_0 : i32, i32
  }
  func.func @transform_7(%arg0: i32) -> (i32, i32) {
    %c0_i32 = arith.constant 0 : i32
    %c0_i32_0 = arith.constant 0 : i32
    %c0_i32_1 = arith.constant 0 : i32
    return %c0_i32, %c0_i32_0 : i32, i32
  }
  func.func @transform_8(%arg0: i32) -> (i32, i32) {
    %c0_i32 = arith.constant 0 : i32
    %c0_i32_0 = arith.constant 0 : i32
    %c0_i32_1 = arith.constant 0 : i32
    return %c0_i32, %c0_i32_0 : i32, i32
  }
  func.func @transform_9(%arg0: i32) -> (i32, i32) {
    %c0_i32 = arith.constant 0 : i32
    %c0_i32_0 = arith.constant 0 : i32
    %c0_i32_1 = arith.constant 0 : i32
    return %c0_i32, %c0_i32_0 : i32, i32
  }
  func.func @transform_10(%arg0: i32) -> (i32, i32) {
    %c0_i32 = arith.constant 0 : i32
    %c0_i32_0 = arith.constant 0 : i32
    %c0_i32_1 = arith.constant 0 : i32
    return %c0_i32, %c0_i32_0 : i32, i32
  }
  func.func @transform_11(%arg0: i32) -> (i32, i32) {
    %c0_i32 = arith.constant 0 : i32
    %c0_i32_0 = arith.constant 0 : i32
    %c0_i32_1 = arith.constant 0 : i32
    return %c0_i32, %c0_i32_0 : i32, i32
  }
  func.func @transform_12(%arg0: i32) -> (i32, i32) {
    %c0_i32 = arith.constant 0 : i32
    %c0_i32_0 = arith.constant 0 : i32
    %c0_i32_1 = arith.constant 0 : i32
    return %c0_i32, %c0_i32_0 : i32, i32
  }
  func.func @transform_13(%arg0: i32) -> (i32, i32) {
    %c0_i32 = arith.constant 0 : i32
    %c0_i32_0 = arith.constant 0 : i32
    %c0_i32_1 = arith.constant 0 : i32
    return %c0_i32, %c0_i32_0 : i32, i32
  }
  func.func @transform_14(%arg0: i32) -> (i32, i32) {
    %c0_i32 = arith.constant 0 : i32
    %c0_i32_0 = arith.constant 0 : i32
    %c0_i32_1 = arith.constant 0 : i32
    return %c0_i32, %c0_i32_0 : i32, i32
  }
  func.func @transform_15(%arg0: i32) -> (i32, i32) {
    %c0_i32 = arith.constant 0 : i32
    %c0_i32_0 = arith.constant 0 : i32
    %c0_i32_1 = arith.constant 0 : i32
    return %c0_i32, %c0_i32_0 : i32, i32
  }
  func.func @transform_16(%arg0: i32) -> (i32, i32) {
    %c0_i32 = arith.constant 0 : i32
    %c0_i32_0 = arith.constant 0 : i32
    %c0_i32_1 = arith.constant 0 : i32
    return %c0_i32, %c0_i32_0 : i32, i32
  }
  func.func @transform_17(%arg0: i32) -> (i32, i32) {
    %c0_i32 = arith.constant 0 : i32
    %c0_i32_0 = arith.constant 0 : i32
    %c0_i32_1 = arith.constant 0 : i32
    return %c0_i32, %c0_i32_0 : i32, i32
  }
  func.func @transform_18(%arg0: i32) -> (i32, i32) {
    %c0_i32 = arith.constant 0 : i32
    %c0_i32_0 = arith.constant 0 : i32
    %c0_i32_1 = arith.constant 0 : i32
    return %c0_i32, %c0_i32_0 : i32, i32
  }
  func.func @transform_19(%arg0: i32) -> (i32, i32) {
    %c0_i32 = arith.constant 0 : i32
    %c0_i32_0 = arith.constant 0 : i32
    %c0_i32_1 = arith.constant 0 : i32
    return %c0_i32, %c0_i32_0 : i32, i32
  }
  func.func @transform_20(%arg0: i32) -> (i32, i32) {
    %c0_i32 = arith.constant 0 : i32
    %c0_i32_0 = arith.constant 0 : i32
    %c0_i32_1 = arith.constant 0 : i32
    return %c0_i32, %c0_i32_0 : i32, i32
  }
  func.func @transform_21(%arg0: i32) -> (i32, i32) {
    %c0_i32 = arith.constant 0 : i32
    %c0_i32_0 = arith.constant 0 : i32
    %c0_i32_1 = arith.constant 0 : i32
    return %c0_i32, %c0_i32_0 : i32, i32
  }
  func.func @transform_22(%arg0: i32) -> (i32, i32) {
    %c0_i32 = arith.constant 0 : i32
    %c0_i32_0 = arith.constant 0 : i32
    %c0_i32_1 = arith.constant 0 : i32
    return %c0_i32, %c0_i32_0 : i32, i32
  }
  func.func @transform_23(%arg0: i32) -> (i32, i32) {
    %c0_i32 = arith.constant 0 : i32
    %c0_i32_0 = arith.constant 0 : i32
    return %arg0, %c0_i32 : i32, i32
  }
  func.func @transform_24(%arg0: i32) -> (i32, i32) {
    %c0_i32 = arith.constant 0 : i32
    %c0_i32_0 = arith.constant 0 : i32
    return %arg0, %c0_i32 : i32, i32
  }
}

module attributes {stable_mosaic.version = 11 : i64} {
  func.func @_node_update_kernel(%arg0: i32, %arg1: memref<8x128xf32, #tpu.memory_space<vmem>>, %arg2: memref<8x6xf32, #tpu.memory_space<vmem>>, %arg3: memref<8x128xf32, #tpu.memory_space<vmem>>, %arg4: memref<8x6xf32, #tpu.memory_space<vmem>>, %arg5: memref<8x1xf32, #tpu.memory_space<vmem>>, %arg6: memref<6x128xf32, #tpu.memory_space<vmem>>, %arg7: memref<6x12xf32, #tpu.memory_space<vmem>>, %arg8: memref<128x512xbf16, #tpu.memory_space<vmem>>, %arg9: memref<4x512xbf16, #tpu.memory_space<vmem>>, %arg10: memref<1x512xf32, #tpu.memory_space<vmem>>, %arg11: memref<12x12xf32, #tpu.memory_space<vmem>>, %arg12: memref<12x12xf32, #tpu.memory_space<vmem>>, %arg13: memref<512x128xbf16, #tpu.memory_space<vmem>>, %arg14: memref<4x128xbf16, #tpu.memory_space<vmem>>, %arg15: memref<1x1xf32, #tpu.memory_space<vmem>>, %arg16: memref<8x1xf32, #tpu.memory_space<vmem>>) attributes {dimension_semantics = [#tpu.dimension_semantics<parallel>], iteration_bounds = array<i64: 2>, scalar_prefetch = 0 : i64, scratch_operands = 0 : i64, tpu.core_type = #tpu.core_type<tc>, window_params = [{transform_indices = @transform_0, window_bounds = array<i64: 8, 128>}, {transform_indices = @transform_1, window_bounds = array<i64: 8, 6>}, {transform_indices = @transform_2, window_bounds = array<i64: 8, 128>}, {transform_indices = @transform_3, window_bounds = array<i64: 8, 6>}, {transform_indices = @transform_4, window_bounds = array<i64: 8, 1>}, {pipeline_mode = #tpu.pipeline_mode<synchronous>, transform_indices = @transform_5, window_bounds = array<i64: 6, 128>}, {pipeline_mode = #tpu.pipeline_mode<synchronous>, transform_indices = @transform_6, window_bounds = array<i64: 6, 12>}, {pipeline_mode = #tpu.pipeline_mode<synchronous>, transform_indices = @transform_7, window_bounds = array<i64: 128, 512>}, {pipeline_mode = #tpu.pipeline_mode<synchronous>, transform_indices = @transform_8, window_bounds = array<i64: 4, 512>}, {pipeline_mode = #tpu.pipeline_mode<synchronous>, transform_indices = @transform_9, window_bounds = array<i64: 1, 512>}, {pipeline_mode = #tpu.pipeline_mode<synchronous>, transform_indices = @transform_10, window_bounds = array<i64: 12, 12>}, {pipeline_mode = #tpu.pipeline_mode<synchronous>, transform_indices = @transform_11, window_bounds = array<i64: 12, 12>}, {pipeline_mode = #tpu.pipeline_mode<synchronous>, transform_indices = @transform_12, window_bounds = array<i64: 512, 128>}, {pipeline_mode = #tpu.pipeline_mode<synchronous>, transform_indices = @transform_13, window_bounds = array<i64: 4, 128>}, {pipeline_mode = #tpu.pipeline_mode<synchronous>, transform_indices = @transform_14, window_bounds = array<i64: 1, 1>}, {transform_indices = @transform_15, window_bounds = array<i64: 8, 1>}]} {
    %c0 = arith.constant 0 : index
    %c0_0 = arith.constant 0 : index
    %0 = vector.load %arg5[%c0, %c0_0] : memref<8x1xf32, #tpu.memory_space<vmem>>, vector<8x1xf32>
    %cst = arith.constant 1.000000e+00 : f32
    %1 = vector.broadcast %cst : f32 to vector<8x1xf32>
    %2 = arith.maximumf %0, %1 : vector<8x1xf32>
    %cst_1 = arith.constant 1.000000e+00 : f32
    %3 = vector.broadcast %cst_1 : f32 to vector<8x1xf32>
    %4 = arith.divf %3, %2 : vector<8x1xf32>
    %c0_2 = arith.constant 0 : index
    %c0_3 = arith.constant 0 : index
    %5 = vector.load %arg1[%c0_2, %c0_3] : memref<8x128xf32, #tpu.memory_space<vmem>>, vector<8x128xf32>
    %c0_4 = arith.constant 0 : index
    %c0_5 = arith.constant 0 : index
    %6 = vector.load %arg3[%c0_4, %c0_5] : memref<8x128xf32, #tpu.memory_space<vmem>>, vector<8x128xf32>
    %7 = vector.broadcast %4 : vector<8x1xf32> to vector<8x128xf32>
    %8 = arith.mulf %6, %7 : vector<8x128xf32>
    %9 = arith.addf %5, %8 : vector<8x128xf32>
    %c0_6 = arith.constant 0 : index
    %c0_7 = arith.constant 0 : index
    %10 = vector.load %arg2[%c0_6, %c0_7] : memref<8x6xf32, #tpu.memory_space<vmem>>, vector<8x6xf32>
    %c0_8 = arith.constant 0 : index
    %c0_9 = arith.constant 0 : index
    %11 = vector.load %arg4[%c0_8, %c0_9] : memref<8x6xf32, #tpu.memory_space<vmem>>, vector<8x6xf32>
    %12 = vector.broadcast %4 : vector<8x1xf32> to vector<8x6xf32>
    %13 = arith.mulf %11, %12 : vector<8x6xf32>
    %14 = arith.addf %10, %13 : vector<8x6xf32>
    %c0_10 = arith.constant 0 : index
    %c0_11 = arith.constant 0 : index
    %15 = vector.load %arg6[%c0_10, %c0_11] : memref<6x128xf32, #tpu.memory_space<vmem>>, vector<1x128xf32>
    %16 = vector.shape_cast %15 : vector<1x128xf32> to vector<128xf32>
    %c1 = arith.constant 1 : index
    %c0_12 = arith.constant 0 : index
    %17 = vector.load %arg6[%c1, %c0_12] : memref<6x128xf32, #tpu.memory_space<vmem>>, vector<1x128xf32>
    %18 = vector.shape_cast %17 : vector<1x128xf32> to vector<128xf32>
    %cst_13 = arith.constant dense<0.000000e+00> : vector<8xf32>
    %19 = vector.multi_reduction <add>, %9, %cst_13 [1] : vector<8x128xf32> to vector<8xf32>
    %20 = vector.shape_cast %19 : vector<8xf32> to vector<8x1xf32>
    %cst_14 = arith.constant 1.280000e+02 : f32
    %21 = vector.broadcast %cst_14 : f32 to vector<8x1xf32>
    %22 = arith.divf %20, %21 : vector<8x1xf32>
    %23 = vector.broadcast %22 : vector<8x1xf32> to vector<8x128xf32>
    %24 = arith.subf %9, %23 : vector<8x128xf32>
    %25 = arith.mulf %24, %24 : vector<8x128xf32>
    %cst_15 = arith.constant dense<0.000000e+00> : vector<8xf32>
    %26 = vector.multi_reduction <add>, %25, %cst_15 [1] : vector<8x128xf32> to vector<8xf32>
    %27 = vector.shape_cast %26 : vector<8xf32> to vector<8x1xf32>
    %cst_16 = arith.constant 1.280000e+02 : f32
    %28 = vector.broadcast %cst_16 : f32 to vector<8x1xf32>
    %29 = arith.divf %27, %28 : vector<8x1xf32>
    %30 = vector.broadcast %22 : vector<8x1xf32> to vector<8x128xf32>
    %31 = arith.subf %9, %30 : vector<8x128xf32>
    %cst_17 = arith.constant 9.99999974E-6 : f32
    %32 = vector.broadcast %cst_17 : f32 to vector<8x1xf32>
    %33 = arith.addf %29, %32 : vector<8x1xf32>
    %34 = math.rsqrt %33 : vector<8x1xf32>
    %35 = vector.broadcast %34 : vector<8x1xf32> to vector<8x128xf32>
    %36 = arith.mulf %31, %35 : vector<8x128xf32>
    %37 = vector.shape_cast %16 : vector<128xf32> to vector<1x128xf32>
    %38 = vector.broadcast %37 : vector<1x128xf32> to vector<8x128xf32>
    %39 = arith.mulf %36, %38 : vector<8x128xf32>
    %40 = vector.shape_cast %18 : vector<128xf32> to vector<1x128xf32>
    %41 = vector.broadcast %40 : vector<1x128xf32> to vector<8x128xf32>
    %42 = arith.addf %39, %41 : vector<8x128xf32>
    %43 = vector.extract_strided_slice %14 {offsets = [0, 0], sizes = [8, 2], strides = [1, 1]} : vector<8x6xf32> to vector<8x2xf32>
    %44 = vector.extract_strided_slice %14 {offsets = [0, 2], sizes = [8, 2], strides = [1, 1]} : vector<8x6xf32> to vector<8x2xf32>
    %45 = vector.extract_strided_slice %14 {offsets = [0, 4], sizes = [8, 2], strides = [1, 1]} : vector<8x6xf32> to vector<8x2xf32>
    %46 = arith.mulf %43, %43 : vector<8x2xf32>
    %47 = arith.mulf %44, %44 : vector<8x2xf32>
    %48 = arith.addf %46, %47 : vector<8x2xf32>
    %49 = arith.mulf %45, %45 : vector<8x2xf32>
    %50 = arith.addf %48, %49 : vector<8x2xf32>
    %cst_18 = arith.constant 9.99999993E-9 : f32
    %51 = vector.broadcast %cst_18 : f32 to vector<8x2xf32>
    %52 = arith.maximumf %50, %51 : vector<8x2xf32>
    %cst_19 = arith.constant dense<0.000000e+00> : vector<8xf32>
    %53 = vector.multi_reduction <add>, %52, %cst_19 [1] : vector<8x2xf32> to vector<8xf32>
    %54 = vector.shape_cast %53 : vector<8xf32> to vector<8x1xf32>
    %cst_20 = arith.constant 2.000000e+00 : f32
    %55 = vector.broadcast %cst_20 : f32 to vector<8x1xf32>
    %56 = arith.divf %54, %55 : vector<8x1xf32>
    %57 = math.rsqrt %56 : vector<8x1xf32>
    %58 = vector.broadcast %57 : vector<8x1xf32> to vector<8x6xf32>
    %59 = arith.mulf %14, %58 : vector<8x6xf32>
    %c0_21 = arith.constant 0 : index
    %c0_22 = arith.constant 0 : index
    %60 = vector.load %arg7[%c0_21, %c0_22] : memref<6x12xf32, #tpu.memory_space<vmem>>, vector<6x12xf32>
    %cst_23 = arith.constant dense<0.000000e+00> : vector<8x12xf32>
    %61 = tpu.matmul %59, %60, %cst_23 {dimension_numbers = #tpu.dot_dimension_numbers<[1], [0], [0], [1], [0, 0, 1, 1], [], []>} : vector<8x6xf32>, vector<6x12xf32>, vector<8x12xf32> -> vector<8x12xf32>
    %62 = vector.extract_strided_slice %61 {offsets = [0, 0], sizes = [8, 4], strides = [1, 1]} : vector<8x12xf32> to vector<8x4xf32>
    %63 = vector.extract_strided_slice %61 {offsets = [0, 4], sizes = [8, 4], strides = [1, 1]} : vector<8x12xf32> to vector<8x4xf32>
    %64 = vector.extract_strided_slice %61 {offsets = [0, 8], sizes = [8, 4], strides = [1, 1]} : vector<8x12xf32> to vector<8x4xf32>
    %65 = arith.mulf %62, %62 : vector<8x4xf32>
    %66 = arith.mulf %63, %63 : vector<8x4xf32>
    %67 = arith.addf %65, %66 : vector<8x4xf32>
    %68 = arith.mulf %64, %64 : vector<8x4xf32>
    %69 = arith.addf %67, %68 : vector<8x4xf32>
    %cst_24 = arith.constant 9.99999993E-9 : f32
    %70 = vector.broadcast %cst_24 : f32 to vector<8x4xf32>
    %71 = arith.maximumf %69, %70 : vector<8x4xf32>
    %72 = math.sqrt %71 : vector<8x4xf32>
    %c0_25 = arith.constant 0 : index
    %c0_26 = arith.constant 0 : index
    %73 = vector.load %arg8[%c0_25, %c0_26] : memref<128x512xbf16, #tpu.memory_space<vmem>>, vector<128x512xbf16>
    %74 = arith.truncf %42 : vector<8x128xf32> to vector<8x128xbf16>
    %cst_27 = arith.constant dense<0.000000e+00> : vector<8x512xf32>
    %75 = tpu.matmul %74, %73, %cst_27 {dimension_numbers = #tpu.dot_dimension_numbers<[1], [0], [0], [1], [0, 0, 1, 1], [], []>} : vector<8x128xbf16>, vector<128x512xbf16>, vector<8x512xf32> -> vector<8x512xf32>
    %c0_28 = arith.constant 0 : index
    %c0_29 = arith.constant 0 : index
    %76 = vector.load %arg9[%c0_28, %c0_29] : memref<4x512xbf16, #tpu.memory_space<vmem>>, vector<4x512xbf16>
    %77 = arith.truncf %72 : vector<8x4xf32> to vector<8x4xbf16>
    %cst_30 = arith.constant dense<0.000000e+00> : vector<8x512xf32>
    %78 = tpu.matmul %77, %76, %cst_30 {dimension_numbers = #tpu.dot_dimension_numbers<[1], [0], [0], [1], [0, 0, 1, 1], [], []>} : vector<8x4xbf16>, vector<4x512xbf16>, vector<8x512xf32> -> vector<8x512xf32>
    %79 = arith.addf %75, %78 : vector<8x512xf32>
    %c0_31 = arith.constant 0 : index
    %c0_32 = arith.constant 0 : index
    %80 = vector.load %arg10[%c0_31, %c0_32] : memref<1x512xf32, #tpu.memory_space<vmem>>, vector<1x512xf32>
    %81 = vector.broadcast %80 : vector<1x512xf32> to vector<8x512xf32>
    %82 = arith.addf %79, %81 : vector<8x512xf32>
    %cst_33 = arith.constant 0.000000e+00 : f32
    %83 = vector.broadcast %cst_33 : f32 to vector<8x512xf32>
    %84 = arith.maximumf %82, %83 : vector<8x512xf32>
    %c0_34 = arith.constant 0 : index
    %c0_35 = arith.constant 0 : index
    %85 = vector.load %arg11[%c0_34, %c0_35] : memref<12x12xf32, #tpu.memory_space<vmem>>, vector<12x12xf32>
    %cst_36 = arith.constant dense<0.000000e+00> : vector<8x12xf32>
    %86 = tpu.matmul %61, %85, %cst_36 {dimension_numbers = #tpu.dot_dimension_numbers<[1], [0], [0], [1], [0, 0, 1, 1], [], []>} : vector<8x12xf32>, vector<12x12xf32>, vector<8x12xf32> -> vector<8x12xf32>
    %87 = vector.extract_strided_slice %86 {offsets = [0, 0], sizes = [8, 4], strides = [1, 1]} : vector<8x12xf32> to vector<8x4xf32>
    %88 = vector.extract_strided_slice %86 {offsets = [0, 4], sizes = [8, 4], strides = [1, 1]} : vector<8x12xf32> to vector<8x4xf32>
    %89 = vector.extract_strided_slice %86 {offsets = [0, 8], sizes = [8, 4], strides = [1, 1]} : vector<8x12xf32> to vector<8x4xf32>
    %90 = arith.mulf %87, %87 : vector<8x4xf32>
    %91 = arith.mulf %88, %88 : vector<8x4xf32>
    %92 = arith.addf %90, %91 : vector<8x4xf32>
    %93 = arith.mulf %89, %89 : vector<8x4xf32>
    %94 = arith.addf %92, %93 : vector<8x4xf32>
    %cst_37 = arith.constant 9.99999993E-9 : f32
    %95 = vector.broadcast %cst_37 : f32 to vector<8x4xf32>
    %96 = arith.maximumf %94, %95 : vector<8x4xf32>
    %97 = math.sqrt %96 : vector<8x4xf32>
    %98 = arith.negf %97 : vector<8x4xf32>
    %99 = math.exp %98 : vector<8x4xf32>
    %cst_38 = arith.constant 1.000000e+00 : f32
    %100 = vector.broadcast %cst_38 : f32 to vector<8x4xf32>
    %101 = arith.addf %100, %99 : vector<8x4xf32>
    %102 = arith.divf %100, %101 : vector<8x4xf32>
    %103 = tpu.concatenate %102, %102, %102 in 1 : vector<8x4xf32>, vector<8x4xf32>, vector<8x4xf32> -> vector<8x12xf32>
    %104 = arith.mulf %86, %103 : vector<8x12xf32>
    %c0_39 = arith.constant 0 : index
    %c0_40 = arith.constant 0 : index
    %105 = vector.load %arg12[%c0_39, %c0_40] : memref<12x12xf32, #tpu.memory_space<vmem>>, vector<12x12xf32>
    %cst_41 = arith.constant dense<0.000000e+00> : vector<8x12xf32>
    %106 = tpu.matmul %104, %105, %cst_41 {dimension_numbers = #tpu.dot_dimension_numbers<[1], [0], [0], [1], [0, 0, 1, 1], [], []>} : vector<8x12xf32>, vector<12x12xf32>, vector<8x12xf32> -> vector<8x12xf32>
    %107 = vector.extract_strided_slice %106 {offsets = [0, 0], sizes = [8, 4], strides = [1, 1]} : vector<8x12xf32> to vector<8x4xf32>
    %108 = vector.extract_strided_slice %106 {offsets = [0, 4], sizes = [8, 4], strides = [1, 1]} : vector<8x12xf32> to vector<8x4xf32>
    %109 = vector.extract_strided_slice %106 {offsets = [0, 8], sizes = [8, 4], strides = [1, 1]} : vector<8x12xf32> to vector<8x4xf32>
    %110 = arith.mulf %107, %107 : vector<8x4xf32>
    %111 = arith.mulf %108, %108 : vector<8x4xf32>
    %112 = arith.addf %110, %111 : vector<8x4xf32>
    %113 = arith.mulf %109, %109 : vector<8x4xf32>
    %114 = arith.addf %112, %113 : vector<8x4xf32>
    %cst_42 = arith.constant 9.99999993E-9 : f32
    %115 = vector.broadcast %cst_42 : f32 to vector<8x4xf32>
    %116 = arith.maximumf %114, %115 : vector<8x4xf32>
    %117 = math.sqrt %116 : vector<8x4xf32>
    %c0_43 = arith.constant 0 : index
    %c0_44 = arith.constant 0 : index
    %118 = vector.load %arg13[%c0_43, %c0_44] : memref<512x128xbf16, #tpu.memory_space<vmem>>, vector<512x128xbf16>
    %119 = arith.truncf %84 : vector<8x512xf32> to vector<8x512xbf16>
    %cst_45 = arith.constant dense<0.000000e+00> : vector<8x128xf32>
    %120 = tpu.matmul %119, %118, %cst_45 {dimension_numbers = #tpu.dot_dimension_numbers<[1], [0], [0], [1], [0, 0, 1, 1], [], []>} : vector<8x512xbf16>, vector<512x128xbf16>, vector<8x128xf32> -> vector<8x128xf32>
    %c0_46 = arith.constant 0 : index
    %c0_47 = arith.constant 0 : index
    %121 = vector.load %arg14[%c0_46, %c0_47] : memref<4x128xbf16, #tpu.memory_space<vmem>>, vector<4x128xbf16>
    %122 = arith.truncf %117 : vector<8x4xf32> to vector<8x4xbf16>
    %cst_48 = arith.constant dense<0.000000e+00> : vector<8x128xf32>
    %123 = tpu.matmul %122, %121, %cst_48 {dimension_numbers = #tpu.dot_dimension_numbers<[1], [0], [0], [1], [0, 0, 1, 1], [], []>} : vector<8x4xbf16>, vector<4x128xbf16>, vector<8x128xf32> -> vector<8x128xf32>
    %124 = arith.addf %120, %123 : vector<8x128xf32>
    %c2 = arith.constant 2 : index
    %c0_49 = arith.constant 0 : index
    %125 = vector.load %arg6[%c2, %c0_49] : memref<6x128xf32, #tpu.memory_space<vmem>>, vector<1x128xf32>
    %126 = vector.shape_cast %125 : vector<1x128xf32> to vector<128xf32>
    %127 = vector.shape_cast %126 : vector<128xf32> to vector<1x128xf32>
    %128 = vector.broadcast %127 : vector<1x128xf32> to vector<8x128xf32>
    %129 = arith.addf %124, %128 : vector<8x128xf32>
    %130 = arith.addf %42, %129 : vector<8x128xf32>
    %c3 = arith.constant 3 : index
    %c0_50 = arith.constant 0 : index
    %131 = vector.load %arg6[%c3, %c0_50] : memref<6x128xf32, #tpu.memory_space<vmem>>, vector<1x128xf32>
    %132 = vector.shape_cast %131 : vector<1x128xf32> to vector<128xf32>
    %c4 = arith.constant 4 : index
    %c0_51 = arith.constant 0 : index
    %133 = vector.load %arg6[%c4, %c0_51] : memref<6x128xf32, #tpu.memory_space<vmem>>, vector<1x128xf32>
    %134 = vector.shape_cast %133 : vector<1x128xf32> to vector<128xf32>
    %cst_52 = arith.constant dense<0.000000e+00> : vector<8xf32>
    %135 = vector.multi_reduction <add>, %130, %cst_52 [1] : vector<8x128xf32> to vector<8xf32>
    %136 = vector.shape_cast %135 : vector<8xf32> to vector<8x1xf32>
    %cst_53 = arith.constant 1.280000e+02 : f32
    %137 = vector.broadcast %cst_53 : f32 to vector<8x1xf32>
    %138 = arith.divf %136, %137 : vector<8x1xf32>
    %139 = vector.broadcast %138 : vector<8x1xf32> to vector<8x128xf32>
    %140 = arith.subf %130, %139 : vector<8x128xf32>
    %141 = arith.mulf %140, %140 : vector<8x128xf32>
    %cst_54 = arith.constant dense<0.000000e+00> : vector<8xf32>
    %142 = vector.multi_reduction <add>, %141, %cst_54 [1] : vector<8x128xf32> to vector<8xf32>
    %143 = vector.shape_cast %142 : vector<8xf32> to vector<8x1xf32>
    %cst_55 = arith.constant 1.280000e+02 : f32
    %144 = vector.broadcast %cst_55 : f32 to vector<8x1xf32>
    %145 = arith.divf %143, %144 : vector<8x1xf32>
    %146 = vector.broadcast %138 : vector<8x1xf32> to vector<8x128xf32>
    %147 = arith.subf %130, %146 : vector<8x128xf32>
    %cst_56 = arith.constant 9.99999974E-6 : f32
    %148 = vector.broadcast %cst_56 : f32 to vector<8x1xf32>
    %149 = arith.addf %145, %148 : vector<8x1xf32>
    %150 = math.rsqrt %149 : vector<8x1xf32>
    %151 = vector.broadcast %150 : vector<8x1xf32> to vector<8x128xf32>
    %152 = arith.mulf %147, %151 : vector<8x128xf32>
    %153 = vector.shape_cast %132 : vector<128xf32> to vector<1x128xf32>
    %154 = vector.broadcast %153 : vector<1x128xf32> to vector<8x128xf32>
    %155 = arith.mulf %152, %154 : vector<8x128xf32>
    %156 = vector.shape_cast %134 : vector<128xf32> to vector<1x128xf32>
    %157 = vector.broadcast %156 : vector<1x128xf32> to vector<8x128xf32>
    %158 = arith.addf %155, %157 : vector<8x128xf32>
    %c5 = arith.constant 5 : index
    %c0_57 = arith.constant 0 : index
    %159 = vector.load %arg6[%c5, %c0_57] : memref<6x128xf32, #tpu.memory_space<vmem>>, vector<1x128xf32>
    %160 = vector.shape_cast %159 : vector<1x128xf32> to vector<128xf32>
    %161 = vector.shape_cast %160 : vector<128xf32> to vector<1x128xf32>
    %162 = vector.broadcast %161 : vector<1x128xf32> to vector<8x128xf32>
    %163 = arith.mulf %158, %162 : vector<8x128xf32>
    %cst_58 = arith.constant dense<0.000000e+00> : vector<8xf32>
    %164 = vector.multi_reduction <add>, %163, %cst_58 [1] : vector<8x128xf32> to vector<8xf32>
    %165 = vector.shape_cast %164 : vector<8xf32> to vector<8x1xf32>
    %c0_59 = arith.constant 0 : index
    %c0_60 = arith.constant 0 : index
    %166 = vector.load %arg15[%c0_59, %c0_60] : memref<1x1xf32, #tpu.memory_space<vmem>>, vector<1x1xf32>
    %167 = vector.broadcast %166 : vector<1x1xf32> to vector<8x1xf32>
    %168 = arith.addf %165, %167 : vector<8x1xf32>
    %169 = arith.negf %168 : vector<8x1xf32>
    %170 = math.exp %169 : vector<8x1xf32>
    %cst_61 = arith.constant 1.000000e+00 : f32
    %171 = vector.broadcast %cst_61 : f32 to vector<8x1xf32>
    %172 = arith.addf %171, %170 : vector<8x1xf32>
    %173 = arith.divf %171, %172 : vector<8x1xf32>
    %c0_62 = arith.constant 0 : index
    %c0_63 = arith.constant 0 : index
    %174 = vector.load %arg16[%c0_62, %c0_63] : memref<8x1xf32, #tpu.memory_space<vmem>>, vector<8x1xf32>
    tpu.vector_store %arg16[%c0_62, %c0_63], %173 {strides = array<i32>} : memref<8x1xf32, #tpu.memory_space<vmem>>, vector<8x1xf32>,
    return
  }
  func.func @transform_0(%arg0: i32) -> (i32, i32) {
    %c0_i32 = arith.constant 0 : i32
    %c0_i32_0 = arith.constant 0 : i32
    return %arg0, %c0_i32 : i32, i32
  }
  func.func @transform_1(%arg0: i32) -> (i32, i32) {
    %c0_i32 = arith.constant 0 : i32
    %c0_i32_0 = arith.constant 0 : i32
    return %arg0, %c0_i32 : i32, i32
  }
  func.func @transform_2(%arg0: i32) -> (i32, i32) {
    %c0_i32 = arith.constant 0 : i32
    %c0_i32_0 = arith.constant 0 : i32
    return %arg0, %c0_i32 : i32, i32
  }
  func.func @transform_3(%arg0: i32) -> (i32, i32) {
    %c0_i32 = arith.constant 0 : i32
    %c0_i32_0 = arith.constant 0 : i32
    return %arg0, %c0_i32 : i32, i32
  }
  func.func @transform_4(%arg0: i32) -> (i32, i32) {
    %c0_i32 = arith.constant 0 : i32
    %c0_i32_0 = arith.constant 0 : i32
    return %arg0, %c0_i32 : i32, i32
  }
  func.func @transform_5(%arg0: i32) -> (i32, i32) {
    %c0_i32 = arith.constant 0 : i32
    %c0_i32_0 = arith.constant 0 : i32
    %c0_i32_1 = arith.constant 0 : i32
    return %c0_i32, %c0_i32_0 : i32, i32
  }
  func.func @transform_6(%arg0: i32) -> (i32, i32) {
    %c0_i32 = arith.constant 0 : i32
    %c0_i32_0 = arith.constant 0 : i32
    %c0_i32_1 = arith.constant 0 : i32
    return %c0_i32, %c0_i32_0 : i32, i32
  }
  func.func @transform_7(%arg0: i32) -> (i32, i32) {
    %c0_i32 = arith.constant 0 : i32
    %c0_i32_0 = arith.constant 0 : i32
    %c0_i32_1 = arith.constant 0 : i32
    return %c0_i32, %c0_i32_0 : i32, i32
  }
  func.func @transform_8(%arg0: i32) -> (i32, i32) {
    %c0_i32 = arith.constant 0 : i32
    %c0_i32_0 = arith.constant 0 : i32
    %c0_i32_1 = arith.constant 0 : i32
    return %c0_i32, %c0_i32_0 : i32, i32
  }
  func.func @transform_9(%arg0: i32) -> (i32, i32) {
    %c0_i32 = arith.constant 0 : i32
    %c0_i32_0 = arith.constant 0 : i32
    %c0_i32_1 = arith.constant 0 : i32
    return %c0_i32, %c0_i32_0 : i32, i32
  }
  func.func @transform_10(%arg0: i32) -> (i32, i32) {
    %c0_i32 = arith.constant 0 : i32
    %c0_i32_0 = arith.constant 0 : i32
    %c0_i32_1 = arith.constant 0 : i32
    return %c0_i32, %c0_i32_0 : i32, i32
  }
  func.func @transform_11(%arg0: i32) -> (i32, i32) {
    %c0_i32 = arith.constant 0 : i32
    %c0_i32_0 = arith.constant 0 : i32
    %c0_i32_1 = arith.constant 0 : i32
    return %c0_i32, %c0_i32_0 : i32, i32
  }
  func.func @transform_12(%arg0: i32) -> (i32, i32) {
    %c0_i32 = arith.constant 0 : i32
    %c0_i32_0 = arith.constant 0 : i32
    %c0_i32_1 = arith.constant 0 : i32
    return %c0_i32, %c0_i32_0 : i32, i32
  }
  func.func @transform_13(%arg0: i32) -> (i32, i32) {
    %c0_i32 = arith.constant 0 : i32
    %c0_i32_0 = arith.constant 0 : i32
    %c0_i32_1 = arith.constant 0 : i32
    return %c0_i32, %c0_i32_0 : i32, i32
  }
  func.func @transform_14(%arg0: i32) -> (i32, i32) {
    %c0_i32 = arith.constant 0 : i32
    %c0_i32_0 = arith.constant 0 : i32
    %c0_i32_1 = arith.constant 0 : i32
    return %c0_i32, %c0_i32_0 : i32, i32
  }
  func.func @transform_15(%arg0: i32) -> (i32, i32) {
    %c0_i32 = arith.constant 0 : i32
    %c0_i32_0 = arith.constant 0 : i32
    return %arg0, %c0_i32 : i32, i32
  }
}

</mosaic_0001>

<bundles_post_ra>
// kernel: scoring_model_forward.3
= control target key start
LH: loop header
LB: loop body
LE: loop exit
PB: predicated region body
PF: predicated region fallthrough
CT: control target
= control target key end

     0   :  { %s1567_s12 = smov 0   ;;  %s1889_s0 = inlined_call_operand.vmem [shape: f32[16,1433], index: 0, kind: input, shape index: {}]   ;;  %s1890_s1 = inlined_call_operand.vmem [shape: bf16[1433,128], index: 1, kind: input, shape index: {}]   ;;  %s1891_s2 = inlined_call_operand.vmem [shape: f32[1,128], index: 2, kind: input, shape index: {}]   ;;  %s1892_s3 = inlined_call_operand.vmem [shape: f32[16,128], index: 3, kind: output, shape index: {}]  }
   0x1 LB: > { %s1225_s13 = sadd.s32 4294967295, %s1543_s12   ;;  %p1229_p0 = scmp.ge.s32.totalorder %s1543_s12, 1  ;;  %s1543_s12 = sphi %s1567_s12, %s13_s12  }
   0x2   : > { %p137_p1 = scmp.lt.s32.totalorder %s1543_s12, 3 }
   0x4   : > { %p138_p2 = pnand %p1229_p0, %p137_p1 }
   0x5   : > { %v1447_v0 = vld [vmem:[%s1890_s1 + $0x40] sm:$0xff] (!%p138_p2)   ;;  %v1451_v4 = vld [vmem:[%s1890_s1 + $0x48] sm:$0xff] (!%p138_p2)   ;;  %v1455_v8 = vld [vmem:[%s1890_s1 + $0x50] sm:$0xff] (!%p138_p2)   ;;  %p160_p3 = scmp.lt.s32.totalorder (!%p138_p2), %s1225_s13, 1  ;;  %vm924_vm0 = vcmask (!%p138_p2), 1043456   ;;  %vm920_vm1 = vcmask (!%p138_p2), 203776  }
   0x6   : > { %141 = sbr.rel (%p138_p2) target bundleno = 327 (0x147), region = 32  ;;  %v1448_v1 = vld [vmem:[%s1890_s1 + $0xc0] sm:$0xff] (!%p138_p2)   ;;  %1326 = vmatprep.subr.bf16.mxu0 (!%p138_p2), %v1447_v0  ;;  %v1452_v5 = vld [vmem:[%s1890_s1 + $0xc8] sm:$0xff] (!%p138_p2)   ;;  %v1456_v9 = vld [vmem:[%s1890_s1 + $0xd0] sm:$0xff] (!%p138_p2)   ;;  %vm925_vm2 = vcmask (!%p138_p2), 1044480  }
   0x7   : > { %v1449_v2 = vld [vmem:[%s1890_s1] sm:$0xff] (!%p138_p2)   ;;  %1348 = vmatprep.subr.bf16.mxu1 (!%p138_p2), %v1448_v1  ;;  %v1453_v6 = vld [vmem:[%s1890_s1 + $0x8] sm:$0xff] (!%p138_p2)   ;;  %v1457_v10 = vld [vmem:[%s1890_s1 + $0x10] sm:$0xff] (!%p138_p2)  }
   0x8   : > { %v1450_v3 = vld [vmem:[%s1890_s1 + $0x80] sm:$0xff] (!%p138_p2)   ;;  %1327 = vmatpush3.bf16.msra.mxu0 (!%p138_p2), %v1449_v2  ;;  %v1454_v7 = vld [vmem:[%s1890_s1 + $0x88] sm:$0xff] (!%p138_p2)   ;;  %v1458_v11 = vld [vmem:[%s1890_s1 + $0x90] sm:$0xff] (!%p138_p2)  }
   0x9   : > { %1349 = vmatpush3.bf16.msra.mxu1 (!%p138_p2), %v1450_v3  ;;  %1328 = vmatprep.subr.bf16.mxu0 (!%p138_p2), %v1451_v4  ;;  %v1459_v12 = vld [vmem:[%s1890_s1 + $0x58] sm:$0xff] (!%p138_p2)   ;;  %v1463_v16 = vld [vmem:[%s1890_s1 + $0x60] sm:$0xff] (!%p138_p2)   ;;  %v1467_v20 = vld [vmem:[%s1890_s1 + $0x68] sm:$0xff] (!%p138_p2)  }
   0xa   : > { %1350 = vmatprep.subr.bf16.mxu1 (!%p138_p2), %v1452_v5  ;;  %v1460_v13 = vld [vmem:[%s1890_s1 + $0xd8] sm:$0xff] (!%p138_p2)   ;;  %v1464_v17 = vld [vmem:[%s1890_s1 + $0xe0] sm:$0xff] (!%p138_p2)   ;;  %v1468_v21 = vld [vmem:[%s1890_s1 + $0xe8] sm:$0xff] (!%p138_p2)  }
   0xb   : > { %v1461_v14 = vld [vmem:[%s1890_s1 + $0x18] sm:$0xff] (!%p138_p2)   ;;  %v1465_v18 = vld [vmem:[%s1890_s1 + $0x20] sm:$0xff] (!%p138_p2)   ;;  %v1469_v22 = vld [vmem:[%s1890_s1 + $0x28] sm:$0xff] (!%p138_p2)  }
   0xc   : > { %1329 = vmatpush3.bf16.msra.mxu0 (!%p138_p2), %v1453_v6  ;;  %v1462_v15 = vld [vmem:[%s1890_s1 + $0x98] sm:$0xff] (!%p138_p2)   ;;  %v1466_v19 = vld [vmem:[%s1890_s1 + $0xa0] sm:$0xff] (!%p138_p2)   ;;  %v1470_v23 = vld [vmem:[%s1890_s1 + $0xa8] sm:$0xff] (!%p138_p2)  }
   0xd   : > { %1351 = vmatpush3.bf16.msra.mxu1 %v1454_v7  ;;  %1330 = vmatprep.subr.bf16.mxu0 %v1455_v8  ;;  %s1894_s13 = smov (!%p160_p3, %s1225_s13), 1  ;;  %v1471_v24 = vld [vmem:[%s1890_s1 + $0x70] sm:$0xff]   ;;  %v1475_v28 = vld [vmem:[%s1890_s1 + $0x78] sm:$0xff]   ;;  %v1479_v40 = vld [vmem:[%s1890_s1 + $0x140] sm:$0xff]  }
   0xe   : > { %1352 = vmatprep.subr.bf16.mxu1 %v1456_v9  ;;  %v1472_v25 = vld [vmem:[%s1890_s1 + $0xf0] sm:$0xff]   ;;  %s1436_s16 = smul.u32 96, %s1894_s13  ;;  %v1476_v29 = vld [vmem:[%s1890_s1 + $0xf8] sm:$0xff]   ;;  %v1480_v41 = vld [vmem:[%s1890_s1 + $0x1c0] sm:$0xff]  }
   0xf   : > { %v1473_v26 = vld [vmem:[%s1890_s1 + $0x30] sm:$0xff]   ;;  %v1477_v30 = vld [vmem:[%s1890_s1 + $0x38] sm:$0xff]   ;;  %v1481_v42 = vld [vmem:[%s1890_s1 + $0x100] sm:$0xff]  }
  0x10   : > { %1331 = vmatpush3.bf16.msra.mxu0 %v1457_v10  ;;  %v1474_v27 = vld [vmem:[%s1890_s1 + $0xb0] sm:$0xff]   ;;  %s1675_s27 = scalar_lea.vmem %s1889_s0, %s1436_s16  ;;  %v1478_v31 = vld [vmem:[%s1890_s1 + $0xb8] sm:$0xff]   ;;  %v1482_v43 = vld [vmem:[%s1890_s1 + $0x180] sm:$0xff]  }
  0x11   : > { %1353 = vmatpush3.bf16.msra.mxu1 %v1458_v11  ;;  %1332 = vmatprep.subr.bf16.mxu0 %v1459_v12  ;;  %v171_v32 = vld [vmem:[%s1675_s27 + $0x8] sm:$0xff]  ;;  %v173_v33 = vld [vmem:[%s1675_s27 + $0x18] sm:$0xff]  ;;  %v170_v34 = vld [vmem:[%s1675_s27] sm:$0xff] }
  0x12   : > { %1354 = vmatprep.subr.bf16.mxu1 %v1460_v13  ;;  %v183_v35 = vpack.c.bf16 %v171_v32, %v171_v32  ;;  %v185_v36 = vpack.c.bf16 %v173_v33, %v173_v33  ;;  %v182_v37 = vpack.c.bf16 %v170_v34, %v170_v34  ;;  %v172_v38 = vld [vmem:[%s1675_s27 + $0x10] sm:$0xff]  ;;  %v1483_v44 = vld [vmem:[%s1890_s1 + $0x148] sm:$0xff]   ;;  %v1491_v52 = vld [vmem:[%s1890_s1 + $0x158] sm:$0xff]  }
  0x13   : > { %v184_v39 = vpack.c.bf16 %v172_v38, %v172_v38  ;;  %v1484_v45 = vld [vmem:[%s1890_s1 + $0x1c8] sm:$0xff]   ;;  %v1487_v48 = vld [vmem:[%s1890_s1 + $0x150] sm:$0xff]   ;;  %v1492_v53 = vld [vmem:[%s1890_s1 + $0x1d8] sm:$0xff]  }
  0x14   : > { %1333 = vmatpush3.bf16.msra.mxu0 %v1461_v14  ;;  %963 = vmatprep.mubr.bf16.mxu0 %v183_v35  ;;  %v1485_v46 = vld [vmem:[%s1890_s1 + $0x108] sm:$0xff]   ;;  %v1488_v49 = vld [vmem:[%s1890_s1 + $0x1d0] sm:$0xff]   ;;  %v1493_v54 = vld [vmem:[%s1890_s1 + $0x118] sm:$0xff]  }
  0x15   : > { %1355 = vmatpush3.bf16.msra.mxu1 %v1462_v15  ;;  %1334 = vmatprep.subr.bf16.mxu0 %v1463_v16  ;;  %v1486_v47 = vld [vmem:[%s1890_s1 + $0x188] sm:$0xff]   ;;  %v1489_v50 = vld [vmem:[%s1890_s1 + $0x110] sm:$0xff]   ;;  %v1494_v55 = vld [vmem:[%s1890_s1 + $0x198] sm:$0xff]  }
  0x16   : > { %1356 = vmatprep.subr.bf16.mxu1 %v1464_v17  ;;  %1003 = vmatprep.mubr.bf16.mxu1 %v185_v36  ;;  %v1490_v51 = vld [vmem:[%s1890_s1 + $0x190] sm:$0xff]   ;;  %v1495_v56 = vld [vmem:[%s1890_s1 + $0x160] sm:$0xff]   ;;  %v1499_v60 = vld [vmem:[%s1890_s1 + $0x168] sm:$0xff]  }
  0x17   : > { %v1496_v57 = vld [vmem:[%s1890_s1 + $0x1e0] sm:$0xff]   ;;  %v1500_v61 = vld [vmem:[%s1890_s1 + $0x1e8] sm:$0xff]   ;;  %v1503_v0 = vld [vmem:[%s1890_s1 + $0x170] sm:$0xff]  }
  0x18   : > { %1335 = vmatpush3.bf16.msra.mxu0 %v1465_v18  ;;  %v1497_v58 = vld [vmem:[%s1890_s1 + $0x120] sm:$0xff]   ;;  %v1501_v62 = vld [vmem:[%s1890_s1 + $0x128] sm:$0xff]   ;;  %v1504_v1 = vld [vmem:[%s1890_s1 + $0x1f0] sm:$0xff]  }
  0x19   : > { %1357 = vmatpush3.bf16.msra.mxu1 %v1466_v19  ;;  %1336 = vmatprep.subr.bf16.mxu0 %v1467_v20  ;;  %v1498_v59 = vld [vmem:[%s1890_s1 + $0x1a0] sm:$0xff]   ;;  %v1502_v63 = vld [vmem:[%s1890_s1 + $0x1a8] sm:$0xff]   ;;  %v1505_v2 = vld [vmem:[%s1890_s1 + $0x130] sm:$0xff]   ;;  %v1545_v19 = vmov 0  }
  0x1a   : > { %1358 = vmatprep.subr.bf16.mxu1 %v1468_v21  ;;  %v1506_v3 = vld [vmem:[%s1890_s1 + $0x1b0] sm:$0xff]   ;;  %v1507_v4 = vld [vmem:[%s1890_s1 + $0x178] sm:$0xff]   ;;  %v175_v8 = vld [vmem:[%s1675_s27 + $0x28] sm:$0xff] }
  0x1b   : > { %v1508_v5 = vld [vmem:[%s1890_s1 + $0x1f8] sm:$0xff]   ;;  %v187_v10 = vpack.c.bf16 %v175_v8, %v175_v8  ;;  %v174_v12 = vld [vmem:[%s1675_s27 + $0x20] sm:$0xff]  ;;  %v176_v13 = vld [vmem:[%s1675_s27 + $0x30] sm:$0xff] }
  0x1c   : > { %1337 = vmatpush3.bf16.msra.mxu0 %v1469_v22  ;;  %v1509_v6 = vld [vmem:[%s1890_s1 + $0x138] sm:$0xff]   ;;  %v186_v14 = vpack.c.bf16 %v174_v12, %v174_v12  ;;  %v188_v15 = vpack.c.bf16 %v176_v13, %v176_v13  ;;  %v1511_v16 = vld [vmem:[%s1890_s1 + $0x240] sm:$0xff]   ;;  %v1514_v20 = vld [vmem:[%s1890_s1 + $0x248] sm:$0xff]  }
  0x1d   : > { %1359 = vmatpush3.bf16.msra.mxu1 %v1470_v23  ;;  %1338 = vmatprep.subr.bf16.mxu0 %v1471_v24  ;;  %v1510_v7 = vld [vmem:[%s1890_s1 + $0x1b8] sm:$0xff]   ;;  %v1512_v17 = vld [vmem:[%s1890_s1 + $0x200] sm:$0xff]   ;;  %v1515_v21 = vld [vmem:[%s1890_s1 + $0x208] sm:$0xff]  }
  0x1e   : > { %1360 = vmatprep.subr.bf16.mxu1 %v1472_v25  ;;  %v177_v9 = vld [vmem:[%s1675_s27 + $0x38] sm:$0xff]  ;;  %v1513_v18 = vld [vmem:[%s1890_s1 + $0x280] sm:$0xff]   ;;  %v1516_v22 = vld [vmem:[%s1890_s1 + $0x288] sm:$0xff]  }
  0x1f   : > { %v189_v11 = vpack.c.bf16 %v177_v9, %v177_v9  ;;  %v1517_v23 = vld [vmem:[%s1890_s1 + $0x250] sm:$0xff]   ;;  %v1526_v32 = vld [vmem:[%s1890_s1 + $0x268] sm:$0xff]  }
  0x20   : > { %1339 = vmatpush3.bf16.msra.mxu0 %v1473_v26  ;;  %v1518_v24 = vld [vmem:[%s1890_s1 + $0x210] sm:$0xff]   ;;  %v1520_v26 = vld [vmem:[%s1890_s1 + $0x258] sm:$0xff]   ;;  %v1527_v33 = vld [vmem:[%s1890_s1 + $0x228] sm:$0xff]  }
  0x21   : > { %1361 = vmatpush3.bf16.msra.mxu1 %v1474_v27  ;;  %1340 = vmatprep.subr.bf16.mxu0 %v1475_v28  ;;  %v1519_v25 = vld [vmem:[%s1890_s1 + $0x290] sm:$0xff]   ;;  %v1521_v27 = vld [vmem:[%s1890_s1 + $0x218] sm:$0xff]   ;;  %v1528_v34 = vld [vmem:[%s1890_s1 + $0x2a8] sm:$0xff]  }
  0x22   : > { %1362 = vmatprep.subr.bf16.mxu1 %v1476_v29  ;;  %v1522_v28 = vld [vmem:[%s1890_s1 + $0x298] sm:$0xff]   ;;  %v1523_v29 = vld [vmem:[%s1890_s1 + $0x260] sm:$0xff]   ;;  %v1529_v35 = vld [vmem:[%s1890_s1 + $0x270] sm:$0xff]  }
  0x23   : > { %v1530_v36 = vld [vmem:[%s1890_s1 + $0x230] sm:$0xff]  }
  0x24   : > { %1341 = vmatpush3.bf16.msra.mxu0 %v1477_v30  ;;  %v1524_v30 = vld [vmem:[%s1890_s1 + $0x220] sm:$0xff]   ;;  %v1531_v38 = vld [vmem:[%s1890_s1 + $0x2b0] sm:$0xff]  }
  0x25   : > { %1363 = vmatpush3.bf16.msra.mxu1 %v1478_v31  ;;  %1370 = vmatprep.subr.bf16.mxu0 %v1479_v40  ;;  %v1525_v31 = vld [vmem:[%s1890_s1 + $0x2a0] sm:$0xff]   ;;  %v1532_v40 = vld [vmem:[%s1890_s1 + $0x278] sm:$0xff]  }
  0x26   : > { %1392 = vmatprep.subr.bf16.mxu1 %v1480_v41  ;;  %v181_v41 = vld [vmem:[%s1675_s27 + $0x58] sm:$0xff] }
  0x27   : > { %964 = vmatmul.mubr.bf16.vlgmr.msra.gmra.mrb[0].mxu0 %v182_v37  ;;  %v179_v37 = vld [vmem:[%s1675_s27 + $0x48] sm:$0xff] }
  0x28   : > { %1004 = vmatmul.mubr.bf16.vlgmr.msra.gmra.mrb[0].mxu1 %v184_v39  ;;  %1371 = vmatpush3.bf16.msra.mxu0 %v1481_v42  ;;  %v191_v39 = vpack.c.bf16 %v179_v37, %v179_v37  ;;  %v193_v42 = vpack.c.bf16 %v181_v41, %v181_v41 }
  0x29   : > { %1393 = vmatpush3.bf16.msra.mxu1 %v1482_v43  ;;  %1372 = vmatprep.subr.bf16.mxu0 %v1483_v44  ;;  %v1533_v43 = vld [vmem:[%s1890_s1 + $0x238] sm:$0xff]  }
  0x2a   : > { %1394 = vmatprep.subr.bf16.mxu1 %v1484_v45  ;;  %1043 = vmatprep.mubr.bf16.mxu0 %v187_v10  ;;  %v1534_v44 = vld [vmem:[%s1890_s1 + $0x2b8] sm:$0xff]   ;;  %v178_v45 = vld [vmem:[%s1675_s27 + $0x40] sm:$0xff] }
  0x2b   : > { %1083 = vmatprep.mubr.bf16.mxu1 %v189_v11 }
  0x2c   : > { %1373 = vmatpush3.bf16.msra.mxu0 %v1485_v46  ;;  %v1546_v46 = vmov 65535  }
  0x2d   : > { %1395 = vmatpush3.bf16.msra.mxu1 %v1486_v47  ;;  %1374 = vmatprep.subr.bf16.mxu0 %v1487_v48  ;;  %v926_v47 = vsel %vm924_vm0, 4294967295, %v1546_v46  ;;  %v190_v48 = vpack.c.bf16 %v178_v45, %v178_v45 }
  0x2e   : > { %1396 = vmatprep.subr.bf16.mxu1 %v1488_v49  ;;  %v1535_v49 = vld [vmem:[%s1890_s1 + $0x2c0] sm:$0xff]  }
  0x30   : > { %1375 = vmatpush3.bf16.msra.mxu0 %v1489_v50  ;;  %v1536_v50 = vld [vmem:[%s1890_s1 + $0x2c8] sm:$0x1f]  }
  0x31   : > { %1397 = vmatpush3.bf16.msra.mxu1 %v1490_v51  ;;  %1376 = vmatprep.subr.bf16.mxu0 %v1491_v52  ;;  %v927_v51 = vsel %vm925_vm2, %v926_v47, 0 }
  0x32   : > { %1398 = vmatprep.subr.bf16.mxu1 %v1492_v53  ;;  %v929_v52 = vand.u32 %v1536_v50, %v927_v51  ;;  %v180_v53 = vld [vmem:[%s1675_s27 + $0x50] sm:$0xff]  ;;  %s1231_s27 = sshll.u32 %s1894_s13, 3 }
  0x33   : > { %s168_s5 = scalar_lea.vmem %s1892_s3, %s1231_s27 }
  0x34   : > { %1377 = vmatpush3.bf16.msra.mxu0 %v1493_v54  ;;  %v192_v54 = vpack.c.bf16 %v180_v53, %v180_v53 }
  0x35   : > { %1399 = vmatpush3.bf16.msra.mxu1 %v1494_v55  ;;  %1378 = vmatprep.subr.bf16.mxu0 %v1495_v56 }
  0x36   : > { %1400 = vmatprep.subr.bf16.mxu1 %v1496_v57  ;;  %v1232_v57 = vld [vmem:[%s1891_s2] ss:$0 sm:$0xff] }
  0x38   : > { %1379 = vmatpush3.bf16.msra.mxu0 %v1497_v58 }
  0x39   : > { %1401 = vmatpush3.bf16.msra.mxu1 %v1498_v59  ;;  %1380 = vmatprep.subr.bf16.mxu0 %v1499_v60 }
  0x3a   : > { %1402 = vmatprep.subr.bf16.mxu1 %v1500_v61 }
  0x3c   : > { %1381 = vmatpush3.bf16.msra.mxu0 %v1501_v62 }
  0x3d   : > { %1403 = vmatpush3.bf16.msra.mxu1 %v1502_v63  ;;  %1382 = vmatprep.subr.bf16.mxu0 %v1503_v0 }
  0x3e   : > { %1404 = vmatprep.subr.bf16.mxu1 %v1504_v1 }
  0x40   : > { %1383 = vmatpush3.bf16.msra.mxu0 %v1505_v2 }
  0x41   : > { %1405 = vmatpush3.bf16.msra.mxu1 %v1506_v3  ;;  %1384 = vmatprep.subr.bf16.mxu0 %v1507_v4 }
  0x42   : > { %1406 = vmatprep.subr.bf16.mxu1 %v1508_v5 }
  0x44   : > { %1385 = vmatpush3.bf16.msra.mxu0 %v1509_v6 }
  0x45   : > { %1407 = vmatpush3.bf16.msra.mxu1 %v1510_v7  ;;  %1414 = vmatprep.subr.bf16.mxu0 %v1511_v16 }
  0x46   : > { %1131 = vmatprep.subr.bf16.mxu1 %v1545_v19 }
  0x47   : > { %1044 = vmatmul.mubr.bf16.vlgmr.msra.gmra.mrb[4].mxu0 %v186_v14 }
  0x48   : > { %1084 = vmatmul.mubr.bf16.vlgmr.msra.gmra.mrb[4].mxu1 %v188_v15  ;;  %1415 = vmatpush3.bf16.msra.mxu0 %v1512_v17 }
  0x49   : > { %1132 = vmatpush1.bf16.msra.mxu1 %v1513_v18  ;;  %1416 = vmatprep.subr.bf16.mxu0 %v1514_v20 }
  0x4a   : > { %1133 = vmatprep.subr.bf16.mxu1 %v1545_v19  ;;  %1123 = vmatprep.mubr.bf16.mxu0 %v191_v39 }
  0x4b   : > { %1323 = vmatprep.mubr.msk.bf16.mxu1 %vm920_vm1, %v193_v42 }
  0x4c   : > { %1417 = vmatpush3.bf16.msra.mxu0 %v1515_v21 }
  0x4d   : > { %1134 = vmatpush1.bf16.msra.mxu1 %v1516_v22  ;;  %1418 = vmatprep.subr.bf16.mxu0 %v1517_v23 }
  0x4e   : > { %1135 = vmatprep.subr.bf16.mxu1 %v1545_v19 }
  0x50   : > { %1419 = vmatpush3.bf16.msra.mxu0 %v1518_v24 }
  0x51   : > { %1136 = vmatpush1.bf16.msra.mxu1 %v1519_v25  ;;  %1420 = vmatprep.subr.bf16.mxu0 %v1520_v26 }
  0x52   : > { %1137 = vmatprep.subr.bf16.mxu1 %v1545_v19 }
  0x54   : > { %1421 = vmatpush3.bf16.msra.mxu0 %v1521_v27 }
  0x55   : > { %1138 = vmatpush1.bf16.msra.mxu1 %v1522_v28  ;;  %1422 = vmatprep.subr.bf16.mxu0 %v1523_v29 }
  0x56   : > { %1139 = vmatprep.subr.bf16.mxu1 %v1545_v19 }
  0x58   : > { %1423 = vmatpush3.bf16.msra.mxu0 %v1524_v30 }
  0x59   : > { %1140 = vmatpush1.bf16.msra.mxu1 %v1525_v31  ;;  %1424 = vmatprep.subr.bf16.mxu0 %v1526_v32 }
  0x5a   : > { %1141 = vmatprep.subr.bf16.mxu1 %v1545_v19 }
  0x5c   : > { %1425 = vmatpush3.bf16.msra.mxu0 %v1527_v33 }
  0x5d   : > { %1142 = vmatpush1.bf16.msra.mxu1 %v1528_v34  ;;  %1426 = vmatprep.subr.bf16.mxu0 %v1529_v35 }
  0x5e   : > { %1143 = vmatprep.subr.bf16.mxu1 %v1545_v19 }
  0x60   : > { %1427 = vmatpush3.bf16.msra.mxu0 %v1530_v36 }
  0x61   : > { %1144 = vmatpush1.bf16.msra.mxu1 %v1531_v38  ;;  %1428 = vmatprep.subr.bf16.mxu0 %v1532_v40 }
  0x62   : > { %1145 = vmatprep.subr.bf16.mxu1 %v1545_v19 }
  0x64   : > { %1429 = vmatpush3.bf16.msra.mxu0 %v1533_v43 }
  0x65   : > { %1146 = vmatpush1.bf16.msra.mxu1 %v1534_v44 }
  0x66   : > { %1147 = vmatprep.subr.bf16.mxu1 %v1545_v19 }
  0x67   : > { %1124 = vmatmul.mubr.bf16.vlgmr.msra.gmra.mrb[8].mxu0 %v190_v48 }
  0x69   : > { %1148 = vmatpush1.bf16.msra.mxu1 %v1535_v49 }
  0x6a   : > { %1149 = vmatprep.subr.bf16.mxu1 %v1545_v19 }
  0x6d   : > { %1150 = vmatpush1.bf16.msra.mxu1 %v929_v52 }
  0x70   : > { %1164 = vmatmul.mubr.bf16.vlgmr.msra.gmra.mrb[8].mxu1 %v192_v54 }
  0xfa   : > { %v1342_v55 = vpop.f32.mrb[0].mxu0 }
  0xfb   : > { %v1364_v56 = vpop.f32.mrb[0].mxu1  ;;  %v1343_v58 = vpop.f32.mrb[1].mxu0 }
  0xfc   : > { %v1365_v59 = vpop.f32.mrb[1].mxu1  ;;  %v1344_v60 = vadd.f32 %v1343_v58, %v1342_v55  ;;  %v1345_v63 = vpop.f32.mrb[2].mxu0 }
  0xfd   : > { %v1366_v61 = vadd.f32 %v1365_v59, %v1364_v56  ;;  %v1367_v62 = vpop.f32.mrb[2].mxu1  ;;  %v1346_v1 = vpop.f32.mrb[3].mxu0 }
  0xfe   : > { %v1368_v0 = vpop.f32.mrb[3].mxu1  ;;  %v966_v2 = vadd.f32 %v1344_v60, %v1232_v57 }
 0x100   : > { %v1006_v3 = vadd.f32 %v1366_v61, %v966_v2 }
 0x11a   : > { %v1386_v4 = vpop.f32.mrb[4].mxu0 }
 0x11b   : > { %v1408_v5 = vpop.f32.mrb[4].mxu1  ;;  %v1387_v6 = vpop.f32.mrb[5].mxu0 }
 0x11c   : > { %v1388_v7 = vadd.f32 %v1387_v6, %v1386_v4  ;;  %v1409_v8 = vpop.f32.mrb[5].mxu1  ;;  %v1389_v9 = vpop.f32.mrb[6].mxu0 }
 0x11d   : > { %v1410_v10 = vadd.f32 %v1409_v8, %v1408_v5  ;;  %v1411_v11 = vpop.f32.mrb[6].mxu1  ;;  %v1390_v12 = vpop.f32.mrb[7].mxu0 }
 0x11e   : > { %v1046_v13 = vadd.f32 %v1388_v7, %v1006_v3  ;;  %v1412_v14 = vpop.f32.mrb[7].mxu1 }
 0x120   : > { %v1086_v15 = vadd.f32 %v1410_v10, %v1046_v13 }
 0x13a   : > { %v1430_v16 = vpop.f32.mrb[8].mxu0 }
 0x13b   : > { %v1431_v17 = vpop.f32.mrb[9].mxu0 }
 0x13c   : > { %v1432_v18 = vadd.f32 %v1431_v17, %v1430_v16  ;;  %v1433_v19 = vpop.f32.mrb[10].mxu0 }
 0x13d   : > { %v1434_v20 = vpop.f32.mrb[11].mxu0 }
 0x13e   : > { %v1126_v21 = vadd.f32 %v1432_v18, %v1086_v15 }
 0x143   : > { %v1165_v22 = vpop.f32.mrb[8].mxu1 }
 0x144   : > { %v1166_v23 = vadd.f32 %v1165_v22, %v1126_v21  ;;  %v1167_v24 = vpop.f32.mrb[9].mxu1 }
 0x145   : > { %v1168_v25 = vpop.f32.mrb[10].mxu1 }
 0x146   : > { %1171 = vst [vmem:[%s168_s5] sm:$0xff] %v1166_v23  ;;  %v1169_v26 = vpop.f32.mrb[11].mxu1 }
 0x147 PF: > { %s13_s12 = sadd.s32 1, %s1543_s12  }
 0x148   : > { %p10_p4 = scmp.ge.s32.totalorder %s13_s12, 4  }
 0x14a   :  { %12 = sbr.rel (!%p10_p4) target bundleno = 1 (0x1), region = 62 }

// kernel: scoring_model_forward.4
= control target key start
LH: loop header
LB: loop body
LE: loop exit
PB: predicated region body
PF: predicated region fallthrough
CT: control target
= control target key end

     0   :  { %s3974_s0 = inlined_call_operand.vmem [shape: f32[48,128], index: 0, kind: input, shape index: {}]   ;;  %s3975_s1 = inlined_call_operand.vmem [shape: f32[48,8], index: 1, kind: input, shape index: {}]   ;;  %s3976_s2 = inlined_call_operand.vmem [shape: f32[48,128], index: 2, kind: input, shape index: {}]   ;;  %s3977_s3 = inlined_call_operand.vmem [shape: f32[48,6], index: 3, kind: input, shape index: {}]   ;;  %s3978_s4 = inlined_call_operand.vmem [shape: f32[48,3], index: 4, kind: input, shape index: {}]   ;;  %s3979_s5 = inlined_call_operand.vmem [shape: f32[48,6], index: 5, kind: input, shape index: {}]   ;;  %s3980_s6 = inlined_call_operand.vmem [shape: f32[6,15], index: 6, kind: input, shape index: {}]   ;;  %s3981_s7 = inlined_call_operand.vmem [shape: f32[3,15], index: 7, kind: input, shape index: {}]   ;;  %s3982_s8 = inlined_call_operand.vmem [shape: f32[6,15], index: 8, kind: input, shape index: {}]   ;;  %s3983_s9 = inlined_call_operand.vmem [shape: bf16[128,128], index: 9, kind: input, shape index: {}]   ;;  %s3984_s10 = inlined_call_operand.vmem [shape: bf16[8,128], index: 10, kind: input, shape index: {}]   ;;  %s3985_s11 = inlined_call_operand.vmem [shape: bf16[128,128], index: 11, kind: input, shape index: {}]   ;;  %s3986_s12 = inlined_call_operand.vmem [shape: bf16[5,128], index: 12, kind: input, shape index: {}]   ;;  %s3987_s13 = inlined_call_operand.vmem [shape: f32[15,6], index: 13, kind: input, shape index: {}]   ;;  %s3988_s14 = inlined_call_operand.vmem [shape: f32[6,6], index: 14, kind: input, shape index: {}]   ;;  %s3989_s15 = inlined_call_operand.vmem [shape: bf16[128,128], index: 15, kind: input, shape index: {}]   ;;  %s3990_s16 = inlined_call_operand.vmem [shape: bf16[2,128], index: 16, kind: input, shape index: {}]   ;;  %s3991_s17 = inlined_call_operand.vmem [shape: f32[6,6], index: 17, kind: input, shape index: {}]   ;;  %s3992_s18 = inlined_call_operand.vmem [shape: f32[6,6], index: 18, kind: input, shape index: {}]   ;;  %s3993_s19 = inlined_call_operand.vmem [shape: bf16[128,128], index: 19, kind: input, shape index: {}]   ;;  %s3994_s20 = inlined_call_operand.vmem [shape: bf16[2,128], index: 20, kind: input, shape index: {}]   ;;  %s3995_s21 = inlined_call_operand.vmem [shape: f32[6,6], index: 21, kind: input, shape index: {}]   ;;  %s3996_s22 = inlined_call_operand.vmem [shape: f32[3,128], index: 22, kind: input, shape index: {}]   ;;  %s3997_s23 = inlined_call_operand.vmem [shape: f32[48,128], index: 23, kind: output, shape index: {0}]   ;;  %s3998_s24 = inlined_call_operand.vmem [shape: f32[48,6], index: 24, kind: output, shape index: {1}]  }
   0x1   :  { %3999 = sst [smem:[#allocation2_spill]] %s3974_s0 }
   0x2   :  { %4000 = sst [smem:[#allocation3_spill]] %s3975_s1 }
   0x3   :  { %4001 = sst [smem:[#allocation4_spill]] %s3976_s2 }
   0x4   :  { %4002 = sst [smem:[#allocation5_spill]] %s3977_s3 }
   0x5   :  { %4003 = sst [smem:[#allocation6_spill]] %s3978_s4 }
   0x6   :  { %4004 = sst [smem:[#allocation7_spill]] %s3979_s5  ;;  %s3544_s5 = smov 0  }
   0x7   :  { %4005 = sst [smem:[#allocation8_spill]] %s3980_s6 }
   0x8   :  { %4006 = sst [smem:[#allocation9_spill]] %s3981_s7 }
   0x9   :  { %4007 = sst [smem:[#allocation10_spill]] %s3982_s8 }
   0xa LB: > { %s2901_s26 = sadd.s32 4294967295, %s3406_s5   ;;  %p2905_p0 = scmp.ge.s32.totalorder %s3406_s5, 1  ;;  %s3406_s5 = sphi %s3544_s5, %s35_s5  }
   0xb   : > { %p721_p1 = scmp.lt.s32.totalorder %s3406_s5, 3 }
   0xd   : > { %p722_p2 = pnand %p2905_p0, %p721_p1 }
   0xe   : > { %s4008_s6 = sld [smem:[#allocation9_spill]] (!%p722_p2)  ;;  %vm884_vm0 = vcmask (!%p722_p2), 1042432   ;;  %v3408_v1 = vmov (!%p722_p2), 0.0   ;;  %s817_s2 = smul.u32 (!%p722_p2), 3, %s2901_s26  ;;  %vm3409_vm1 = vmmov (!%p722_p2), 0   ;;  %vm1249_vm2 = vcmask (!%p722_p2), 1043456  }
   0xf   : > { %725 = sbr.rel (%p722_p2) target bundleno = 2217 (0x8a9), region = 112  ;;  %3082 = vmatprep.subr.mxu0 (!%p722_p2), %v3408_v1  ;;  %3084 = vmatprep.mubr.msk.f32.mxu0 (!%p722_p2), %vm3409_vm1, %v3408_v1  ;;  %v3314_v2 = vld [vmem:[%s3983_s9] sm:$0xff] (!%p722_p2)   ;;  %s4009_s8 = sld [smem:[#allocation8_spill]] (!%p722_p2)  ;;  %vm874_vm3 = vcmask (!%p722_p2), 23552   ;;  %vm978_vm4 = vcmask (!%p722_p2), 1045504   ;;  %vm1242_vm5 = vcmask (!%p722_p2), 64512  }
  0x10   : > { %p818_p3 = scmp.lt.s32.totalorder (!%p722_p2), %s817_s2, 5  ;;  %v1239_v3 = vld [vmem:[%s3984_s10] sm:$0xf] (!%p722_p2)  ;;  %s4010_s27 = sld [smem:[#allocation6_spill]] (!%p722_p2)  ;;  %v3316_v13 = vld [vmem:[%s3983_s9 + $0x8] sm:$0xff] (!%p722_p2)   ;;  %v3318_v16 = vld [vmem:[%s3983_s9 + $0x10] sm:$0xff] (!%p722_p2)  }
  0x11   : > { %3292 = vmatprep.subr.msk.bf16.mxu1 (!%p722_p2), %vm1249_vm2, %v1239_v3  ;;  %v1251_v4 = vsel (!%p722_p2), %vm1249_vm2, %v1239_v3, 0  ;;  %s4011_s0 = sld [smem:[#allocation3_spill]] (!%p722_p2)  ;;  %vm968_vm6 = vcmask (!%p722_p2), 48128   ;;  %v3315_v18 = vld [vmem:[%s3985_s11] sm:$0xff] (!%p722_p2)   ;;  %s4014_s3 = sld [smem:[#allocation2_spill]] (!%p722_p2)  ;;  %v3320_v19 = vld [vmem:[%s3983_s9 + $0x18] sm:$0xff] (!%p722_p2)  }
  0x12   : > { %3116 = vmatpush3.bf16.msra.mxu1 (!%p722_p2), %v1251_v4  ;;  %s4015_s29 = sld [smem:[#allocation7_spill]] (!%p722_p2)  ;;  %v3322_v25 = vld [vmem:[%s3983_s9 + $0x20] sm:$0xff] (!%p722_p2)   ;;  %v3324_v26 = vld [vmem:[%s3983_s9 + $0x28] sm:$0xff] (!%p722_p2)   ;;  %v3326_v29 = vld [vmem:[%s3983_s9 + $0x30] sm:$0xff] (!%p722_p2)   ;;  %vm1607_vm7 = vcmask (!%p722_p2), 1046528   ;;  %v3410_v44 = vmov (!%p722_p2), 0.0|0.0  }
  0x13   : > { %3121 = vmatprep.subr.bf16.mxu1 (!%p722_p2), %v3314_v2  ;;  %v3317_v28 = vld [vmem:[%s3985_s11 + $0x8] sm:$0xff] (!%p722_p2)   ;;  %v3319_v31 = vld [vmem:[%s3985_s11 + $0x10] sm:$0xff] (!%p722_p2)   ;;  %v3328_v34 = vld [vmem:[%s3983_s9 + $0x38] sm:$0xff] (!%p722_p2)   ;;  %vm3411_vm8 = vmmov (!%p722_p2), 1   ;;  %vm1527_vm10 = vcmask (!%p722_p2), 1041408   ;;  %v3412_v47 = vmov (!%p722_p2), 65535  }
  0x14   : > { %v873_v0 = vld [vmem:[%s4008_s6] sm:$0x7] (!%p722_p2)  ;;  %s4013_s6 = sld [smem:[#allocation10_spill]] (!%p722_p2)  ;;  %v3321_v37 = vld [vmem:[%s3985_s11 + $0x18] sm:$0xff] (!%p722_p2)   ;;  %v1596_v40 = vld [vmem:[%s3987_s13 + $0x8] sm:$0x7f] (!%p722_p2) }
  0x15   : > { %3083 = vmatpush3.msk.msra.mxu0 (!%p722_p2), %vm884_vm0, %v873_v0  ;;  %v869_v5 = vld [vmem:[%s4009_s8] sm:$0x3f] (!%p722_p2)  ;;  %s4012_s8 = sld [smem:[#allocation5_spill]] (!%p722_p2)  ;;  %vm3278_vm9 = vmpackc.low (!%p722_p2), %vm1607_vm7, %vm3411_vm8  ;;  %v3325_v45 = vld [vmem:[%s3985_s11 + $0x28] sm:$0xff] (!%p722_p2)   ;;  %v1528_v48 = vsel (!%p722_p2), %vm1527_vm10, 4294967295, %v3412_v47  ;;  %vm1597_vm11 = vcmask (!%p722_p2), 121856  }
  0x16   : > { %3093 = vmatprep.subr.mxu0 %v3408_v1  ;;  %s4018_s2 = smov (!%p818_p3, %s817_s2), 5  ;;  %v1595_v39 = vld [vmem:[%s3987_s13] sm:$0xff]  ;;  %v3327_v46 = vld [vmem:[%s3985_s11 + $0x30] sm:$0xff]   ;;  %v3329_v49 = vld [vmem:[%s3985_s11 + $0x38] sm:$0xff]   ;;  %v1529_v51 = vsel %vm884_vm0, %v1528_v48, 0  ;;  %s3418_s30 = smov 118  }
  0x17   : > { %s3569_s4 = sshll.u32 %s4018_s2, 3  ;;  %v3323_v41 = vld [vmem:[%s3985_s11 + $0x20] sm:$0xff]   ;;  %v3277_v43 = vpack.c.bf16 %v1596_v40, %v1595_v39  ;;  %s3417_s2 = smov 123  }
  0x18   : > { %s845_s28 = scalar_lea.vmem %s4010_s27, %s3569_s4  ;;  %s827_s7 = scalar_lea.vmem %s4011_s0, %s3569_s4  ;;  %v1517_v50 = vld [vmem:[%s3986_s12] sm:$0x7] }
  0x19   : > { %v870_v6 = vld [vmem:[%s845_s28] sm:$0xff]  ;;  %v871_v7 = vld [vmem:[%s845_s28 + $0x8] sm:$0xff]  ;;  %v1238_v10 = vld [vmem:[%s827_s7 + $0x10] sm:$0xff]  ;;  %s3610_s25 = scalar_lea.vmem %s4014_s3, %s3569_s4  ;;  %s851_s0 = scalar_lea.vmem %s4015_s29, %s3569_s4  ;;  %v1531_v53 = vand.u32 %v1529_v51, %v1517_v50 }
  0x1a   : > { %3085 = vmatmul.mubr.msk.f32.vlgmr.msra.gmra.mrb[0].mxu0 %vm874_vm3, %v870_v6  ;;  %v1236_v8 = vld [vmem:[%s827_s7] sm:$0xff]  ;;  %v1237_v9 = vld [vmem:[%s827_s7 + $0x8] sm:$0xff]  ;;  %v1241_v12 = vpack.c.bf16 %v1238_v10, %v1238_v10  ;;  %v872_v14 = vld [vmem:[%s845_s28 + $0x10] sm:$0xff]  ;;  %s4016_s27 = sld [smem:[#allocation4_spill]]  ;;  %s3414_s29 = smov 124  }
  0x1b   : > { %3094 = vmatpush3.msk.msra.mxu0 %vm978_vm4, %v869_v5  ;;  %3087 = vmatprep.mubr.msk.f32.mxu0 %vm3409_vm1, %v3408_v1  ;;  %v1240_v11 = vpack.c.bf16 %v1237_v9, %v1236_v8  ;;  %s839_s1 = scalar_lea.vmem %s4012_s8, %s3569_s4  ;;  %v1065_v15 = vld [vmem:[%s4013_s6] sm:$0x3f]  ;;  %v1216_v22 = vld [vmem:[%s3610_s25 + $0x8] sm:$0xff]  ;;  %v1064_v35 = vld [vmem:[%s851_s0 + $0x10] sm:$0xff]  ;;  %s3415_s7 = smov 4  }
  0x1c   : > { %3104 = vmatprep.subr.mxu0 %v3408_v1  ;;  %v866_v17 = vld [vmem:[%s839_s1] sm:$0xff]  ;;  %v867_v20 = vld [vmem:[%s839_s1 + $0x8] sm:$0xff]  ;;  %v868_v24 = vld [vmem:[%s839_s1 + $0x10] sm:$0xff]  ;;  %s857_s3 = scalar_lea.vmem %s3997_s23, %s3569_s4 }
  0x1d   : > { %3117 = vmatprep.mubr.msk.bf16.mxu1 %vm1242_vm5, %v1240_v11  ;;  %v1215_v21 = vld [vmem:[%s3610_s25] sm:$0xff]  ;;  %v1063_v30 = vld [vmem:[%s851_s0 + $0x8] sm:$0xff]  ;;  %v1217_v38 = vld [vmem:[%s3610_s25 + $0x10] sm:$0xff]  ;;  %s3416_s25 = smov 2  }
  0x1e   : > { %3088 = vmatmul.mubr.msk.f32.gmra.mrb[2].mxu0 %vm874_vm3, %v871_v7  ;;  %3118 = vmatmul.mubr.msk.bf16.vlgmr.msra.gmra.mrb[0].mxu1 %vm1242_vm5, %v1241_v12  ;;  %v1234_v23 = vpack.c.bf16 %v1216_v22, %v1215_v21  ;;  %v1062_v27 = vld [vmem:[%s851_s0] sm:$0xff]  ;;  %v1235_v42 = vpack.c.bf16 %v1217_v38, %v1217_v38  ;;  %vm1788_vm5 = vcmask 31744  }
  0x1f   : > { %3090 = vmatprep.mubr.msk.f32.mxu0 %vm3409_vm1, %v3408_v1  ;;  %3122 = vmatpush3.bf16.msra.mxu1 %v3314_v2 }
  0x20   : > { %3123 = vmatprep.subr.bf16.mxu1 %v3316_v13  ;;  %3137 = vmatprep.mubr.bf16.mxu1 %v1234_v23  ;;  %s3644_s6 = scalar_lea.vmem %s4016_s27, %s3569_s4  ;;  %s863_s27 = scalar_lea.vmem %s3998_s24, %s3569_s4 }
  0x21   : > { %v1397_v32 = vld [vmem:[%s3644_s6] sm:$0xff]  ;;  %v1398_v33 = vld [vmem:[%s3644_s6 + $0x8] sm:$0xff]  ;;  %v1399_v52 = vld [vmem:[%s3644_s6 + $0x10] sm:$0xff]  ;;  %s3413_s6 = smov 126  }
  0x22   : > { %3091 = vmatmul.mubr.msk.f32.gmra.mrb[4].mxu0 %vm874_vm3, %v872_v14  ;;  %v1416_v36 = vpack.c.bf16 %v1398_v33, %v1397_v32  ;;  %v1417_v54 = vpack.c.bf16 %v1399_v52, %v1399_v52  ;;  %vm1784_vm3 = vcmask 15360  }
  0x23   : > { %3095 = vmatprep.mubr.msk.f32.mxu0 %vm3409_vm1, %v3408_v1  ;;  %3124 = vmatpush3.bf16.msra.mxu1 %v3316_v13 }
  0x24   : > { %3125 = vmatprep.subr.bf16.mxu1 %v3318_v16 }
  0x26   : > { %3096 = vmatmul.mubr.msk.f32.vlgmr.msra.gmra.mrb[0].mxu0 %vm968_vm6, %v866_v17 }
  0x27   : > { %3105 = vmatpush3.msk.msra.mxu0 %vm978_vm4, %v1065_v15  ;;  %3098 = vmatprep.mubr.msk.f32.mxu0 %vm3409_vm1, %v3408_v1 }
  0x28   : > { %3141 = vmatprep.subr.bf16.mxu0 %v3315_v18  ;;  %3126 = vmatpush3.bf16.msra.mxu1 %v3318_v16 }
  0x29   : > { %3127 = vmatprep.subr.bf16.mxu1 %v3320_v19 }
  0x2a   : > { %3099 = vmatmul.mubr.msk.f32.gmra.mrb[2].mxu0 %vm968_vm6, %v867_v20 }
  0x2b   : > { %3101 = vmatprep.mubr.msk.f32.mxu0 %vm3409_vm1, %v3408_v1 }
  0x2c   : > { %3128 = vmatpush3.bf16.msra.mxu1 %v3320_v19 }
  0x2d   : > { %3129 = vmatprep.subr.bf16.mxu1 %v3322_v25 }
  0x2e   : > { %3102 = vmatmul.mubr.msk.f32.gmra.mrb[4].mxu0 %vm968_vm6, %v868_v24 }
  0x2f   : > { %3106 = vmatprep.mubr.msk.f32.mxu0 %vm3409_vm1, %v3408_v1 }
  0x30   : > { %3130 = vmatpush3.bf16.msra.mxu1 %v3322_v25  ;;  %v1795_v25 = vld [vmem:[%s3988_s14] sm:$0x3f] }
  0x31   : > { %3131 = vmatprep.subr.bf16.mxu1 %v3324_v26 }
  0x32   : > { %3107 = vmatmul.mubr.msk.f32.vlgmr.msra.gmra.mrb[0].mxu0 %vm968_vm6, %v1062_v27 }
  0x33   : > { %3109 = vmatprep.mubr.msk.f32.mxu0 %vm3409_vm1, %v3408_v1  ;;  %3142 = vmatpush3.bf16.msra.mxu0 %v3315_v18 }
  0x34   : > { %3143 = vmatprep.subr.bf16.mxu0 %v3317_v28  ;;  %3132 = vmatpush3.bf16.msra.mxu1 %v3324_v26 }
  0x35   : > { %3133 = vmatprep.subr.bf16.mxu1 %v3326_v29 }
  0x36   : > { %3110 = vmatmul.mubr.msk.f32.gmra.mrb[2].mxu0 %vm968_vm6, %v1063_v30 }
  0x37   : > { %3112 = vmatprep.mubr.msk.f32.mxu0 %vm3409_vm1, %v3408_v1  ;;  %3144 = vmatpush3.bf16.msra.mxu0 %v3317_v28 }
  0x38   : > { %3145 = vmatprep.subr.bf16.mxu0 %v3319_v31  ;;  %3134 = vmatpush3.bf16.msra.mxu1 %v3326_v29 }
  0x39   : > { %3135 = vmatprep.subr.bf16.mxu1 %v3328_v34 }
  0x3a   : > { %3113 = vmatmul.mubr.msk.f32.gmra.mrb[4].mxu0 %vm968_vm6, %v1064_v35 }
  0x3b   : > { %3146 = vmatpush3.bf16.msra.mxu0 %v3319_v31  ;;  %3157 = vmatprep.mubr.bf16.mxu0 %v1416_v36 }
  0x3c   : > { %3147 = vmatprep.subr.bf16.mxu0 %v3321_v37  ;;  %3136 = vmatpush3.bf16.msra.mxu1 %v3328_v34 }
  0x3d   : > { %3276 = vmatprep.subr.bf16.mxu1 %v3410_v44 }
  0x3f   : > { %3148 = vmatpush3.bf16.msra.mxu0 %v3321_v37  ;;  %3138 = vmatmul.mubr.bf16.vlgmr.msra.gmra.mrb[4].mxu1 %v1235_v42 }
  0x40   : > { %3149 = vmatprep.subr.bf16.mxu0 %v3323_v41  ;;  %3279 = vmatpush3.bf16.msk.msra.mxu1 %vm3278_vm9, %v3277_v43 }
  0x41   : > { %3171 = vmatprep.mubr.msk.f32.mxu1 %vm3409_vm1, %v3408_v1  ;;  %3180 = vmatprep.subr.mxu1 %v3408_v1 }
  0x43   : > { %3150 = vmatpush3.bf16.msra.mxu0 %v3323_v41 }
  0x44   : > { %3151 = vmatprep.subr.bf16.mxu0 %v3325_v45 }
  0x47   : > { %3152 = vmatpush3.bf16.msra.mxu0 %v3325_v45 }
  0x48   : > { %3153 = vmatprep.subr.bf16.mxu0 %v3327_v46 }
  0x4b   : > { %3154 = vmatpush3.bf16.msra.mxu0 %v3327_v46 }
  0x4c   : > { %3155 = vmatprep.subr.bf16.mxu0 %v3329_v49 }
  0x4f   : > { %3156 = vmatpush3.bf16.msra.mxu0 %v3329_v49 }
  0x50   : > { %3161 = vmatprep.subr.bf16.mxu0 %v1531_v53 }
  0x52   : > { %3158 = vmatmul.mubr.bf16.vlgmr.msra.gmra.mrb[8].mxu0 %v1417_v54 }
  0x53   : > { %3162 = vmatpush3.bf16.msra.mxu0 %v1531_v53 }
  0xf1   : > { %v3119_v55 = vpop.f32.mrb[0].mxu1 }
  0xf2   : > { %v1287_v56 = vpop.f32.mrb[1].mxu1 }
  0xf3   : > { %v3120_v57 = vpop.f32.mrb[2].mxu1 }
  0xf4   : > { %v1290_v58 = vpop.f32.mrb[3].mxu1 }
 0x105   : > { %v3694_v59 = vpop.f32.mrb[0].mxu0 }
 0x106   : > { %v3108_v60 = vpop.f32.mrb[1].mxu0  ;;  %3172 = vmatmul.mubr.msk.f32.vlgmr.msra.gmra.mrb[8].mxu1 %vm1597_vm11, %v3694_v59 }
 0x107   : > { %3174 = vmatprep.mubr.msk.f32.mxu1 %vm3409_vm1, %v3408_v1  ;;  %3181 = vmatpush3.msk.msra.mxu1 %vm978_vm4, %v1795_v25 }
 0x109   : > { %v3699_v61 = vpop.f32.mrb[2].mxu0 }
 0x10a   : > { %v3111_v62 = vpop.f32.mrb[3].mxu0  ;;  %3175 = vmatmul.mubr.msk.f32.gmra.mrb[10].mxu1 %vm1597_vm11, %v3699_v61 }
 0x10b   : > { %3177 = vmatprep.mubr.msk.f32.mxu1 %vm3409_vm1, %v3408_v1 }
 0x10d   : > { %v3704_v63 = vpop.f32.mrb[4].mxu0 }
 0x10e   : > { %v3114_v0 = vpop.f32.mrb[5].mxu0  ;;  %3178 = vmatmul.mubr.msk.f32.gmra.mrb[12].mxu1 %vm1597_vm11, %v3704_v63 }
 0x10f   : > { %3182 = vmatprep.mubr.msk.f32.mxu1 %vm3409_vm1, %v3408_v1 }
 0x112   : > { %v3139_v2 = vpop.f32.mrb[4].mxu1 }
 0x113   : > { %v1392_v3 = vadd.f32 %v3139_v2, %v3119_v55  ;;  %v1383_v4 = vpop.f32.mrb[5].mxu1 }
 0x114   : > { %v1384_v5 = vadd.f32 %v1383_v4, %v1287_v56  ;;  %v3140_v6 = vpop.f32.mrb[6].mxu1 }
 0x115   : > { %v1386_v7 = vpop.f32.mrb[7].mxu1 }
 0x116   : > { %v1387_v8 = vadd.f32 %v1386_v7, %v1290_v58 }
 0x125   : > { %v3159_v9 = vpop.f32.mrb[8].mxu0 }
 0x126   : > { %v3709_v10 = vadd.f32 %v3159_v9, %v1392_v3  ;;  %v1500_v11 = vpop.f32.mrb[9].mxu0  ;;  %v1162_v9 = vmul.f32 %v3699_v61, %v3699_v61 }
 0x127   : > { %v3711_v12 = vadd.f32 %v1500_v11, %v1384_v5  ;;  %v3160_v13 = vpop.f32.mrb[10].mxu0  ;;  %v1163_v11 = vmul.f32 %v3704_v63, %v3704_v63 }
 0x128   : > { %v1503_v14 = vpop.f32.mrb[11].mxu0 }
 0x129   : > { %v3713_v15 = vadd.f32 %v1503_v14, %v1387_v8  ;;  %v1161_v8 = vmul.f32 %v3694_v59, %v3694_v59 }
 0x1d9   : > { %v3715_v16 = vpop.f32.mrb[8].mxu1 }
 0x1da   : > { %v1691_v17 = vmul.f32 %v3715_v16, %v3715_v16  ;;  %v3173_v18 = vpop.f32.mrb[9].mxu1 }
 0x1dc   : > { %1697 = vrot.lane.b32.xlu0 %v1691_v17, %s3413_s6 }
 0x1dd   : > { %v3720_v19 = vpop.f32.mrb[10].mxu1 }
 0x1de   : > { %v1692_v20 = vmul.f32 %v3720_v19, %v3720_v19  ;;  %v3176_v21 = vpop.f32.mrb[11].mxu1 }
 0x1e0   : > { %1709 = vrot.lane.b32.xlu0 %v1691_v17, %s3414_s29  ;;  %1699 = vrot.lane.b32.xlu1 %v1692_v20, %s3413_s6 }
 0x1e1   : > { %v3726_v22 = vpop.f32.mrb[12].mxu1 }
 0x1e2   : > { %v1693_v23 = vmul.f32 %v3726_v22, %v3726_v22  ;;  %v3179_v24 = vpop.f32.mrb[13].mxu1 }
 0x1e4   : > { %1711 = vrot.lane.b32.xlu1 %v1692_v20, %s3414_s29  ;;  %1701 = vrot.lane.b32.xlu0 %v1693_v23, %s3413_s6 }
 0x1e8   : > { %1713 = vrot.lane.b32.xlu1 %v1693_v23, %s3414_s29 }
 0x24e   : > { %v1698_v26 = vpop.permute.xlu0 %1697 }
 0x24f   : > { %v1706_v27 = vadd.f32 %v1698_v26, %v1691_v17 }
 0x252   : > { %v1710_v28 = vpop.permute.xlu0 %1709  ;;  %v1700_v29 = vpop.permute.xlu1 %1699 }
 0x253   : > { %v1718_v30 = vadd.f32 %v1710_v28, %v1706_v27  ;;  %v1707_v32 = vadd.f32 %v1700_v29, %v1692_v20 }
 0x255   : > { %v1721_v31 = vmax.f32 %v1718_v30, 1e-08 }
 0x256   : > { %v1712_v33 = vpop.permute.xlu1 %1711  ;;  %v1702_v34 = vpop.permute.xlu0 %1701 }
 0x257   : > { %3346 = vrsqrt.f32 %v1721_v31  ;;  %v1719_v35 = vadd.f32 %v1712_v33, %v1707_v32  ;;  %v1708_v36 = vadd.f32 %v1702_v34, %v1693_v23  ;;  %vm1726_vm12 = vcmp.eq.f32.partialorder %v1721_v31, inf }
 0x258   : > { %v1729_v43 = vand.u32 2147483648, %v1721_v31  ;;  %vm1728_vm13 = vcmp.eq.f32.partialorder %v1721_v31, 0.0 }
 0x259   : > { %v1722_v37 = vmax.f32 %v1719_v35, 1e-08 }
 0x25a   : > { %v1714_v38 = vpop.permute.xlu1 %1713 }
 0x25b   : > { %v1720_v39 = vadd.f32 %v1714_v38, %v1708_v36  ;;  %3348 = vrsqrt.f32 %v1722_v37  ;;  %vm1733_vm14 = vcmp.eq.f32.partialorder %v1722_v37, inf  ;;  %v1736_v49 = vand.u32 2147483648, %v1722_v37 }
 0x25c   : > { %vm1735_vm15 = vcmp.eq.f32.partialorder %v1722_v37, 0.0 }
 0x25d   : > { %v1723_v40 = vmax.f32 %v1720_v39, 1e-08 }
 0x25f   : > { %3350 = vrsqrt.f32 %v1723_v40  ;;  %vm1740_vm0 = vcmp.eq.f32.partialorder %v1723_v40, inf  ;;  %v1743_v55 = vand.u32 2147483648, %v1723_v40  ;;  %vm1742_vm2 = vcmp.eq.f32.partialorder %v1723_v40, 0.0 }
 0x261   : > { %v3347_v41 = vpop.eup %3346 }
 0x262   : > { %v1725_v42 = vmul.f32 %v3347_v41, %v1721_v31 }
 0x264   : > { %v1727_v44 = vsel %vm1726_vm12, %v1721_v31, %v1725_v42 }
 0x265   : > { %v1730_v45 = vsel %vm1728_vm13, %v1729_v43, %v1727_v44  ;;  %v3349_v46 = vpop.eup %3348  ;;  %vm1520_vm13 = vcmask 39936  }
 0x266   : > { %v2951_v47 = vmul.f32 -1.442695, %v1730_v45  ;;  %v1732_v48 = vmul.f32 %v3349_v46, %v1722_v37 }
 0x268   : > { %3352 = vpow2.f32 %v2951_v47  ;;  %v1734_v51 = vsel %vm1733_vm14, %v1722_v37, %v1732_v48  ;;  %vm1969_vm14 = vcmask 1040384  }
 0x269   : > { %v3351_v50 = vpop.eup %3350  ;;  %v1737_v52 = vsel %vm1735_vm15, %v1736_v49, %v1734_v51 }
 0x26a   : > { %v1739_v53 = vmul.f32 %v3351_v50, %v1723_v40  ;;  %v2952_v54 = vmul.f32 -1.442695, %v1737_v52 }
 0x26c   : > { %v1741_v56 = vsel %vm1740_vm0, %v1723_v40, %v1739_v53  ;;  %3354 = vpow2.f32 %v2952_v54 }
 0x26d   : > { %v1744_v57 = vsel %vm1742_vm2, %v1743_v55, %v1741_v56 }
 0x26e   : > { %v2953_v58 = vmul.f32 -1.442695, %v1744_v57 }
 0x270   : > { %3356 = vpow2.f32 %v2953_v58  ;;  %v3330_v58 = vld [vmem:[%s3989_s15] sm:$0xff]  }
 0x271   : > { %3197 = vmatprep.subr.bf16.mxu1 %v3330_v58 }
 0x272   : > { %v3353_v60 = vpop.eup %3352 }
 0x273   : > { %v1754_v62 = vadd.f32 1.0, %v3353_v60  ;;  %v3331_v60 = vld [vmem:[%s3989_s15 + $0x8] sm:$0xff]  }
 0x275   : > { %3358 = vrcp.f32 %v1754_v62  ;;  %v3332_v62 = vld [vmem:[%s3989_s15 + $0x10] sm:$0xff]  }
 0x276   : > { %v3355_v0 = vpop.eup %3354 }
 0x277   : > { %v1755_v2 = vadd.f32 1.0, %v3355_v0  ;;  %v3333_v0 = vld [vmem:[%s3989_s15 + $0x18] sm:$0xff]  }
 0x279   : > { %3360 = vrcp.f32 %v1755_v2  ;;  %v3334_v2 = vld [vmem:[%s3989_s15 + $0x20] sm:$0xff]  }
 0x27a   : > { %v3357_v3 = vpop.eup %3356 }
 0x27b   : > { %v1756_v4 = vadd.f32 1.0, %v3357_v3  ;;  %v3335_v3 = vld [vmem:[%s3989_s15 + $0x28] sm:$0xff]  }
 0x27d   : > { %3362 = vrcp.f32 %v1756_v4  ;;  %v3336_v4 = vld [vmem:[%s3989_s15 + $0x30] sm:$0xff]  }
 0x27f   : > { %v3359_v5 = vpop.eup %3358 }
 0x280   : > { %1775 = vrot.lane.b32.xlu1 %v3359_v5, %s3415_s7  ;;  %1766 = vrot.lane.b32.xlu0 %v3359_v5, %s3416_s25 }
 0x283   : > { %v3361_v6 = vpop.eup %3360 }
 0x284   : > { %1777 = vrot.lane.b32.xlu1 %v3361_v6, %s3415_s7  ;;  %1768 = vrot.lane.b32.xlu0 %v3361_v6, %s3416_s25 }
 0x287   : > { %v3363_v7 = vpop.eup %3362 }
 0x288   : > { %1779 = vrot.lane.b32.xlu1 %v3363_v7, %s3415_s7  ;;  %1770 = vrot.lane.b32.xlu0 %v3363_v7, %s3416_s25 }
 0x28c   : > { %1169 = vrot.lane.b32.xlu1 %v1162_v9, %s3417_s2  ;;  %1167 = vrot.lane.b32.xlu0 %v1161_v8, %s3417_s2 }
 0x290   : > { %1179 = vrot.lane.b32.xlu1 %v1161_v8, %s3418_s30  ;;  %1171 = vrot.lane.b32.xlu0 %v1163_v11, %s3417_s2 }
 0x294   : > { %1183 = vrot.lane.b32.xlu1 %v1163_v11, %s3418_s30  ;;  %1181 = vrot.lane.b32.xlu0 %v1162_v9, %s3418_s30 }
 0x2f2   : > { %v1776_v13 = vpop.permute.xlu1 %1775  ;;  %v1767_v14 = vpop.permute.xlu0 %1766 }
 0x2f3   : > { %v1785_v59 = vsel %vm1784_vm3, %v3359_v5, %v1767_v14  ;;  %v3337_v5 = vld [vmem:[%s3989_s15 + $0x38] sm:$0xff]   ;;  %v1960_v14 = vld [vmem:[%s3990_s16] sm:$0x1] }
 0x2f4   : > { %v1789_v17 = vsel %vm1788_vm5, %v1785_v59, %v1776_v13  ;;  %3293 = vmatprep.subr.msk.bf16.mxu0 %vm1969_vm14, %v1960_v14  ;;  %v1971_v59 = vsel %vm1969_vm14, %v1960_v14, 0 }
 0x2f5   : > { %v1792_v61 = vmul.f32 %v1789_v17, %v3715_v16 }
 0x2f6   : > { %v1778_v18 = vpop.permute.xlu1 %1777  ;;  %v1769_v20 = vpop.permute.xlu0 %1768 }
 0x2f7   : > { %3183 = vmatmul.mubr.msk.f32.vlgmr.msra.gmra.mrb[14].mxu1 %vm968_vm6, %v1792_v61  ;;  %v1786_v63 = vsel %vm1784_vm3, %v3361_v6, %v1769_v20 }
 0x2f8   : > { %3185 = vmatprep.mubr.msk.f32.mxu1 %vm3409_vm1, %v3408_v1  ;;  %v1790_v21 = vsel %vm1788_vm5, %v1786_v63, %v1778_v18  ;;  %3198 = vmatpush3.bf16.msra.mxu1 %v3330_v58  ;;  %v2946_v63 = vld [vmem:[%s3996_s22] ss:$0 sm:$0xff] }
 0x2f9   : > { %v1793_v23 = vmul.f32 %v1790_v21, %v3720_v19  ;;  %3199 = vmatprep.subr.bf16.mxu1 %v3331_v60 }
 0x2fa   : > { %v1780_v24 = vpop.permute.xlu1 %1779  ;;  %v1771_v25 = vpop.permute.xlu0 %1770 }
 0x2fb   : > { %v1787_v26 = vsel %vm1784_vm3, %v3363_v7, %v1771_v25  ;;  %3186 = vmatmul.mubr.msk.f32.gmra.mrb[16].mxu1 %vm968_vm6, %v1793_v23 }
 0x2fc   : > { %v1791_v16 = vsel %vm1788_vm5, %v1787_v26, %v1780_v24  ;;  %3188 = vmatprep.mubr.msk.f32.mxu1 %vm3409_vm1, %v3408_v1  ;;  %3200 = vmatpush3.bf16.msra.mxu1 %v3331_v60  ;;  %v3341_v60 = vld [vmem:[%s3993_s19 + $0x18] sm:$0xff]  }
 0x2fd   : > { %v1794_v27 = vmul.f32 %v1791_v16, %v3726_v22  ;;  %3201 = vmatprep.subr.bf16.mxu1 %v3332_v62 }
 0x2fe   : > { %v1170_v28 = vpop.permute.xlu1 %1169  ;;  %v1168_v29 = vpop.permute.xlu0 %1167 }
 0x2ff   : > { %3189 = vmatmul.mubr.msk.f32.gmra.mrb[18].mxu1 %vm968_vm6, %v1794_v27  ;;  %v1176_v30 = vadd.f32 %v1168_v29, %v1161_v8  ;;  %v1177_v33 = vadd.f32 %v1170_v28, %v1162_v9 }
 0x300   : > { %3202 = vmatpush3.bf16.msra.mxu1 %v3332_v62 }
 0x301   : > { %3203 = vmatprep.subr.bf16.mxu1 %v3333_v0 }
 0x302   : > { %v1180_v31 = vpop.permute.xlu1 %1179  ;;  %v1172_v19 = vpop.permute.xlu0 %1171 }
 0x303   : > { %v1188_v32 = vadd.f32 %v1180_v31, %v1176_v30  ;;  %v1178_v35 = vadd.f32 %v1172_v19, %v1163_v11 }
 0x304   : > { %3204 = vmatpush3.bf16.msra.mxu1 %v3333_v0 }
 0x305   : > { %v1191_v34 = vmax.f32 %v1188_v32, 1e-08  ;;  %3205 = vmatprep.subr.bf16.mxu1 %v3334_v2 }
 0x306   : > { %v1184_v36 = vpop.permute.xlu1 %1183  ;;  %v1182_v37 = vpop.permute.xlu0 %1181 }
 0x307   : > { %3364 = vrsqrt.f32 %v1191_v34  ;;  %v1190_v38 = vadd.f32 %v1184_v36, %v1178_v35  ;;  %v1189_v39 = vadd.f32 %v1182_v37, %v1177_v33  ;;  %vm1196_vm7 = vcmp.eq.f32.partialorder %v1191_v34, inf }
 0x308   : > { %v1199_v45 = vand.u32 2147483648, %v1191_v34  ;;  %vm1198_vm11 = vcmp.eq.f32.partialorder %v1191_v34, 0.0  ;;  %3206 = vmatpush3.bf16.msra.mxu1 %v3334_v2 }
 0x309   : > { %v1193_v40 = vmax.f32 %v1190_v38, 1e-08  ;;  %v1192_v41 = vmax.f32 %v1189_v39, 1e-08  ;;  %3207 = vmatprep.subr.bf16.mxu1 %v3335_v3 }
 0x30b   : > { %3366 = vrsqrt.f32 %v1193_v40  ;;  %vm1210_vm8 = vcmp.eq.f32.partialorder %v1193_v40, inf  ;;  %v1213_v49 = vand.u32 2147483648, %v1193_v40  ;;  %vm1203_vm9 = vcmp.eq.f32.partialorder %v1192_v41, inf }
 0x30c   : > { %3368 = vrsqrt.f32 %v1192_v41  ;;  %v1206_v50 = vand.u32 2147483648, %v1192_v41  ;;  %vm1212_vm10 = vcmp.eq.f32.partialorder %v1193_v40, 0.0  ;;  %vm1205_vm12 = vcmp.eq.f32.partialorder %v1192_v41, 0.0  ;;  %3208 = vmatpush3.bf16.msra.mxu1 %v3335_v3 }
 0x30d   : > { %3209 = vmatprep.subr.bf16.mxu1 %v3336_v4 }
 0x310   : > { %3210 = vmatpush3.bf16.msra.mxu1 %v3336_v4 }
 0x311   : > { %v3365_v22 = vpop.eup %3364  ;;  %3211 = vmatprep.subr.bf16.mxu1 %v3337_v5 }
 0x312   : > { %v1195_v42 = vmul.f32 %v3365_v22, %v1191_v34 }
 0x314   : > { %v1197_v47 = vsel %vm1196_vm7, %v1191_v34, %v1195_v42  ;;  %3212 = vmatpush3.bf16.msra.mxu1 %v3337_v5 }
 0x315   : > { %v3367_v43 = vpop.eup %3366  ;;  %v1200_v54 = vsel %vm1198_vm11, %v1199_v45, %v1197_v47  ;;  %v3339_v47 = vld [vmem:[%s3993_s19 + $0x8] sm:$0xff]  }
 0x316   : > { %v3369_v44 = vpop.eup %3368  ;;  %v1209_v46 = vmul.f32 %v3367_v43, %v1193_v40 }
 0x317   : > { %v1202_v48 = vmul.f32 %v3369_v44, %v1192_v41 }
 0x318   : > { %v1211_v51 = vsel %vm1210_vm8, %v1193_v40, %v1209_v46  ;;  %v3338_v46 = vld [vmem:[%s3993_s19] sm:$0xff]  }
 0x319   : > { %v1204_v52 = vsel %vm1203_vm9, %v1192_v41, %v1202_v48  ;;  %v1214_v53 = vsel %vm1212_vm10, %v1213_v49, %v1211_v51  ;;  %3245 = vmatprep.subr.bf16.mxu1 %v3338_v46 }
 0x31a   : > { %v1207_v55 = vsel %vm1205_vm12, %v1206_v50, %v1204_v52  ;;  %v1519_v56 = vpack.c.bf16 %v1214_v53, %v1214_v53  ;;  %v3340_v50 = vld [vmem:[%s3993_s19 + $0x10] sm:$0xff]  }
 0x31b   : > { %v1518_v57 = vpack.c.bf16 %v1207_v55, %v1200_v54 }
 0x31d   : > { %3163 = vmatprep.mubr.msk.bf16.mxu0 %vm1520_vm13, %v1518_v57 }
 0x31e   : > { %3164 = vmatmul.mubr.msk.bf16.vlgmr.msra.gmra.mrb[12].mxu0 %vm1520_vm13, %v1519_v56 }
 0x31f   : > { %3192 = vmatpush3.bf16.msra.mxu0 %v1971_v59 }
 0x320   : > { %3217 = vmatprep.subr.mxu0 %v3408_v1 }
 0x3ca   : > { %v3789_v6 = vpop.f32.mrb[14].mxu1 }
 0x3cb   : > { %v1888_v7 = vmul.f32 %v3789_v6, %v3789_v6  ;;  %v3184_v8 = vpop.f32.mrb[15].mxu1 }
 0x3cc   : > { %v3342_v8 = vld [vmem:[%s3993_s19 + $0x20] sm:$0xff]  }
 0x3cd   : > { %1906 = vrot.lane.b32.xlu1 %v1888_v7, %s3414_s29  ;;  %1894 = vrot.lane.b32.xlu0 %v1888_v7, %s3413_s6 }
 0x3ce   : > { %v3795_v9 = vpop.f32.mrb[16].mxu1 }
 0x3cf   : > { %v1889_v11 = vmul.f32 %v3795_v9, %v3795_v9  ;;  %v3187_v13 = vpop.f32.mrb[17].mxu1 }
 0x3d1   : > { %1896 = vrot.lane.b32.xlu1 %v1889_v11, %s3413_s6 }
 0x3d2   : > { %v3805_v17 = vpop.f32.mrb[18].mxu1 }
 0x3d3   : > { %v1890_v61 = vmul.f32 %v3805_v17, %v3805_v17  ;;  %v3190_v18 = vpop.f32.mrb[19].mxu1 }
 0x3d4   : > { %v2968_v18 = vld [vmem:[%s3996_s22 + $0x1] ss:$0 sm:$0xff] }
 0x3d5   : > { %1910 = vrot.lane.b32.xlu1 %v1890_v61, %s3414_s29  ;;  %1898 = vrot.lane.b32.xlu0 %v1890_v61, %s3413_s6 }
 0x3d9   : > { %1908 = vrot.lane.b32.xlu0 %v1889_v11, %s3414_s29 }
 0x3f1   : > { %v3165_v20 = vpop.f32.mrb[12].mxu0 }
 0x3f2   : > { %v1583_v21 = vadd.f32 %v3165_v20, %v3709_v10  ;;  %v1567_v23 = vpop.f32.mrb[13].mxu0 }
 0x3f3   : > { %v1581_v24 = vadd.f32 %v1567_v23, %v3711_v12  ;;  %v3166_v25 = vpop.f32.mrb[14].mxu0 }
 0x3f4   : > { %v1591_v26 = vadd.f32 %v2946_v63, %v1583_v21  ;;  %v1570_v16 = vpop.f32.mrb[15].mxu0 }
 0x3f5   : > { %v1589_v27 = vadd.f32 %v2946_v63, %v1581_v24  ;;  %v1582_v28 = vadd.f32 %v1570_v16, %v3713_v15 }
 0x3f6   : > { %v1594_v30 = vmax.f32 %v1591_v26, 0.0 }
 0x3f7   : > { %v1590_v29 = vadd.f32 %v2946_v63, %v1582_v28  ;;  %v1592_v31 = vmax.f32 %v1589_v27, 0.0 }
 0x3f8   : > { %v1959_v33 = vpack.c.bf16 %v1594_v30, %v1594_v30 }
 0x3f9   : > { %v1593_v19 = vmax.f32 %v1590_v29, 0.0 }
 0x3fb   : > { %v1958_v32 = vpack.c.bf16 %v1593_v19, %v1592_v31 }
 0x3fd   : > { %3213 = vmatprep.mubr.bf16.mxu1 %v1958_v32 }
 0x3fe   : > { %3214 = vmatmul.mubr.bf16.vlgmr.msra.gmra.mrb[20].mxu1 %v1959_v33 }
 0x3ff   : > { %3246 = vmatpush3.bf16.msra.mxu1 %v3338_v46 }
 0x400   : > { %3247 = vmatprep.subr.bf16.mxu1 %v3339_v47 }
 0x403   : > { %3248 = vmatpush3.bf16.msra.mxu1 %v3339_v47 }
 0x404   : > { %3249 = vmatprep.subr.bf16.mxu1 %v3340_v50 }
 0x407   : > { %3250 = vmatpush3.bf16.msra.mxu1 %v3340_v50 }
 0x408   : > { %3251 = vmatprep.subr.bf16.mxu1 %v3341_v60 }
 0x40b   : > { %3252 = vmatpush3.bf16.msra.mxu1 %v3341_v60 }
 0x40c   : > { %3253 = vmatprep.subr.bf16.mxu1 %v3342_v8 }
 0x40f   : > { %3254 = vmatpush3.bf16.msra.mxu1 %v3342_v8 }
 0x43f   : > { %v1907_v34 = vpop.permute.xlu1 %1906  ;;  %v1895_v35 = vpop.permute.xlu0 %1894 }
 0x440   : > { %v1903_v10 = vadd.f32 %v1895_v35, %v1888_v7  ;;  %v2128_v7 = vld [vmem:[%s3991_s17] sm:$0x3f] }
 0x442   : > { %v1915_v36 = vadd.f32 %v1907_v34, %v1903_v10 }
 0x443   : > { %v1897_v37 = vpop.permute.xlu1 %1896 }
 0x444   : > { %v1918_v12 = vmax.f32 %v1915_v36, 1e-08  ;;  %v1904_v41 = vadd.f32 %v1897_v37, %v1889_v11  ;;  %v3343_v11 = vld [vmem:[%s3993_s19 + $0x28] sm:$0xff]  }
 0x445   : > { %3255 = vmatprep.subr.bf16.mxu1 %v3343_v11 }
 0x446   : > { %3370 = vrsqrt.f32 %v1918_v12  ;;  %vm1923_vm15 = vcmp.eq.f32.partialorder %v1918_v12, inf  ;;  %v1926_v57 = vand.u32 2147483648, %v1918_v12  ;;  %vm1925_vm8 = vcmp.eq.f32.partialorder %v1918_v12, 0.0  ;;  %3256 = vmatpush3.bf16.msra.mxu1 %v3343_v11 }
 0x447   : > { %v1899_v38 = vpop.permute.xlu0 %1898  ;;  %v1911_v40 = vpop.permute.xlu1 %1910 }
 0x448   : > { %v1905_v39 = vadd.f32 %v1899_v38, %v1890_v61 }
 0x44a   : > { %v1917_v15 = vadd.f32 %v1911_v40, %v1905_v39  ;;  %v2323_v39 = vld [vmem:[%s3992_s18] sm:$0x3f] }
 0x44b   : > { %v1909_v22 = vpop.permute.xlu0 %1908 }
 0x44c   : > { %v1920_v42 = vmax.f32 %v1917_v15, 1e-08  ;;  %v1916_v43 = vadd.f32 %v1909_v22, %v1904_v41 }
 0x44e   : > { %3372 = vrsqrt.f32 %v1920_v42  ;;  %v1919_v44 = vmax.f32 %v1916_v43, 1e-08  ;;  %vm1937_vm0 = vcmp.eq.f32.partialorder %v1920_v42, inf  ;;  %v1940_v56 = vand.u32 2147483648, %v1920_v42 }
 0x44f   : > { %vm1939_vm7 = vcmp.eq.f32.partialorder %v1920_v42, 0.0 }
 0x450   : > { %3374 = vrsqrt.f32 %v1919_v44  ;;  %v3371_v45 = vpop.eup %3370  ;;  %vm1930_vm2 = vcmp.eq.f32.partialorder %v1919_v44, inf  ;;  %v1933_v58 = vand.u32 2147483648, %v1919_v44  ;;  %vm1932_vm9 = vcmp.eq.f32.partialorder %v1919_v44, 0.0 }
 0x451   : > { %v1922_v48 = vmul.f32 %v3371_v45, %v1918_v12 }
 0x453   : > { %v1924_v53 = vsel %vm1923_vm15, %v1918_v12, %v1922_v48 }
 0x454   : > { %v1927_v2 = vsel %vm1925_vm8, %v1926_v57, %v1924_v53 }
 0x458   : > { %v3373_v49 = vpop.eup %3372 }
 0x459   : > { %v1936_v51 = vmul.f32 %v3373_v49, %v1920_v42 }
 0x45a   : > { %v3375_v52 = vpop.eup %3374 }
 0x45b   : > { %v1929_v54 = vmul.f32 %v3375_v52, %v1919_v44  ;;  %v1938_v55 = vsel %vm1937_vm0, %v1920_v42, %v1936_v51 }
 0x45c   : > { %v1941_v0 = vsel %vm1939_vm7, %v1940_v56, %v1938_v55 }
 0x45d   : > { %v1931_v62 = vsel %vm1930_vm2, %v1919_v44, %v1929_v54  ;;  %v1962_v5 = vpack.c.bf16 %v1941_v0, %v1941_v0 }
 0x45e   : > { %v1934_v3 = vsel %vm1932_vm9, %v1933_v58, %v1931_v62 }
 0x45f   : > { %v1961_v4 = vpack.c.bf16 %v1934_v3, %v1927_v2 }
 0x461   : > { %3193 = vmatprep.mubr.msk.bf16.mxu0 %vm1784_vm3, %v1961_v4 }
 0x462   : > { %3194 = vmatmul.mubr.msk.bf16.vlgmr.msra.gmra.mrb[16].mxu0 %vm1784_vm3, %v1962_v5 }
 0x463   : > { %3218 = vmatpush3.msk.msra.mxu0 %vm978_vm4, %v2128_v7  ;;  %3219 = vmatprep.mubr.msk.f32.mxu0 %vm3409_vm1, %v3408_v1 }
 0x464   : > { %3228 = vmatprep.subr.mxu0 %v3408_v1 }
 0x46a   : > { %3220 = vmatmul.mubr.msk.f32.vlgmr.msra.gmra.mrb[6].mxu0 %vm968_vm6, %v3789_v6  ;;  %v3344_v6 = vld [vmem:[%s3993_s19 + $0x30] sm:$0xff]  }
 0x46b   : > { %3222 = vmatprep.mubr.msk.f32.mxu0 %vm3409_vm1, %v3408_v1  ;;  %3257 = vmatprep.subr.bf16.mxu1 %v3344_v6 }
 0x46c   : > { %3258 = vmatpush3.bf16.msra.mxu1 %v3344_v6  ;;  %3229 = vmatpush3.msk.msra.mxu0 %vm978_vm4, %v2323_v39 }
 0x46e   : > { %3223 = vmatmul.mubr.msk.f32.gmra.mrb[20].mxu0 %vm968_vm6, %v3795_v9  ;;  %v3345_v9 = vld [vmem:[%s3993_s19 + $0x38] sm:$0xff]  }
 0x46f   : > { %3225 = vmatprep.mubr.msk.f32.mxu0 %vm3409_vm1, %v3408_v1  ;;  %3259 = vmatprep.subr.bf16.mxu1 %v3345_v9 }
 0x470   : > { %3260 = vmatpush3.bf16.msra.mxu1 %v3345_v9 }
 0x472   : > { %3226 = vmatmul.mubr.msk.f32.gmra.mrb[22].mxu0 %vm968_vm6, %v3805_v17 }
 0x473   : > { %3230 = vmatprep.mubr.msk.f32.mxu0 %vm3409_vm1, %v3408_v1 }
 0x4d1   : > { %v3215_v13 = vpop.f32.mrb[20].mxu1 }
 0x4d2   : > { %v2103_v14 = vpop.f32.mrb[21].mxu1 }
 0x4d3   : > { %v3216_v59 = vpop.f32.mrb[22].mxu1 }
 0x4d4   : > { %v2106_v17 = vpop.f32.mrb[23].mxu1 }
 0x535   : > { %v3195_v61 = vpop.f32.mrb[16].mxu0 }
 0x536   : > { %v2112_v20 = vadd.f32 %v3215_v13, %v3195_v61  ;;  %v2007_v63 = vpop.f32.mrb[17].mxu0 }
 0x537   : > { %v2104_v21 = vadd.f32 %v2103_v14, %v2007_v63  ;;  %v3196_v23 = vpop.f32.mrb[18].mxu0 }
 0x538   : > { %v2124_v24 = vadd.f32 %v2968_v18, %v2112_v20  ;;  %v2010_v25 = vpop.f32.mrb[19].mxu0 }
 0x539   : > { %v2122_v26 = vadd.f32 %v2968_v18, %v2104_v21  ;;  %v2107_v16 = vadd.f32 %v2106_v17, %v2010_v25 }
 0x53a   : > { %v2127_v28 = vmax.f32 %v2124_v24, 0.0 }
 0x53b   : > { %v2123_v27 = vadd.f32 %v2968_v18, %v2107_v16  ;;  %v2125_v29 = vmax.f32 %v2122_v26, 0.0 }
 0x53c   : > { %v2487_v34 = vpack.c.bf16 %v2127_v28, %v2127_v28 }
 0x53d   : > { %v2126_v30 = vmax.f32 %v2123_v27, 0.0  ;;  %v3867_v31 = vpop.f32.mrb[6].mxu0 }
 0x53e   : > { %v2221_v19 = vmul.f32 %v3867_v31, %v3867_v31  ;;  %v3221_v32 = vpop.f32.mrb[7].mxu0 }
 0x53f   : > { %v2486_v33 = vpack.c.bf16 %v2126_v30, %v2125_v29 }
 0x540   : > { %2239 = vrot.lane.b32.xlu1 %v2221_v19, %s3414_s29  ;;  %2227 = vrot.lane.b32.xlu0 %v2221_v19, %s3413_s6 }
 0x541   : > { %v3873_v35 = vpop.f32.mrb[20].mxu0  ;;  %3261 = vmatprep.mubr.bf16.mxu1 %v2486_v33 }
 0x542   : > { %v2222_v10 = vmul.f32 %v3873_v35, %v3873_v35  ;;  %v3224_v36 = vpop.f32.mrb[21].mxu0  ;;  %3262 = vmatmul.mubr.bf16.vlgmr.msra.gmra.mrb[24].mxu1 %v2487_v34 }
 0x544   : > { %2241 = vrot.lane.b32.xlu1 %v2222_v10, %s3414_s29  ;;  %2229 = vrot.lane.b32.xlu0 %v2222_v10, %s3413_s6 }
 0x545   : > { %v3879_v37 = vpop.f32.mrb[22].mxu0 }
 0x546   : > { %v2223_v12 = vmul.f32 %v3879_v37, %v3879_v37  ;;  %v3227_v38 = vpop.f32.mrb[23].mxu0 }
 0x548   : > { %2243 = vrot.lane.b32.xlu1 %v2223_v12, %s3414_s29  ;;  %2231 = vrot.lane.b32.xlu0 %v2223_v12, %s3413_s6 }
 0x5b2   : > { %v2240_v40 = vpop.permute.xlu1 %2239  ;;  %v2228_v41 = vpop.permute.xlu0 %2227 }
 0x5b3   : > { %v2236_v15 = vadd.f32 %v2228_v41, %v2221_v19 }
 0x5b5   : > { %v2248_v22 = vadd.f32 %v2240_v40, %v2236_v15 }
 0x5b6   : > { %v2242_v42 = vpop.permute.xlu1 %2241  ;;  %v2230_v43 = vpop.permute.xlu0 %2229 }
 0x5b7   : > { %v2251_v44 = vmax.f32 %v2248_v22, 1e-08  ;;  %v2237_v45 = vadd.f32 %v2230_v43, %v2222_v10 }
 0x5b9   : > { %3376 = vrsqrt.f32 %v2251_v44  ;;  %v2249_v46 = vadd.f32 %v2242_v42, %v2237_v45  ;;  %vm2256_vm10 = vcmp.eq.f32.partialorder %v2251_v44, inf  ;;  %v2259_v55 = vand.u32 2147483648, %v2251_v44  ;;  %v2488_v45 = vld [vmem:[%s3994_s20] sm:$0x1] }
 0x5ba   : > { %v2232_v47 = vpop.permute.xlu0 %2231  ;;  %v2244_v50 = vpop.permute.xlu1 %2243  ;;  %vm2258_vm11 = vcmp.eq.f32.partialorder %v2251_v44, 0.0  ;;  %3294 = vmatprep.subr.msk.bf16.mxu0 %vm1969_vm14, %v2488_v45 }
 0x5bb   : > { %v2238_v48 = vadd.f32 %v2232_v47, %v2223_v12  ;;  %v2252_v49 = vmax.f32 %v2249_v46, 1e-08  ;;  %v2498_v46 = vsel %vm1969_vm14, %v2488_v45, 0 }
 0x5bd   : > { %v2250_v51 = vadd.f32 %v2244_v50, %v2238_v48  ;;  %3378 = vrsqrt.f32 %v2252_v49  ;;  %vm2263_vm12 = vcmp.eq.f32.partialorder %v2252_v49, inf  ;;  %v2266_v0 = vand.u32 2147483648, %v2252_v49 }
 0x5be   : > { %vm2265_vm13 = vcmp.eq.f32.partialorder %v2252_v49, 0.0 }
 0x5bf   : > { %v2253_v52 = vmax.f32 %v2250_v51, 1e-08 }
 0x5c1   : > { %3380 = vrsqrt.f32 %v2253_v52  ;;  %vm2270_vm15 = vcmp.eq.f32.partialorder %v2253_v52, inf  ;;  %v2273_v8 = vand.u32 2147483648, %v2253_v52  ;;  %vm2272_vm0 = vcmp.eq.f32.partialorder %v2253_v52, 0.0 }
 0x5c3   : > { %v3377_v53 = vpop.eup %3376 }
 0x5c4   : > { %v2255_v54 = vmul.f32 %v3377_v53, %v2251_v44 }
 0x5c6   : > { %v2257_v56 = vsel %vm2256_vm10, %v2251_v44, %v2255_v54 }
 0x5c7   : > { %v2260_v57 = vsel %vm2258_vm11, %v2259_v55, %v2257_v56  ;;  %v3379_v58 = vpop.eup %3378 }
 0x5c8   : > { %v2973_v60 = vmul.f32 -1.442695, %v2260_v57  ;;  %v2262_v62 = vmul.f32 %v3379_v58, %v2252_v49 }
 0x5ca   : > { %3382 = vpow2.f32 %v2973_v60  ;;  %v2264_v3 = vsel %vm2263_vm12, %v2252_v49, %v2262_v62 }
 0x5cb   : > { %v3381_v2 = vpop.eup %3380  ;;  %v2267_v4 = vsel %vm2265_vm13, %v2266_v0, %v2264_v3 }
 0x5cc   : > { %v2269_v5 = vmul.f32 %v3381_v2, %v2253_v52  ;;  %v2974_v7 = vmul.f32 -1.442695, %v2267_v4 }
 0x5ce   : > { %v2271_v11 = vsel %vm2270_vm15, %v2253_v52, %v2269_v5  ;;  %3384 = vpow2.f32 %v2974_v7 }
 0x5cf   : > { %v2274_v6 = vsel %vm2272_vm0, %v2273_v8, %v2271_v11 }
 0x5d0   : > { %v2975_v9 = vmul.f32 -1.442695, %v2274_v6 }
 0x5d2   : > { %3386 = vpow2.f32 %v2975_v9 }
 0x5d4   : > { %v3383_v13 = vpop.eup %3382 }
 0x5d5   : > { %v2284_v14 = vadd.f32 1.0, %v3383_v13 }
 0x5d7   : > { %3388 = vrcp.f32 %v2284_v14 }
 0x5d8   : > { %v3385_v59 = vpop.eup %3384 }
 0x5d9   : > { %v2285_v17 = vadd.f32 1.0, %v3385_v59 }
 0x5db   : > { %3390 = vrcp.f32 %v2285_v17 }
 0x5dc   : > { %v3387_v61 = vpop.eup %3386 }
 0x5dd   : > { %v2286_v18 = vadd.f32 1.0, %v3387_v61 }
 0x5df   : > { %3392 = vrcp.f32 %v2286_v18 }
 0x5e1   : > { %v3389_v20 = vpop.eup %3388 }
 0x5e2   : > { %2305 = vrot.lane.b32.xlu1 %v3389_v20, %s3415_s7  ;;  %2296 = vrot.lane.b32.xlu0 %v3389_v20, %s3416_s25 }
 0x5e5   : > { %v3391_v63 = vpop.eup %3390 }
 0x5e6   : > { %2307 = vrot.lane.b32.xlu1 %v3391_v63, %s3415_s7  ;;  %2298 = vrot.lane.b32.xlu0 %v3391_v63, %s3416_s25 }
 0x5e9   : > { %v3393_v21 = vpop.eup %3392 }
 0x5ea   : > { %2309 = vrot.lane.b32.xlu1 %v3393_v21, %s3415_s7  ;;  %2300 = vrot.lane.b32.xlu0 %v3393_v21, %s3416_s25 }
 0x615   : > { %v3895_v23 = vpop.f32.mrb[24].mxu1 }
 0x616   : > { %v3897_v24 = vpop.f32.mrb[25].mxu1 }
 0x617   : > { %v3264_v25 = vpop.f32.mrb[26].mxu1 }
 0x618   : > { %v3899_v26 = vpop.f32.mrb[27].mxu1 }
 0x654   : > { %v2306_v16 = vpop.permute.xlu1 %2305  ;;  %v2297_v27 = vpop.permute.xlu0 %2296 }
 0x655   : > { %v2314_v28 = vsel %vm1784_vm3, %v3389_v20, %v2297_v27 }
 0x656   : > { %v2317_v29 = vsel %vm1788_vm5, %v2314_v28, %v2306_v16  ;;  %v2990_v16 = vld [vmem:[%s3996_s22 + $0x2] ss:$0 sm:$0xff] }
 0x657   : > { %v2320_v30 = vmul.f32 %v2317_v29, %v3867_v31 }
 0x658   : > { %v2308_v19 = vpop.permute.xlu1 %2307  ;;  %v2299_v32 = vpop.permute.xlu0 %2298 }
 0x659   : > { %3231 = vmatmul.mubr.msk.f32.vlgmr.msra.gmra.mrb[24].mxu0 %vm968_vm6, %v2320_v30  ;;  %v2315_v33 = vsel %vm1784_vm3, %v3391_v63, %v2299_v32 }
 0x65a   : > { %3233 = vmatprep.mubr.msk.f32.mxu0 %vm3409_vm1, %v3408_v1  ;;  %v2318_v34 = vsel %vm1788_vm5, %v2315_v33, %v2308_v19  ;;  %3240 = vmatpush3.bf16.msra.mxu0 %v2498_v46 }
 0x65b   : > { %v2321_v10 = vmul.f32 %v2318_v34, %v3873_v35  ;;  %3265 = vmatprep.subr.mxu0 %v3408_v1 }
 0x65c   : > { %v2310_v36 = vpop.permute.xlu1 %2309  ;;  %v2301_v12 = vpop.permute.xlu0 %2300 }
 0x65d   : > { %v2316_v38 = vsel %vm1784_vm3, %v3393_v21, %v2301_v12  ;;  %3234 = vmatmul.mubr.msk.f32.gmra.mrb[26].mxu0 %vm968_vm6, %v2321_v10  ;;  %v2652_v21 = vld [vmem:[%s3995_s21] sm:$0x3f] }
 0x65e   : > { %v2319_v31 = vsel %vm1788_vm5, %v2316_v38, %v2310_v36  ;;  %3236 = vmatprep.mubr.msk.f32.mxu0 %vm3409_vm1, %v3408_v1 }
 0x65f   : > { %v2322_v39 = vmul.f32 %v2319_v31, %v3879_v37 }
 0x661   : > { %3237 = vmatmul.mubr.msk.f32.gmra.mrb[28].mxu0 %vm968_vm6, %v2322_v39 }
 0x72c   : > { %v3917_v40 = vpop.f32.mrb[24].mxu0 }
 0x72d   : > { %v2416_v35 = vmul.f32 %v3917_v40, %v3917_v40  ;;  %v3232_v41 = vpop.f32.mrb[25].mxu0 }
 0x72f   : > { %2434 = vrot.lane.b32.xlu1 %v2416_v35, %s3414_s29  ;;  %2422 = vrot.lane.b32.xlu0 %v2416_v35, %s3413_s6 }
 0x730   : > { %v3923_v15 = vpop.f32.mrb[26].mxu0 }
 0x731   : > { %v2417_v22 = vmul.f32 %v3923_v15, %v3923_v15  ;;  %v3235_v42 = vpop.f32.mrb[27].mxu0 }
 0x733   : > { %2424 = vrot.lane.b32.xlu1 %v2417_v22, %s3413_s6 }
 0x734   : > { %v2412_v37 = vpop.f32.mrb[28].mxu0 }
 0x735   : > { %v2418_v43 = vmul.f32 %v2412_v37, %v2412_v37  ;;  %v3238_v44 = vpop.f32.mrb[29].mxu0 }
 0x737   : > { %2438 = vrot.lane.b32.xlu1 %v2418_v43, %s3414_s29  ;;  %2426 = vrot.lane.b32.xlu0 %v2418_v43, %s3413_s6 }
 0x73b   : > { %2436 = vrot.lane.b32.xlu0 %v2417_v22, %s3414_s29 }
 0x7a1   : > { %v2435_v47 = vpop.permute.xlu1 %2434  ;;  %v2423_v48 = vpop.permute.xlu0 %2422 }
 0x7a2   : > { %v2431_v49 = vadd.f32 %v2423_v48, %v2416_v35 }
 0x7a4   : > { %v2443_v50 = vadd.f32 %v2435_v47, %v2431_v49 }
 0x7a5   : > { %v2425_v51 = vpop.permute.xlu1 %2424 }
 0x7a6   : > { %v2446_v52 = vmax.f32 %v2443_v50, 1e-08  ;;  %v2432_v56 = vadd.f32 %v2425_v51, %v2417_v22 }
 0x7a8   : > { %3394 = vrsqrt.f32 %v2446_v52  ;;  %vm2451_vm14 = vcmp.eq.f32.partialorder %v2446_v52, inf  ;;  %v2454_v13 = vand.u32 2147483648, %v2446_v52  ;;  %vm2453_vm8 = vcmp.eq.f32.partialorder %v2446_v52, 0.0 }
 0x7a9   : > { %v2427_v53 = vpop.permute.xlu0 %2426  ;;  %v2439_v55 = vpop.permute.xlu1 %2438 }
 0x7aa   : > { %v2433_v54 = vadd.f32 %v2427_v53, %v2418_v43 }
 0x7ac   : > { %v2445_v57 = vadd.f32 %v2439_v55, %v2433_v54 }
 0x7ad   : > { %v2437_v58 = vpop.permute.xlu0 %2436 }
 0x7ae   : > { %v2448_v60 = vmax.f32 %v2445_v57, 1e-08  ;;  %v2444_v62 = vadd.f32 %v2437_v58, %v2432_v56 }
 0x7b0   : > { %3396 = vrsqrt.f32 %v2448_v60  ;;  %v2447_v0 = vmax.f32 %v2444_v62, 1e-08  ;;  %vm2465_vm5 = vcmp.eq.f32.partialorder %v2448_v60, inf  ;;  %v2468_v8 = vand.u32 2147483648, %v2448_v60 }
 0x7b1   : > { %vm2467_vm7 = vcmp.eq.f32.partialorder %v2448_v60, 0.0 }
 0x7b2   : > { %3398 = vrsqrt.f32 %v2447_v0  ;;  %v3395_v2 = vpop.eup %3394  ;;  %vm2458_vm2 = vcmp.eq.f32.partialorder %v2447_v0, inf  ;;  %v2461_v14 = vand.u32 2147483648, %v2447_v0  ;;  %vm2460_vm9 = vcmp.eq.f32.partialorder %v2447_v0, 0.0 }
 0x7b3   : > { %v2450_v3 = vmul.f32 %v3395_v2, %v2446_v52 }
 0x7b5   : > { %v2452_v11 = vsel %vm2451_vm14, %v2446_v52, %v2450_v3 }
 0x7b6   : > { %v2455_v61 = vsel %vm2453_vm8, %v2454_v13, %v2452_v11 }
 0x7ba   : > { %v3397_v4 = vpop.eup %3396 }
 0x7bb   : > { %v2464_v5 = vmul.f32 %v3397_v4, %v2448_v60 }
 0x7bc   : > { %v3399_v7 = vpop.eup %3398 }
 0x7bd   : > { %v2457_v6 = vmul.f32 %v3399_v7, %v2447_v0  ;;  %v2466_v9 = vsel %vm2465_vm5, %v2448_v60, %v2464_v5 }
 0x7be   : > { %v2469_v17 = vsel %vm2467_vm7, %v2468_v8, %v2466_v9 }
 0x7bf   : > { %v2459_v59 = vsel %vm2458_vm2, %v2447_v0, %v2457_v6  ;;  %v2490_v63 = vpack.c.bf16 %v2469_v17, %v2469_v17 }
 0x7c0   : > { %v2462_v18 = vsel %vm2460_vm9, %v2461_v14, %v2459_v59 }
 0x7c1   : > { %v2489_v20 = vpack.c.bf16 %v2462_v18, %v2455_v61 }
 0x7c3   : > { %3241 = vmatprep.mubr.msk.bf16.mxu0 %vm1784_vm3, %v2489_v20 }
 0x7c4   : > { %3242 = vmatmul.mubr.msk.bf16.vlgmr.msra.gmra.mrb[32].mxu0 %vm1784_vm3, %v2490_v63 }
 0x7c5   : > { %3266 = vmatpush3.msk.msra.mxu0 %vm978_vm4, %v2652_v21  ;;  %3267 = vmatprep.mubr.msk.f32.mxu0 %vm3409_vm1, %v3408_v1 }
 0x7cc   : > { %3268 = vmatmul.mubr.msk.f32.vlgmr.msra.gmra.mrb[30].mxu0 %vm968_vm6, %v3917_v40 }
 0x7cd   : > { %3270 = vmatprep.mubr.msk.f32.mxu0 %vm3409_vm1, %v3408_v1 }
 0x7d0   : > { %3271 = vmatmul.mubr.msk.f32.gmra.mrb[36].mxu0 %vm968_vm6, %v3923_v15 }
 0x7d1   : > { %3273 = vmatprep.mubr.msk.f32.mxu0 %vm3409_vm1, %v3408_v1 }
 0x7d4   : > { %3274 = vmatmul.mubr.msk.f32.gmra.mrb[38].mxu0 %vm968_vm6, %v2412_v37 }
 0x897   : > { %v3243_v25 = vpop.f32.mrb[32].mxu0 }
 0x898   : > { %v2639_v27 = vadd.f32 %v3895_v23, %v3243_v25  ;;  %v2534_v28 = vpop.f32.mrb[33].mxu0 }
 0x899   : > { %v2631_v29 = vadd.f32 %v3897_v24, %v2534_v28  ;;  %v3244_v30 = vpop.f32.mrb[34].mxu0 }
 0x89a   : > { %v2651_v19 = vadd.f32 %v2990_v16, %v2639_v27  ;;  %v2537_v1 = vpop.f32.mrb[35].mxu0 }
 0x89b   : > { %v2649_v32 = vadd.f32 %v2990_v16, %v2631_v29  ;;  %v2634_v33 = vadd.f32 %v3899_v26, %v2537_v1 }
 0x89c   : > { %2747 = vst [vmem:[%s857_s3 + $0x10] sm:$0xff] %v2651_v19 }
 0x89d   : > { %2745 = vst [vmem:[%s857_s3] sm:$0xff] %v2649_v32  ;;  %v2650_v34 = vadd.f32 %v2990_v16, %v2634_v33 }
 0x89f   : > { %2746 = vst [vmem:[%s857_s3 + $0x8] sm:$0xff] %v2650_v34  ;;  %v2731_v23 = vpop.f32.mrb[30].mxu0 }
 0x8a0   : > { %2748 = vst.msk [vmem:[%s863_s27] sm:$0xff] %vm968_vm6, %v2731_v23  ;;  %v3269_v10 = vpop.f32.mrb[31].mxu0 }
 0x8a3   : > { %v2736_v36 = vpop.f32.mrb[36].mxu0 }
 0x8a4   : > { %2749 = vst.msk [vmem:[%s863_s27 + $0x8] sm:$0xff] %vm968_vm6, %v2736_v36  ;;  %v3272_v24 = vpop.f32.mrb[37].mxu0 }
 0x8a7   : > { %v2741_v12 = vpop.f32.mrb[38].mxu0 }
 0x8a8   : > { %2750 = vst.msk [vmem:[%s863_s27 + $0x10] sm:$0xff] %vm968_vm6, %v2741_v12  ;;  %v3275_v26 = vpop.f32.mrb[39].mxu0 }
 0x8a9 PF: > { %s35_s5 = sadd.s32 1, %s3406_s5  }
 0x8aa   : > { %p32_p4 = scmp.ge.s32.totalorder %s35_s5, 4  }
 0x8ac   :  { %34 = sbr.rel (!%p32_p4) target bundleno = 10 (0xa), region = 169 }

// kernel: scoring_model_forward.5
= control target key start
LH: loop header
LB: loop body
LE: loop exit
PB: predicated region body
PF: predicated region fallthrough
CT: control target
= control target key end

     0   :  { %s2305_s20 = smov 0   ;;  %s2654_s0 = inlined_call_operand.vmem [shape: f32[16,128], index: 0, kind: input, shape index: {}]   ;;  %s2655_s1 = inlined_call_operand.vmem [shape: f32[16,6], index: 1, kind: input, shape index: {}]   ;;  %s2656_s2 = inlined_call_operand.vmem [shape: f32[16,128], index: 2, kind: input, shape index: {}]   ;;  %s2657_s3 = inlined_call_operand.vmem [shape: f32[16,6], index: 3, kind: input, shape index: {}]   ;;  %s2658_s4 = inlined_call_operand.vmem [shape: f32[16,1], index: 4, kind: input, shape index: {}]   ;;  %s2659_s5 = inlined_call_operand.vmem [shape: f32[6,128], index: 5, kind: input, shape index: {}]   ;;  %s2660_s6 = inlined_call_operand.vmem [shape: f32[6,12], index: 6, kind: input, shape index: {}]   ;;  %s2661_s7 = inlined_call_operand.vmem [shape: bf16[128,512], index: 7, kind: input, shape index: {}]   ;;  %s2662_s8 = inlined_call_operand.vmem [shape: bf16[4,512], index: 8, kind: input, shape index: {}]   ;;  %s2663_s9 = inlined_call_operand.vmem [shape: f32[1,512], index: 9, kind: input, shape index: {}]   ;;  %s2664_s10 = inlined_call_operand.vmem [shape: f32[12,12], index: 10, kind: input, shape index: {}]   ;;  %s2665_s11 = inlined_call_operand.vmem [shape: f32[12,12], index: 11, kind: input, shape index: {}]   ;;  %s2666_s12 = inlined_call_operand.vmem [shape: bf16[512,128], index: 12, kind: input, shape index: {}]   ;;  %s2667_s13 = inlined_call_operand.vmem [shape: bf16[4,128], index: 13, kind: input, shape index: {}]   ;;  %s2668_s14 = inlined_call_operand.<no memory space> [shape: f32[1,1], index: 14, kind: input, shape index: {}]   ;;  %s2669_s15 = inlined_call_operand.vmem [shape: f32[16,1], index: 15, kind: output, shape index: {}]  }
   0x1   :  { %v20_v0 = vstv %s2668_s14 }
   0x2   :  { %21 = vst [vmem:[#allocation2] sm:$0x1] %v20_v0 }
   0x3 LB: > { %s1896_s21 = sadd.s32 4294967295, %s2209_s20   ;;  %p1900_p0 = scmp.ge.s32.totalorder %s2209_s20, 1  ;;  %s2209_s20 = sphi %s2305_s20, %s27_s20  }
   0x4   : > { %p474_p1 = scmp.lt.s32.totalorder %s2209_s20, 3 }
   0x6   : > { %p475_p2 = pnand %p1900_p0, %p474_p1 }
   0x7   : > { %p536_p3 = scmp.lt.s32.totalorder (!%p475_p2), %s1896_s21, 1  ;;  %v2211_v1 = vmov (!%p475_p2), 0   ;;  %s2212_s16 = smov (!%p475_p2), 124   ;;  %vm613_vm0 = vcmask (!%p475_p2), 15360   ;;  %v621_v21 = vld [vmem:[%s2660_s6] sm:$0x3f] (!%p475_p2)  ;;  %v758_v28 = vlaneseq (!%p475_p2) }
   0x8   : > { %478 = sbr.rel (%p475_p2) target bundleno = 2459 (0x99b), region = 80  ;;  %2099 = vset.pattern.permute.xlu0 (!%p475_p2), %v2211_v1  ;;  %820 = vmatprep.mubr.bf16.mxu1 (!%p475_p2), %v2211_v1  ;;  %s2213_s17 = smov (!%p475_p2), 126   ;;  %vm626_vm1 = vcmask (!%p475_p2), 1045504   ;;  %v2214_v22 = vmov (!%p475_p2), 0.0   ;;  %vm2215_vm2 = vmmov (!%p475_p2), 0   ;;  %vm622_vm3 = vcmask (!%p475_p2), 48128  }
   0x9   : > { %2047 = vmatprep.subr.mxu0 (!%p475_p2), %v2214_v22  ;;  %2049 = vmatprep.mubr.msk.f32.mxu0 (!%p475_p2), %vm2215_vm2, %v2214_v22  ;;  %v751_v27 = vld [vmem:[%s2662_s8] sm:$0xff] (!%p475_p2)  ;;  %v2216_v29 = vmov (!%p475_p2), 1983009808   ;;  %v2348_v31 = vshrl.u32 (!%p475_p2), %v758_v28, 7  ;;  %vm775_vm4 = vcmask (!%p475_p2), 1041408   ;;  %s2217_s29 = smov (!%p475_p2), 120  }
   0xa   : > { %2048 = vmatpush3.msk.msra.mxu0 (!%p475_p2), %vm626_vm1, %v621_v21  ;;  %v756_v30 = vunpack.c.l.s4 (!%p475_p2), %v2216_v29  ;;  %v754_v32 = vcombine.high (!%p475_p2), %v751_v27, %v751_v27  ;;  %v2103_v44 = vld [vmem:[%s2661_s7 + $0x4] ss:$16 sps:$4 sm:$0xff] (!%p475_p2)   ;;  %v2106_v45 = vld [vmem:[%s2661_s7 + $0xc] ss:$16 sps:$4 sm:$0xff] (!%p475_p2)   ;;  %vm771_vm7 = vcmask (!%p475_p2), 31744   ;;  %v2218_v28 = vmov (!%p475_p2), 0.0|0.0  }
   0xb   : > { %v2101_v60 = vld [vmem:[%s2661_s7] ss:$16 sps:$4 sm:$0xff] (!%p475_p2)   ;;  %v2104_v61 = vld [vmem:[%s2661_s7 + $0x8] ss:$16 sps:$4 sm:$0xff] (!%p475_p2)   ;;  %v2109_v63 = vld [vmem:[%s2661_s7 + $0x24] ss:$16 sps:$4 sm:$0xff] (!%p475_p2)  }
   0xc   : > { %v757_v33 = vunpack.c.0.s8 (!%p475_p2), %v756_v30  ;;  %v2112_v0 = vld [vmem:[%s2661_s7 + $0x2c] ss:$16 sps:$4 sm:$0xff] (!%p475_p2)   ;;  %v2137_v21 = vld [vmem:[%s2661_s7 + $0xc0] ss:$16 sps:$4 sm:$0xff] (!%p475_p2)   ;;  %vm1148_vm8 = vcmask (!%p475_p2), 1043456   ;;  %vm2219_vm9 = vmmov (!%p475_p2), 1  }
   0xd   : > { %vm2482_vm10 = vmpackc.low (!%p475_p2), %vm1148_vm8, %vm2219_vm9  ;;  %vm1144_vm11 = vcmask (!%p475_p2), 97280   ;;  %s2220_s25 = smov (!%p475_p2), 4   ;;  %s2221_s26 = smov (!%p475_p2), 8   ;;  %vm1254_vm14 = vcmask (!%p475_p2), 64512   ;;  %vm1793_vm1 = vcmask (!%p475_p2), 7168  }
   0xe   : > { %v760_v37 = vsub.s32 (!%p475_p2), %v757_v33, %v2348_v31 }
   0xf   : > { %s2673_s21 = smov (!%p536_p3, %s1896_s21), 1 }
  0x10   : > { %s2315_s14 = sshll.u32 %s2673_s21, 3  ;;  %v761_v38 = vrot.slane %v751_v27, %v760_v37  ;;  %v768_v39 = vrot.slane %v754_v32, %v760_v37  ;;  %v2146_v27 = vld [vmem:[%s2661_s7 + $0xe8] ss:$16 sps:$4 sm:$0xff]   ;;  %v1908_v37 = vld [vmem:[%s2659_s5 + $0x1] ss:$0 sm:$0xff] }
  0x11   : > { %s555_s24 = scalar_lea.vmem %s2658_s4, %s2315_s14  ;;  %s551_s27 = scalar_lea.vmem %s2657_s3, %s2315_s14 }
  0x12   : > { %v561_v2 = vld [vmem:[%s555_s24] sm:$0xff]  ;;  %s543_s30 = scalar_lea.vmem %s2655_s1, %s2315_s14  ;;  %s547_s21 = scalar_lea.vmem %s2656_s2, %s2315_s14  ;;  %v769_v40 = vcombine.high %v761_v38, %v761_v38  ;;  %v770_v41 = vcombine.high %v768_v39, %v768_v39  ;;  %v777_v42 = vsel %vm775_vm4, %v761_v38, 0  ;;  %v783_v43 = vsel %vm775_vm4, %v768_v39, 0 }
  0x13   : > { %v562_v3 = vmax.f32 %v561_v2, 1.0  ;;  %v575_v5 = vld [vmem:[%s551_s27] sm:$0xff]  ;;  %s539_s24 = scalar_lea.vmem %s2654_s0, %s2315_s14  ;;  %s559_s23 = scalar_lea.vmem %s2669_s15, %s2315_s14 }
  0x14   : > { %v574_v7 = vld [vmem:[%s543_s30] sm:$0xff]  ;;  %1911 = vmatprep.subr.msk.bf16.mxu1 %vm775_vm4, %v769_v40  ;;  %1913 = vmatprep.subr.msk.bf16.mxu0 %vm775_vm4, %v770_v41  ;;  %v1143_v40 = vld [vmem:[%s2664_s10 + $0x8] sm:$0xf] }
  0x15   : > { %2181 = vrcp.f32 %v562_v3  ;;  %v566_v11 = vld [vmem:[%s547_s21] sm:$0xff]  ;;  %789 = vmatpush1.bf16.msra.mxu1 %v777_v42  ;;  %v2110_v3 = vld [vmem:[%s2661_s7 + $0x28] ss:$16 sps:$4 sm:$0xff]  }
  0x16   : > { %v565_v13 = vld [vmem:[%s539_s24] sm:$0xff]  ;;  %1030 = vmatprep.subr.bf16.mxu1 %v2103_v44  ;;  %v2153_v44 = vld [vmem:[%s2666_s12 + $0x50] sm:$0xff]  }
  0x17   : > { %v2107_v2 = vld [vmem:[%s2661_s7 + $0x20] ss:$16 sps:$4 sm:$0xff]  }
  0x18   : > { %v1142_v39 = vld [vmem:[%s2664_s10] sm:$0xff] }
  0x19   : > { %v2073_v42 = vpack.c.bf16 %v1143_v40, %v1142_v39  ;;  %v2151_v40 = vld [vmem:[%s2666_s12 + $0x48] sm:$0xff]  }
  0x1f   : > { %v2182_v4 = vpop.eup %2181 }
  0x20   : > { %569 = vperm.xlu0 %2099, %v2182_v4   ;;  %v2115_v4 = vld [vmem:[%s2661_s7 + $0x44] ss:$16 sps:$4 sm:$0xff]  }
  0x9f   : > { %v570_v6 = vpop.permute.xlu0 %569 }
  0xa0   : > { %v576_v8 = vmul.f32 %v575_v5, %v570_v6  ;;  %v572_v12 = vmul.f32 %v570_v6, %v566_v11  ;;  %v2118_v5 = vld [vmem:[%s2661_s7 + $0x4c] ss:$16 sps:$4 sm:$0xff]   ;;  %v2113_v6 = vld [vmem:[%s2661_s7 + $0x40] ss:$16 sps:$4 sm:$0xff]   ;;  %v2127_v11 = vld [vmem:[%s2661_s7 + $0x84] ss:$16 sps:$4 sm:$0xff]  }
  0xa2   : > { %v577_v9 = vadd.f32 %v576_v8, %v574_v7  ;;  %v573_v14 = vadd.f32 %v572_v12, %v565_v13  ;;  %v2116_v7 = vld [vmem:[%s2661_s7 + $0x48] ss:$16 sps:$4 sm:$0xff]   ;;  %v2121_v8 = vld [vmem:[%s2661_s7 + $0x64] ss:$16 sps:$4 sm:$0xff]   ;;  %v2130_v12 = vld [vmem:[%s2661_s7 + $0x8c] ss:$16 sps:$4 sm:$0xff]  }
  0xa3   : > { %v2125_v13 = vld [vmem:[%s2661_s7 + $0x80] ss:$16 sps:$4 sm:$0xff]  }
  0xa4   : > { %v602_v10 = vmul.f32 %v577_v9, %v577_v9 }
  0xa6   : > { %608 = vrot.lane.b32.xlu1 %v602_v10, %s2212_s16  ;;  %604 = vrot.lane.b32.xlu0 %v602_v10, %s2213_s17 }
  0xc5   : > { %580 = vadd.xlane.f32.xlu0 %v573_v14 }
 0x118   : > { %v605_v15 = vpop.permute.xlu0 %604  ;;  %v609_v17 = vpop.permute.xlu1 %608 }
 0x119   : > { %v607_v16 = vadd.f32 %v605_v15, %v602_v10  ;;  %v2122_v10 = vld [vmem:[%s2661_s7 + $0x68] ss:$16 sps:$4 sm:$0xff]   ;;  %v2133_v15 = vld [vmem:[%s2661_s7 + $0xa4] ss:$16 sps:$4 sm:$0xff]  }
 0x11b   : > { %v611_v18 = vadd.f32 %v609_v17, %v607_v16  ;;  %v2136_v16 = vld [vmem:[%s2661_s7 + $0xac] ss:$16 sps:$4 sm:$0xff]   ;;  %v2131_v17 = vld [vmem:[%s2661_s7 + $0xa0] ss:$16 sps:$4 sm:$0xff]  }
 0x11d   : > { %v612_v19 = vmax.f32 %v611_v18, 1e-08  ;;  %v2134_v18 = vld [vmem:[%s2661_s7 + $0xa8] ss:$16 sps:$4 sm:$0xff]  }
 0x11f   : > { %v614_v20 = vsel %vm613_vm0, %v612_v19, 0.0  ;;  %v2139_v19 = vld [vmem:[%s2661_s7 + $0xc4] ss:$16 sps:$4 sm:$0xff]  }
 0x120   : > { %615 = vadd.xlane.f32.xlu1 %v614_v20  ;;  %v2142_v20 = vld [vmem:[%s2661_s7 + $0xcc] ss:$16 sps:$4 sm:$0xff]  }
 0x152   : > { %v581_v46 = vpop.xlane.xlu0 %580 }
 0x153   : > { %v583_v47 = vmul.f32 0.0078125, %v581_v46 }
 0x155   : > { %v2367_v48 = vsub.f32 %v573_v14, %v583_v47  ;;  %v2128_v14 = vld [vmem:[%s2661_s7 + $0x88] ss:$16 sps:$4 sm:$0xff]  }
 0x157   : > { %v585_v49 = vmul.f32 %v2367_v48, %v2367_v48 }
 0x1ad   : > { %v616_v23 = vpop.xlane.xlu1 %615 }
 0x1ae   : > { %v618_v24 = vmul.f32 0.5, %v616_v23  ;;  %v2140_v23 = vld [vmem:[%s2661_s7 + $0xc8] ss:$16 sps:$4 sm:$0xff]  }
 0x1b0   : > { %2183 = vrsqrt.f32 %v618_v24  ;;  %v2145_v24 = vld [vmem:[%s2661_s7 + $0xe4] ss:$16 sps:$4 sm:$0xff]  }
 0x1ba   : > { %v2184_v25 = vpop.eup %2183 }
 0x1bb   : > { %v620_v26 = vmul.f32 %v2184_v25, %v577_v9  ;;  %v2119_v9 = vld [vmem:[%s2661_s7 + $0x60] ss:$16 sps:$4 sm:$0xff]   ;;  %v2148_v25 = vld [vmem:[%s2661_s7 + $0xec] ss:$16 sps:$4 sm:$0xff]  }
 0x1bd   : > { %2050 = vmatmul.mubr.msk.f32.vlgmr.msra.gmra.mrb[0].mxu0 %vm622_vm3, %v620_v26  ;;  %v2143_v26 = vld [vmem:[%s2661_s7 + $0xe0] ss:$16 sps:$4 sm:$0xff]  }
 0x1be   : > { %861 = vmatprep.mubr.bf16.mxu0 %v2211_v1  ;;  %830 = vmatpush1.bf16.msra.mxu0 %v783_v43 }
 0x1bf   : > { %1071 = vmatprep.subr.bf16.mxu0 %v2106_v45 }
 0x290   : > { %v2350_v34 = vpop.f32.mrb[0].mxu0 }
 0x291   : > { %v700_v35 = vmul.f32 %v2350_v34, %v2350_v34  ;;  %v2051_v36 = vpop.f32.mrb[1].mxu0 }
 0x293   : > { %706 = vrot.lane.b32.xlu1 %v700_v35, %s2217_s29  ;;  %702 = vrot.lane.b32.xlu0 %v700_v35, %s2212_s16 }
 0x2b7   : > { %586 = vadd.xlane.f32.xlu1 %v585_v49 }
 0x305   : > { %v703_v50 = vpop.permute.xlu0 %702  ;;  %v707_v52 = vpop.permute.xlu1 %706 }
 0x306   : > { %v705_v51 = vadd.f32 %v703_v50, %v700_v35  ;;  %v1907_v35 = vld [vmem:[%s2659_s5] ss:$0 sm:$0xff] }
 0x308   : > { %v709_v53 = vadd.f32 %v707_v52, %v705_v51 }
 0x30a   : > { %v710_v54 = vmax.f32 %v709_v53, 1e-08  ;;  %v1124_v53 = vsub.s32 2, %v2348_v31 }
 0x30c   : > { %2185 = vrsqrt.f32 %v710_v54  ;;  %vm713_vm5 = vcmp.eq.f32.partialorder %v710_v54, inf  ;;  %v716_v57 = vand.u32 2147483648, %v710_v54  ;;  %vm715_vm6 = vcmp.eq.f32.partialorder %v710_v54, 0.0 }
 0x316   : > { %v2186_v55 = vpop.eup %2185 }
 0x317   : > { %v712_v56 = vmul.f32 %v2186_v55, %v710_v54 }
 0x319   : > { %v714_v58 = vsel %vm713_vm5, %v710_v54, %v712_v56  ;;  %v2501_v54 = vld [vmem:[%s2663_s9] sm:$0xf] }
 0x31a   : > { %v717_v59 = vsel %vm715_vm6, %v716_v57, %v714_v58  ;;  %v1125_v55 = vrot.slane %v2501_v54, %v1124_v53 }
 0x31b   : > { %v752_v62 = vpack.c.bf16 %v717_v59, %v717_v59 }
 0x31d   : > { %1912 = vmatmul.mubr.msk.bf16.vlgmr.msra.gmra.mrb[0].mxu1 %vm771_vm7, %v752_v62  ;;  %1914 = vmatmul.mubr.msk.bf16.vlgmr.msra.gmra.mrb[4].mxu0 %vm771_vm7, %v752_v62 }
 0x31e   : > { %1031 = vmatpush1.bf16.msra.mxu1 %v2101_v60  ;;  %1072 = vmatpush1.bf16.msra.mxu0 %v2104_v61 }
 0x31f   : > { %1032 = vmatprep.subr.bf16.mxu1 %v2109_v63  ;;  %1073 = vmatprep.subr.bf16.mxu0 %v2112_v0 }
 0x320   : > { %1062 = vmatprep.mubr.bf16.mxu1 %v2211_v1  ;;  %1103 = vmatprep.mubr.bf16.mxu0 %v2211_v1  ;;  %v2124_v1 = vld [vmem:[%s2661_s7 + $0x6c] ss:$16 sps:$4 sm:$0xff]  }
 0x322   : > { %1033 = vmatpush1.bf16.msra.mxu1 %v2107_v2  ;;  %1074 = vmatpush1.bf16.msra.mxu0 %v2110_v3 }
 0x323   : > { %1034 = vmatprep.subr.bf16.mxu1 %v2115_v4  ;;  %1075 = vmatprep.subr.bf16.mxu0 %v2118_v5 }
 0x326   : > { %1035 = vmatpush1.bf16.msra.mxu1 %v2113_v6  ;;  %1076 = vmatpush1.bf16.msra.mxu0 %v2116_v7 }
 0x327   : > { %1036 = vmatprep.subr.bf16.mxu1 %v2121_v8  ;;  %1077 = vmatprep.subr.bf16.mxu0 %v2124_v1 }
 0x32a   : > { %1037 = vmatpush1.bf16.msra.mxu1 %v2119_v9  ;;  %1078 = vmatpush1.bf16.msra.mxu0 %v2122_v10  ;;  %v1257_v9 = vld [vmem:[%s2665_s11] sm:$0xff]  ;;  %v1258_v10 = vld [vmem:[%s2665_s11 + $0x8] sm:$0xf] }
 0x32b   : > { %1038 = vmatprep.subr.bf16.mxu1 %v2127_v11  ;;  %1079 = vmatprep.subr.bf16.mxu0 %v2130_v12  ;;  %v2077_v11 = vpack.c.bf16 %v1258_v10, %v1257_v9 }
 0x32e   : > { %1039 = vmatpush1.bf16.msra.mxu1 %v2125_v13  ;;  %1080 = vmatpush1.bf16.msra.mxu0 %v2128_v14 }
 0x32f   : > { %1040 = vmatprep.subr.bf16.mxu1 %v2133_v15  ;;  %1081 = vmatprep.subr.bf16.mxu0 %v2136_v16 }
 0x332   : > { %1041 = vmatpush1.bf16.msra.mxu1 %v2131_v17  ;;  %1082 = vmatpush1.bf16.msra.mxu0 %v2134_v18 }
 0x333   : > { %1042 = vmatprep.subr.bf16.mxu1 %v2139_v19  ;;  %1083 = vmatprep.subr.bf16.mxu0 %v2142_v20 }
 0x336   : > { %1043 = vmatpush1.bf16.msra.mxu1 %v2137_v21  ;;  %1084 = vmatpush1.bf16.msra.mxu0 %v2140_v23 }
 0x337   : > { %1044 = vmatprep.subr.bf16.mxu1 %v2145_v24  ;;  %1085 = vmatprep.subr.bf16.mxu0 %v2148_v25 }
 0x33a   : > { %1045 = vmatpush1.bf16.msra.mxu1 %v2143_v26  ;;  %1086 = vmatpush1.bf16.msra.mxu0 %v2146_v27  ;;  %v2149_v26 = vld [vmem:[%s2666_s12 + $0x40] sm:$0xff]  }
 0x33b   : > { %2072 = vmatprep.subr.bf16.mxu1 %v2218_v28  ;;  %2076 = vmatprep.subr.bf16.mxu0 %v2218_v28  ;;  %v1120_v28 = vsub.s32 1, %v2348_v31 }
 0x344   : > { %v587_v29 = vpop.xlane.xlu1 %586 }
 0x345   : > { %v588_v30 = vmul.f32 0.0078125, %v587_v29  ;;  %v1121_v29 = vrot.slane %v2501_v54, %v1120_v28  ;;  %v2174_v28 = vld [vmem:[%s2666_s12 + $0xa0] sm:$0xff]  }
 0x347   : > { %v589_v32 = vadd.f32 1e-05, %v588_v30 }
 0x349   : > { %2187 = vrsqrt.f32 %v589_v32 }
 0x353   : > { %v2188_v33 = vpop.eup %2187 }
 0x354   : > { %v591_v36 = vmul.f32 %v2188_v33, %v2367_v48 }
 0x356   : > { %v596_v38 = vmul.f32 %v1907_v35, %v591_v36 }
 0x358   : > { %v2478_v41 = vadd.f32 %v1908_v37, %v596_v38  ;;  %v2150_v38 = vld [vmem:[%s2666_s12] sm:$0xff]  }
 0x35a   : > { %v750_v43 = vpack.c.bf16 %v2478_v41, %v2478_v41 }
 0x35c   : > { %1063 = vmatmul.mubr.bf16.vlgmr.msra.gmra.mrb[4].mxu1 %v750_v43  ;;  %1104 = vmatmul.mubr.bf16.vlgmr.msra.gmra.mrb[8].mxu0 %v750_v43  ;;  %v2152_v43 = vld [vmem:[%s2666_s12 + $0x8] sm:$0xff]  }
 0x35d   : > { %2075 = vmatpush3.bf16.msk.msra.mxu1 %vm2482_vm10, %v2073_v42  ;;  %2056 = vmatprep.mubr.msk.f32.mxu1 %vm2215_vm2, %v2214_v22 }
 0x35e   : > { %2063 = vmatprep.mubr.msk.f32.mxu0 %vm2215_vm2, %v2214_v22  ;;  %2066 = vmatprep.subr.bf16.mxu1 %v2214_v22 }
 0x35f   : > { %2079 = vmatpush3.bf16.msk.msra.mxu0 %vm2482_vm10, %v2077_v11 }
 0x360   : > { %2003 = vmatprep.subr.bf16.mxu0 %v2149_v26  ;;  %v2172_v26 = vld [vmem:[%s2666_s12 + $0x98] sm:$0xff]  }
 0x364   : > { %2057 = vmatmul.mubr.msk.f32.vlgmr.msra.gmra.mrb[8].mxu1 %vm1144_vm11, %v2350_v34  ;;  %v1128_v34 = vsub.s32 3, %v2348_v31 }
 0x365   : > { %2068 = vmatprep.mubr.msk.bf16.mxu1 %vm2215_vm2, %v2214_v22 }
 0x366   : > { %v1129_v57 = vrot.slane %v2501_v54, %v1128_v34  ;;  %v2161_v34 = vld [vmem:[%s2666_s12 + $0x70] sm:$0xff]  }
 0x3f0   : > { %v822_v45 = vpop.f32.mrb[0].mxu1  ;;  %v863_v46 = vpop.f32.mrb[4].mxu0 }
 0x3f1   : > { %v824_v47 = vpop.f32.mrb[1].mxu1  ;;  %v865_v48 = vpop.f32.mrb[5].mxu0 }
 0x3f2   : > { %v826_v49 = vpop.f32.mrb[2].mxu1  ;;  %v867_v50 = vpop.f32.mrb[6].mxu0 }
 0x3f3   : > { %v827_v51 = vpop.f32.mrb[3].mxu1  ;;  %v868_v52 = vpop.f32.mrb[7].mxu0  ;;  %v2158_v49 = vld [vmem:[%s2666_s12 + $0x20] sm:$0xff]   ;;  %v1116_v50 = vsub.s32 0, %v2348_v31  ;;  %v2162_v31 = vld [vmem:[%s2666_s12 + $0x30] sm:$0xff]  }
 0x3f4   : > { %v2159_v51 = vld [vmem:[%s2666_s12 + $0x68] sm:$0xff]  }
 0x3f5   : > { %v2160_v52 = vld [vmem:[%s2666_s12 + $0x28] sm:$0xff]   ;;  %v1117_v53 = vrot.slane %v2501_v54, %v1116_v50  ;;  %v2164_v54 = vld [vmem:[%s2666_s12 + $0x38] sm:$0xff]   ;;  %v1985_v50 = vld [vmem:[%s2659_s5 + $0x2] ss:$0 sm:$0xff] }
 0x42f   : > { %v1064_v22 = vpop.f32.mrb[4].mxu1  ;;  %v1105_v56 = vpop.f32.mrb[8].mxu0 }
 0x430   : > { %v2506_v58 = vadd.f32 %v1064_v22, %v822_v45  ;;  %v1106_v59 = vadd.f32 %v1105_v56, %v863_v46  ;;  %v1066_v60 = vpop.f32.mrb[5].mxu1  ;;  %v1107_v61 = vpop.f32.mrb[9].mxu0  ;;  %v2154_v45 = vld [vmem:[%s2666_s12 + $0x10] sm:$0xff]   ;;  %v2155_v46 = vld [vmem:[%s2666_s12 + $0x58] sm:$0xff]  }
 0x431   : > { %v1067_v62 = vadd.f32 %v1066_v60, %v824_v47  ;;  %v1108_v63 = vadd.f32 %v1107_v61, %v865_v48  ;;  %v1068_v0 = vpop.f32.mrb[6].mxu1  ;;  %v1109_v2 = vpop.f32.mrb[10].mxu0  ;;  %v2156_v47 = vld [vmem:[%s2666_s12 + $0x18] sm:$0xff]   ;;  %v2157_v48 = vld [vmem:[%s2666_s12 + $0x60] sm:$0xff]  }
 0x432   : > { %v2508_v3 = vadd.f32 %v1125_v55, %v1106_v59  ;;  %v1069_v4 = vpop.f32.mrb[7].mxu1  ;;  %v1110_v5 = vpop.f32.mrb[11].mxu0  ;;  %v1134_v55 = vadd.f32 %v1117_v53, %v2506_v58  ;;  %v2163_v22 = vld [vmem:[%s2666_s12 + $0x78] sm:$0xff]   ;;  %v1421_v59 = vld [vmem:[%s2667_s13] sm:$0x3] }
 0x433   : > { %v2510_v6 = vadd.f32 %v1129_v57, %v1108_v63  ;;  %v1135_v30 = vadd.f32 %v1121_v29, %v1067_v62  ;;  %v2165_v58 = vld [vmem:[%s2666_s12 + $0xc0] sm:$0xff]   ;;  %v1427_v60 = vsel %vm775_vm4, %v1421_v59, 0  ;;  %v2175_v29 = vld [vmem:[%s2666_s12 + $0xe8] sm:$0xff]  }
 0x434   : > { %v1138_v56 = vmax.f32 %v1134_v55, 0.0  ;;  %2067 = vmatpush3.bf16.msra.mxu1 %v1427_v60  ;;  %v1986_v59 = vld [vmem:[%s2659_s5 + $0x3] ss:$0 sm:$0xff] }
 0x435   : > { %v1139_v33 = vmax.f32 %v1135_v30, 0.0  ;;  %2025 = vmatprep.subr.bf16.mxu1 %v2165_v58  ;;  %v2176_v30 = vld [vmem:[%s2666_s12 + $0xa8] sm:$0xff]  }
 0x436   : > { %v1417_v57 = vpack.c.bf16 %v1138_v56, %v1138_v56 }
 0x437   : > { %v1218_v7 = vpop.f32.mrb[8].mxu1  ;;  %v1418_v42 = vpack.c.bf16 %v1139_v33, %v1139_v33  ;;  %v2178_v33 = vld [vmem:[%s2666_s12 + $0xb0] sm:$0xff]  }
 0x438   : > { %v1222_v8 = vmul.f32 %v1218_v7, %v1218_v7  ;;  %v2058_v1 = vpop.f32.mrb[9].mxu1 }
 0x43a   : > { %1224 = vrot.lane.b32.xlu0 %v1222_v8, %s2212_s16 }
 0x43e   : > { %1228 = vrot.lane.b32.xlu0 %v1222_v8, %s2217_s29 }
 0x4ac   : > { %v1225_v12 = vpop.permute.xlu0 %1224 }
 0x4ad   : > { %v1227_v13 = vadd.f32 %v1225_v12, %v1222_v8 }
 0x4b0   : > { %v1229_v14 = vpop.permute.xlu0 %1228 }
 0x4b1   : > { %v1231_v15 = vadd.f32 %v1229_v14, %v1227_v13  ;;  %v1141_v14 = vmax.f32 %v2510_v6, 0.0  ;;  %v2168_v6 = vld [vmem:[%s2666_s12 + $0x88] sm:$0xff]  }
 0x4b3   : > { %v1232_v16 = vmax.f32 %v1231_v15, 1e-08 }
 0x4b5   : > { %2189 = vrsqrt.f32 %v1232_v16  ;;  %vm1235_vm12 = vcmp.eq.f32.partialorder %v1232_v16, inf  ;;  %v1238_v19 = vand.u32 2147483648, %v1232_v16  ;;  %vm1237_vm13 = vcmp.eq.f32.partialorder %v1232_v16, 0.0 }
 0x4bf   : > { %v2190_v17 = vpop.eup %2189 }
 0x4c0   : > { %v1234_v18 = vmul.f32 %v2190_v17, %v1232_v16 }
 0x4c2   : > { %v1236_v20 = vsel %vm1235_vm12, %v1232_v16, %v1234_v18  ;;  %v2166_v18 = vld [vmem:[%s2666_s12 + $0x80] sm:$0xff]  }
 0x4c3   : > { %v1239_v21 = vsel %vm1237_vm13, %v1238_v19, %v1236_v20  ;;  %v2167_v20 = vld [vmem:[%s2666_s12 + $0xc8] sm:$0xff]  }
 0x4c4   : > { %v1949_v23 = vmul.f32 -1.442695, %v1239_v21  ;;  %v1420_v21 = vpack.c.bf16 %v1141_v14, %v1141_v14 }
 0x4c6   : > { %2191 = vpow2.f32 %v1949_v23  ;;  %v2169_v23 = vld [vmem:[%s2666_s12 + $0xd0] sm:$0xff]  }
 0x4d0   : > { %v2192_v24 = vpop.eup %2191 }
 0x4d1   : > { %v1243_v25 = vadd.f32 1.0, %v2192_v24  ;;  %v2170_v24 = vld [vmem:[%s2666_s12 + $0x90] sm:$0xff]  }
 0x4d3   : > { %2193 = vrcp.f32 %v1243_v25  ;;  %v2171_v25 = vld [vmem:[%s2666_s12 + $0xd8] sm:$0xff]  }
 0x4dd   : > { %v2194_v27 = vpop.eup %2193 }
 0x4de   : > { %1247 = vrot.lane.b32.xlu0 %v2194_v27, %s2220_s25 }
 0x4e2   : > { %1250 = vrot.lane.b32.xlu0 %v2194_v27, %s2221_s26 }
 0x550   : > { %v1248_v32 = vpop.permute.xlu0 %1247 }
 0x551   : > { %v1253_v35 = vsel %vm771_vm7, %v2194_v27, %v1248_v32  ;;  %v2173_v27 = vld [vmem:[%s2666_s12 + $0xe0] sm:$0xff]   ;;  %v2177_v32 = vld [vmem:[%s2666_s12 + $0xf0] sm:$0xff]  }
 0x554   : > { %v1251_v36 = vpop.permute.xlu0 %1250 }
 0x555   : > { %v1255_v37 = vsel %vm1254_vm14, %v1253_v35, %v1251_v36  ;;  %v2179_v35 = vld [vmem:[%s2666_s12 + $0xf8] sm:$0xff]  }
 0x556   : > { %v1256_v39 = vmul.f32 %v1255_v37, %v1218_v7  ;;  %v2180_v36 = vld [vmem:[%s2666_s12 + $0xb8] sm:$0xff]   ;;  %v1140_v37 = vmax.f32 %v2508_v3, 0.0 }
 0x558   : > { %2064 = vmatmul.mubr.msk.f32.vlgmr.msra.gmra.mrb[2].mxu0 %vm1144_vm11, %v1256_v39 }
 0x559   : > { %2004 = vmatpush3.bf16.msra.mxu0 %v2150_v38  ;;  %1693 = vmatprep.mubr.bf16.mxu0 %v1418_v42  ;;  %v1419_v38 = vpack.c.bf16 %v1140_v37, %v1140_v37 }
 0x55a   : > { %2005 = vmatprep.subr.bf16.mxu0 %v2151_v40 }
 0x55d   : > { %2006 = vmatpush3.bf16.msra.mxu0 %v2152_v43 }
 0x55e   : > { %2007 = vmatprep.subr.bf16.mxu0 %v2153_v44 }
 0x561   : > { %2008 = vmatpush3.bf16.msra.mxu0 %v2154_v45 }
 0x562   : > { %2009 = vmatprep.subr.bf16.mxu0 %v2155_v46 }
 0x565   : > { %2010 = vmatpush3.bf16.msra.mxu0 %v2156_v47 }
 0x566   : > { %2011 = vmatprep.subr.bf16.mxu0 %v2157_v48 }
 0x569   : > { %2012 = vmatpush3.bf16.msra.mxu0 %v2158_v49 }
 0x56a   : > { %2013 = vmatprep.subr.bf16.mxu0 %v2159_v51 }
 0x56d   : > { %2014 = vmatpush3.bf16.msra.mxu0 %v2160_v52 }
 0x56e   : > { %2015 = vmatprep.subr.bf16.mxu0 %v2161_v34 }
 0x571   : > { %2016 = vmatpush3.bf16.msra.mxu0 %v2162_v31 }
 0x572   : > { %2017 = vmatprep.subr.bf16.mxu0 %v2163_v22 }
 0x575   : > { %2018 = vmatpush3.bf16.msra.mxu0 %v2164_v54 }
 0x578   : > { %1694 = vmatmul.mubr.bf16.vlgmr.msra.gmra.mrb[12].mxu0 %v1417_v57 }
 0x62b   : > { %v1331_v61 = vpop.f32.mrb[2].mxu0 }
 0x62c   : > { %v1335_v62 = vmul.f32 %v1331_v61, %v1331_v61  ;;  %v2065_v63 = vpop.f32.mrb[3].mxu0  ;;  %v1988_v61 = vld [vmem:[%s2659_s5 + $0x5] ss:$0 sm:$0xff] }
 0x62e   : > { %1337 = vrot.lane.b32.xlu0 %v1335_v62, %s2212_s16 }
 0x632   : > { %1341 = vrot.lane.b32.xlu0 %v1335_v62, %s2217_s29 }
 0x64b   : > { %v2019_v0 = vpop.f32.mrb[12].mxu0 }
 0x64c   : > { %v2020_v2 = vpop.f32.mrb[13].mxu0 }
 0x64d   : > { %v2021_v4 = vadd.f32 %v2020_v2, %v2019_v0  ;;  %v2022_v5 = vpop.f32.mrb[14].mxu0  ;;  %v1989_v0 = vld [vmem:[#allocation2] ss:$0 sm:$0xff] }
 0x64e   : > { %v2023_v7 = vpop.f32.mrb[15].mxu0 }
 0x6a0   : > { %v1338_v8 = vpop.permute.xlu0 %1337 }
 0x6a1   : > { %v1340_v1 = vadd.f32 %v1338_v8, %v1335_v62 }
 0x6a4   : > { %v1342_v9 = vpop.permute.xlu0 %1341 }
 0x6a5   : > { %v1344_v10 = vadd.f32 %v1342_v9, %v1340_v1 }
 0x6a7   : > { %v1345_v11 = vmax.f32 %v1344_v10, 1e-08 }
 0x6a9   : > { %2195 = vrsqrt.f32 %v1345_v11  ;;  %vm1348_vm15 = vcmp.eq.f32.partialorder %v1345_v11, inf  ;;  %v1351_v15 = vand.u32 2147483648, %v1345_v11  ;;  %vm1350_vm0 = vcmp.eq.f32.partialorder %v1345_v11, 0.0 }
 0x6b3   : > { %v2196_v12 = vpop.eup %2195 }
 0x6b4   : > { %v1347_v13 = vmul.f32 %v2196_v12, %v1345_v11 }
 0x6b6   : > { %v1349_v16 = vsel %vm1348_vm15, %v1345_v11, %v1347_v13 }
 0x6b7   : > { %v1352_v17 = vsel %vm1350_vm0, %v1351_v15, %v1349_v16 }
 0x6b8   : > { %v1422_v19 = vpack.c.bf16 %v1352_v17, %v1352_v17 }
 0x6ba   : > { %2069 = vmatmul.mubr.msk.bf16.vlgmr.msra.gmra.mrb[12].mxu1 %vm771_vm7, %v1422_v19 }
 0x6bb   : > { %2026 = vmatpush3.bf16.msra.mxu1 %v2166_v18  ;;  %1733 = vmatprep.mubr.bf16.mxu1 %v1420_v21 }
 0x6bc   : > { %2027 = vmatprep.subr.bf16.mxu1 %v2167_v20 }
 0x6bf   : > { %2028 = vmatpush3.bf16.msra.mxu1 %v2168_v6 }
 0x6c0   : > { %2029 = vmatprep.subr.bf16.mxu1 %v2169_v23 }
 0x6c3   : > { %2030 = vmatpush3.bf16.msra.mxu1 %v2170_v24 }
 0x6c4   : > { %2031 = vmatprep.subr.bf16.mxu1 %v2171_v25 }
 0x6c7   : > { %2032 = vmatpush3.bf16.msra.mxu1 %v2172_v26 }
 0x6c8   : > { %2033 = vmatprep.subr.bf16.mxu1 %v2173_v27 }
 0x6cb   : > { %2034 = vmatpush3.bf16.msra.mxu1 %v2174_v28 }
 0x6cc   : > { %2035 = vmatprep.subr.bf16.mxu1 %v2175_v29 }
 0x6cf   : > { %2036 = vmatpush3.bf16.msra.mxu1 %v2176_v30 }
 0x6d0   : > { %2037 = vmatprep.subr.bf16.mxu1 %v2177_v32 }
 0x6d3   : > { %2038 = vmatpush3.bf16.msra.mxu1 %v2178_v33 }
 0x6d4   : > { %2039 = vmatprep.subr.bf16.mxu1 %v2179_v35 }
 0x6d7   : > { %2040 = vmatpush3.bf16.msra.mxu1 %v2180_v36 }
 0x6da   : > { %1734 = vmatmul.mubr.bf16.vlgmr.msra.gmra.mrb[16].mxu1 %v1419_v38 }
 0x78d   : > { %v1463_v39 = vpop.f32.mrb[12].mxu1 }
 0x78e   : > { %v1696_v40 = vadd.f32 %v2021_v4, %v1463_v39  ;;  %v2070_v42 = vpop.f32.mrb[13].mxu1 }
 0x78f   : > { %v1466_v43 = vpop.f32.mrb[14].mxu1 }
 0x790   : > { %v2071_v44 = vpop.f32.mrb[15].mxu1 }
 0x7ad   : > { %v2041_v45 = vpop.f32.mrb[16].mxu1 }
 0x7ae   : > { %v2042_v46 = vpop.f32.mrb[17].mxu1 }
 0x7af   : > { %v2043_v47 = vadd.f32 %v2042_v46, %v2041_v45  ;;  %v2044_v48 = vpop.f32.mrb[18].mxu1 }
 0x7b0   : > { %v2045_v49 = vpop.f32.mrb[19].mxu1 }
 0x7b1   : > { %v1736_v51 = vadd.f32 %v2043_v47, %v1696_v40 }
 0x7b3   : > { %v1746_v3 = vadd.f32 %v1985_v50, %v1736_v51 }
 0x7b5   : > { %v1747_v52 = vadd.f32 %v1746_v3, %v2478_v41  ;;  %v1987_v41 = vld [vmem:[%s2659_s5 + $0x4] ss:$0 sm:$0xff] }
 0x7b7   : > { %1750 = vadd.xlane.f32.xlu0 %v1747_v52 }
 0x844   : > { %v1751_v53 = vpop.xlane.xlu0 %1750 }
 0x845   : > { %v1752_v34 = vmul.f32 0.0078125, %v1751_v53 }
 0x847   : > { %v1753_v31 = vsub.f32 %v1747_v52, %v1752_v34 }
 0x849   : > { %v1754_v55 = vmul.f32 %v1753_v31, %v1753_v31 }
 0x84b   : > { %1755 = vadd.xlane.f32.xlu1 %v1754_v55 }
 0x8d8   : > { %v1756_v22 = vpop.xlane.xlu1 %1755 }
 0x8d9   : > { %v1757_v54 = vmul.f32 0.0078125, %v1756_v22 }
 0x8db   : > { %v1758_v56 = vadd.f32 1e-05, %v1757_v54 }
 0x8dd   : > { %2197 = vrsqrt.f32 %v1758_v56 }
 0x8e7   : > { %v2198_v57 = vpop.eup %2197 }
 0x8e8   : > { %v1760_v58 = vmul.f32 %v2198_v57, %v1753_v31 }
 0x8ea   : > { %v1765_v60 = vmul.f32 %v1986_v59, %v1760_v58 }
 0x8ec   : > { %v1770_v62 = vadd.f32 %v1987_v41, %v1765_v60 }
 0x8ee   : > { %v1776_v63 = vmul.f32 %v1988_v61, %v1770_v62 }
 0x8f0   : > { %1777 = vadd.xlane.f32.xlu1 %v1776_v63 }
 0x97d   : > { %v1778_v2 = vpop.xlane.xlu1 %1777 }
 0x97e   : > { %v1786_v4 = vadd.f32 %v1989_v0, %v1778_v2 }
 0x980   : > { %v1990_v5 = vmul.f32 -1.442695, %v1786_v4 }
 0x982   : > { %2199 = vpow2.f32 %v1990_v5 }
 0x98c   : > { %v2200_v7 = vpop.eup %2199 }
 0x98d   : > { %v1790_v8 = vadd.f32 1.0, %v2200_v7 }
 0x98f   : > { %2201 = vrcp.f32 %v1790_v8 }
 0x999   : > { %v2202_v1 = vpop.eup %2201 }
 0x99a   : > { %1794 = vst.msk [vmem:[%s559_s23] sm:$0xff] %vm1793_vm1, %v2202_v1 }
 0x99b PF: > { %s27_s20 = sadd.s32 1, %s2209_s20  }
 0x99c   : > { %p24_p4 = scmp.ge.s32.totalorder %s27_s20, 4  }
 0x99e   :  { %26 = sbr.rel (!%p24_p4) target bundleno = 3 (0x3), region = 122 }

</bundles_post_ra>
